<compile_context>
chip_gen: v7x
topology: tpu7x:2x2x1
jax: 0.10.0
libtpu: 0.0.40
codegen_flags: <defaults>
</compile_context>

<pallas_src>
import jax
import jax.numpy as jnp
import numpy as np
from jax.experimental import pallas as pl
from jax.experimental.pallas import tpu as pltpu

CLAMP_MIN = 1.1    # torch.clamp min (applied first)
CLAMP_MAX = -0.9   # torch.clamp max (applied second; wins because min > max)
KH = KW = 2
STRIDE = 2
PADDING = 2


def conv_clamp_relu_kernel(x_ref, rsel_ref, csel_ref, w_ref, b_ref, o_ref):
    """Fused Conv2d(k=2, s=2, p=2) + clamp(1.1, -0.9) + relu, all in-kernel.

    x_ref   : (N, Cin, H, W)     VMEM  input, native NCHW
    rsel_ref: (KH, OH, H)        VMEM  row-selection matrices (encode pad + stride)
    csel_ref: (KW, W, OW)        VMEM  col-selection matrices (encode pad + stride)
    w_ref   : (Cout*Cin*KH*KW,)  SMEM  conv weights, flat row-major (co, ci, kh, kw)
    b_ref   : (Cout,)            SMEM  bias
    o_ref   : (N, Cout, OH, OW)  VMEM  output, native NCHW
    """
    N, Cin, H, W = x_ref.shape
    kh_n, OH, _ = rsel_ref.shape
    kw_n, _, OW = csel_ref.shape
    Cout = o_ref.shape[1]

    for n in range(N):
        # In-kernel im2col: taps[ci][kh*kw_n+kw][oh, ow] == xpad[n, ci, s*oh+kh, s*ow+kw]
        # (zero where the window lands in the padding), via two tiny MXU matmuls.
        taps = []
        for ci in range(Cin):
            x_nc = x_ref[n, ci]                                              # (H, W)
            per_ci = []
            for kh in range(kh_n):
                a = jnp.dot(rsel_ref[kh], x_nc,
                            preferred_element_type=jnp.float32)             # (OH, W)
                for kw in range(kw_n):
                    per_ci.append(
                        jnp.dot(a, csel_ref[kw],
                                preferred_element_type=jnp.float32))        # (OH, OW)
            taps.append(per_ci)

        for co in range(Cout):
            acc = jnp.zeros((OH, OW), dtype=jnp.float32)
            for ci in range(Cin):
                for kh in range(kh_n):
                    for kw in range(kw_n):
                        wv = w_ref[((co * Cin + ci) * kh_n + kh) * kw_n + kw]
                        acc = acc + wv * taps[ci][kh * kw_n + kw]
            acc = acc + b_ref[co]
            # torch.clamp(x, min, max): min applied first, then max (max wins here).
            acc = jnp.maximum(acc, CLAMP_MIN)
            acc = jnp.minimum(acc, CLAMP_MAX)
            acc = jnp.maximum(acc, 0.0)            # relu
            o_ref[n, co] = acc.astype(o_ref.dtype)


def prepare_conv_params(weight, bias, H, W, *, stride=STRIDE, padding=PADDING):
    """One-time (hoisted) parameter prep: selection matrices + flat weights."""
    weight = np.asarray(weight, np.float32)
    bias = np.asarray(bias, np.float32)
    Cout, Cin, kh_n, kw_n = weight.shape
    OH = (H + 2 * padding - kh_n) // stride + 1
    OW = (W + 2 * padding - kw_n) // stride + 1

    rsel = np.zeros((kh_n, OH, H), np.float32)
    for kh in range(kh_n):
        for oh in range(OH):
            h = oh * stride + kh - padding
            if 0 <= h < H:
                rsel[kh, oh, h] = 1.0

    csel = np.zeros((kw_n, W, OW), np.float32)
    for kw in range(kw_n):
        for ow in range(OW):
            w = ow * stride + kw - padding
            if 0 <= w < W:
                csel[kw, w, ow] = 1.0

    return (jnp.asarray(rsel), jnp.asarray(csel),
            jnp.asarray(weight.reshape(-1)), jnp.asarray(bias))


@jax.jit
def conv2d_clamp_relu(x, rsel, csel, w_flat, bias):
    N, Cin, H, W = x.shape
    kh_n, OH, _ = rsel.shape
    kw_n, _, OW = csel.shape
    Cout = bias.shape[0]

    return pl.pallas_call(
        conv_clamp_relu_kernel,
        out_shape=jax.ShapeDtypeStruct((N, Cout, OH, OW), x.dtype),
        grid=(1,),
        in_specs=[
            pl.BlockSpec((N, Cin, H, W), lambda i: (0, 0, 0, 0)),
            pl.BlockSpec((kh_n, OH, H), lambda i: (0, 0, 0)),
            pl.BlockSpec((kw_n, W, OW), lambda i: (0, 0, 0)),
            pl.BlockSpec(memory_space=pltpu.MemorySpace.SMEM),
            pl.BlockSpec(memory_space=pltpu.MemorySpace.SMEM),
        ],
        out_specs=pl.BlockSpec((N, Cout, OH, OW), lambda i: (0, 0, 0, 0)),
        compiler_params=pltpu.CompilerParams(
            dimension_semantics=("arbitrary",)),
    )(x, rsel, csel, w_flat, bias)


if __name__ == "__main__":
    key = jax.random.PRNGKey(0)
    kx, kw_, kb = jax.random.split(key, 3)

    # Deterministic Conv2d(3, 11, k=2) parameters and a small NCHW input
    # consistent with the module's default (N, 3, 10, 10); batch = 2.
    weight = jax.random.normal(kw_, (11, 3, 2, 2), dtype=jnp.float32) * 0.1
    bias = jax.random.normal(kb, (11,), dtype=jnp.float32) * 0.1
    x = jax.random.normal(kx, (2, 3, 10, 10), dtype=jnp.float32)

    # Hoisted once; only the pallas_call runs per call.
    rsel, csel, w_flat, b = prepare_conv_params(weight, bias, 10, 10)

    y = conv2d_clamp_relu(x, rsel, csel, w_flat, b)
    jax.block_until_ready(y)

    assert y.shape == (2, 11, 7, 7), y.shape

    # Pure-JAX reference of the whole module for a sanity check.
    ref = jax.lax.conv_general_dilated(
        x, weight, window_strides=(STRIDE, STRIDE),
        padding=((PADDING, PADDING), (PADDING, PADDING)),
        dimension_numbers=("NCHW", "OIHW", "NCHW"))
    ref = ref + bias.reshape(1, -1, 1, 1)
    ref = jnp.maximum(ref, CLAMP_MIN)
    ref = jnp.minimum(ref, CLAMP_MAX)
    ref = jnp.maximum(ref, 0.0)
    assert bool(jnp.allclose(y, ref, atol=1e-6)), float(jnp.max(jnp.abs(y - ref)))
    # clamp(min=1.1, max=-0.9) followed by relu forces every finite element to 0.
    assert bool(jnp.all(y == 0.0))
    print("KERNEL_OK")
</pallas_src>

<mosaic_0001>
module attributes {stable_mosaic.version = 11 : i64} {
  func.func @conv_clamp_relu_kernel(%arg0: i32, %arg1: memref<2x3x10x10xf32, #tpu.memory_space<vmem>>, %arg2: memref<2x7x10xf32, #tpu.memory_space<vmem>>, %arg3: memref<2x10x7xf32, #tpu.memory_space<vmem>>, %arg4: memref<132xf32, #tpu.memory_space<smem>>, %arg5: memref<11xf32, #tpu.memory_space<smem>>, %arg6: memref<2x11x7x7xf32, #tpu.memory_space<vmem>>) attributes {dimension_semantics = [#tpu.dimension_semantics<arbitrary>], iteration_bounds = array<i64: 1>, scalar_prefetch = 0 : i64, scratch_operands = 0 : i64, tpu.core_type = #tpu.core_type<tc>, window_params = [{pipeline_mode = #tpu.pipeline_mode<synchronous>, transform_indices = @transform_0, window_bounds = array<i64: 2, 3, 10, 10>}, {pipeline_mode = #tpu.pipeline_mode<synchronous>, transform_indices = @transform_1, window_bounds = array<i64: 2, 7, 10>}, {pipeline_mode = #tpu.pipeline_mode<synchronous>, transform_indices = @transform_2, window_bounds = array<i64: 2, 10, 7>}, {transform_indices = @transform_3, window_bounds = array<i64: 132>}, {transform_indices = @transform_4, window_bounds = array<i64: 11>}, {pipeline_mode = #tpu.pipeline_mode<synchronous>, transform_indices = @transform_5, window_bounds = array<i64: 2, 11, 7, 7>}]} {
    %c0 = arith.constant 0 : index
    %c0_0 = arith.constant 0 : index
    %c0_1 = arith.constant 0 : index
    %c0_2 = arith.constant 0 : index
    %0 = vector.load %arg1[%c0, %c0_0, %c0_1, %c0_2] : memref<2x3x10x10xf32, #tpu.memory_space<vmem>>, vector<1x1x10x10xf32>
    %1 = vector.shape_cast %0 : vector<1x1x10x10xf32> to vector<10x10xf32>
    %c0_3 = arith.constant 0 : index
    %c0_4 = arith.constant 0 : index
    %c0_5 = arith.constant 0 : index
    %2 = vector.load %arg2[%c0_3, %c0_4, %c0_5] : memref<2x7x10xf32, #tpu.memory_space<vmem>>, vector<1x7x10xf32>
    %3 = vector.shape_cast %2 : vector<1x7x10xf32> to vector<7x10xf32>
    %cst = arith.constant dense<0.000000e+00> : vector<7x10xf32>
    %4 = tpu.matmul %3, %1, %cst {dimension_numbers = #tpu.dot_dimension_numbers<[1], [0], [0], [1], [0, 0, 1, 1], [], []>} : vector<7x10xf32>, vector<10x10xf32>, vector<7x10xf32> -> vector<7x10xf32>
    %c0_6 = arith.constant 0 : index
    %c0_7 = arith.constant 0 : index
    %c0_8 = arith.constant 0 : index
    %5 = vector.load %arg3[%c0_6, %c0_7, %c0_8] : memref<2x10x7xf32, #tpu.memory_space<vmem>>, vector<1x10x7xf32>
    %6 = vector.shape_cast %5 : vector<1x10x7xf32> to vector<10x7xf32>
    %cst_9 = arith.constant dense<0.000000e+00> : vector<7x7xf32>
    %7 = tpu.matmul %4, %6, %cst_9 {dimension_numbers = #tpu.dot_dimension_numbers<[1], [0], [0], [1], [0, 0, 1, 1], [], []>} : vector<7x10xf32>, vector<10x7xf32>, vector<7x7xf32> -> vector<7x7xf32>
    %c1 = arith.constant 1 : index
    %c0_10 = arith.constant 0 : index
    %c0_11 = arith.constant 0 : index
    %8 = vector.load %arg3[%c1, %c0_10, %c0_11] : memref<2x10x7xf32, #tpu.memory_space<vmem>>, vector<1x10x7xf32>
    %9 = vector.shape_cast %8 : vector<1x10x7xf32> to vector<10x7xf32>
    %cst_12 = arith.constant dense<0.000000e+00> : vector<7x7xf32>
    %10 = tpu.matmul %4, %9, %cst_12 {dimension_numbers = #tpu.dot_dimension_numbers<[1], [0], [0], [1], [0, 0, 1, 1], [], []>} : vector<7x10xf32>, vector<10x7xf32>, vector<7x7xf32> -> vector<7x7xf32>
    %c1_13 = arith.constant 1 : index
    %c0_14 = arith.constant 0 : index
    %c0_15 = arith.constant 0 : index
    %11 = vector.load %arg2[%c1_13, %c0_14, %c0_15] : memref<2x7x10xf32, #tpu.memory_space<vmem>>, vector<1x7x10xf32>
    %12 = vector.shape_cast %11 : vector<1x7x10xf32> to vector<7x10xf32>
    %cst_16 = arith.constant dense<0.000000e+00> : vector<7x10xf32>
    %13 = tpu.matmul %12, %1, %cst_16 {dimension_numbers = #tpu.dot_dimension_numbers<[1], [0], [0], [1], [0, 0, 1, 1], [], []>} : vector<7x10xf32>, vector<10x10xf32>, vector<7x10xf32> -> vector<7x10xf32>
    %c0_17 = arith.constant 0 : index
    %c0_18 = arith.constant 0 : index
    %c0_19 = arith.constant 0 : index
    %14 = vector.load %arg3[%c0_17, %c0_18, %c0_19] : memref<2x10x7xf32, #tpu.memory_space<vmem>>, vector<1x10x7xf32>
    %15 = vector.shape_cast %14 : vector<1x10x7xf32> to vector<10x7xf32>
    %cst_20 = arith.constant dense<0.000000e+00> : vector<7x7xf32>
    %16 = tpu.matmul %13, %15, %cst_20 {dimension_numbers = #tpu.dot_dimension_numbers<[1], [0], [0], [1], [0, 0, 1, 1], [], []>} : vector<7x10xf32>, vector<10x7xf32>, vector<7x7xf32> -> vector<7x7xf32>
    %c1_21 = arith.constant 1 : index
    %c0_22 = arith.constant 0 : index
    %c0_23 = arith.constant 0 : index
    %17 = vector.load %arg3[%c1_21, %c0_22, %c0_23] : memref<2x10x7xf32, #tpu.memory_space<vmem>>, vector<1x10x7xf32>
    %18 = vector.shape_cast %17 : vector<1x10x7xf32> to vector<10x7xf32>
    %cst_24 = arith.constant dense<0.000000e+00> : vector<7x7xf32>
    %19 = tpu.matmul %13, %18, %cst_24 {dimension_numbers = #tpu.dot_dimension_numbers<[1], [0], [0], [1], [0, 0, 1, 1], [], []>} : vector<7x10xf32>, vector<10x7xf32>, vector<7x7xf32> -> vector<7x7xf32>
    %c0_25 = arith.constant 0 : index
    %c1_26 = arith.constant 1 : index
    %c0_27 = arith.constant 0 : index
    %c0_28 = arith.constant 0 : index
    %20 = vector.load %arg1[%c0_25, %c1_26, %c0_27, %c0_28] : memref<2x3x10x10xf32, #tpu.memory_space<vmem>>, vector<1x1x10x10xf32>
    %21 = vector.shape_cast %20 : vector<1x1x10x10xf32> to vector<10x10xf32>
    %c0_29 = arith.constant 0 : index
    %c0_30 = arith.constant 0 : index
    %c0_31 = arith.constant 0 : index
    %22 = vector.load %arg2[%c0_29, %c0_30, %c0_31] : memref<2x7x10xf32, #tpu.memory_space<vmem>>, vector<1x7x10xf32>
    %23 = vector.shape_cast %22 : vector<1x7x10xf32> to vector<7x10xf32>
    %cst_32 = arith.constant dense<0.000000e+00> : vector<7x10xf32>
    %24 = tpu.matmul %23, %21, %cst_32 {dimension_numbers = #tpu.dot_dimension_numbers<[1], [0], [0], [1], [0, 0, 1, 1], [], []>} : vector<7x10xf32>, vector<10x10xf32>, vector<7x10xf32> -> vector<7x10xf32>
    %c0_33 = arith.constant 0 : index
    %c0_34 = arith.constant 0 : index
    %c0_35 = arith.constant 0 : index
    %25 = vector.load %arg3[%c0_33, %c0_34, %c0_35] : memref<2x10x7xf32, #tpu.memory_space<vmem>>, vector<1x10x7xf32>
    %26 = vector.shape_cast %25 : vector<1x10x7xf32> to vector<10x7xf32>
    %cst_36 = arith.constant dense<0.000000e+00> : vector<7x7xf32>
    %27 = tpu.matmul %24, %26, %cst_36 {dimension_numbers = #tpu.dot_dimension_numbers<[1], [0], [0], [1], [0, 0, 1, 1], [], []>} : vector<7x10xf32>, vector<10x7xf32>, vector<7x7xf32> -> vector<7x7xf32>
    %c1_37 = arith.constant 1 : index
    %c0_38 = arith.constant 0 : index
    %c0_39 = arith.constant 0 : index
    %28 = vector.load %arg3[%c1_37, %c0_38, %c0_39] : memref<2x10x7xf32, #tpu.memory_space<vmem>>, vector<1x10x7xf32>
    %29 = vector.shape_cast %28 : vector<1x10x7xf32> to vector<10x7xf32>
    %cst_40 = arith.constant dense<0.000000e+00> : vector<7x7xf32>
    %30 = tpu.matmul %24, %29, %cst_40 {dimension_numbers = #tpu.dot_dimension_numbers<[1], [0], [0], [1], [0, 0, 1, 1], [], []>} : vector<7x10xf32>, vector<10x7xf32>, vector<7x7xf32> -> vector<7x7xf32>
    %c1_41 = arith.constant 1 : index
    %c0_42 = arith.constant 0 : index
    %c0_43 = arith.constant 0 : index
    %31 = vector.load %arg2[%c1_41, %c0_42, %c0_43] : memref<2x7x10xf32, #tpu.memory_space<vmem>>, vector<1x7x10xf32>
    %32 = vector.shape_cast %31 : vector<1x7x10xf32> to vector<7x10xf32>
    %cst_44 = arith.constant dense<0.000000e+00> : vector<7x10xf32>
    %33 = tpu.matmul %32, %21, %cst_44 {dimension_numbers = #tpu.dot_dimension_numbers<[1], [0], [0], [1], [0, 0, 1, 1], [], []>} : vector<7x10xf32>, vector<10x10xf32>, vector<7x10xf32> -> vector<7x10xf32>
    %c0_45 = arith.constant 0 : index
    %c0_46 = arith.constant 0 : index
    %c0_47 = arith.constant 0 : index
    %34 = vector.load %arg3[%c0_45, %c0_46, %c0_47] : memref<2x10x7xf32, #tpu.memory_space<vmem>>, vector<1x10x7xf32>
    %35 = vector.shape_cast %34 : vector<1x10x7xf32> to vector<10x7xf32>
    %cst_48 = arith.constant dense<0.000000e+00> : vector<7x7xf32>
    %36 = tpu.matmul %33, %35, %cst_48 {dimension_numbers = #tpu.dot_dimension_numbers<[1], [0], [0], [1], [0, 0, 1, 1], [], []>} : vector<7x10xf32>, vector<10x7xf32>, vector<7x7xf32> -> vector<7x7xf32>
    %c1_49 = arith.constant 1 : index
    %c0_50 = arith.constant 0 : index
    %c0_51 = arith.constant 0 : index
    %37 = vector.load %arg3[%c1_49, %c0_50, %c0_51] : memref<2x10x7xf32, #tpu.memory_space<vmem>>, vector<1x10x7xf32>
    %38 = vector.shape_cast %37 : vector<1x10x7xf32> to vector<10x7xf32>
    %cst_52 = arith.constant dense<0.000000e+00> : vector<7x7xf32>
    %39 = tpu.matmul %33, %38, %cst_52 {dimension_numbers = #tpu.dot_dimension_numbers<[1], [0], [0], [1], [0, 0, 1, 1], [], []>} : vector<7x10xf32>, vector<10x7xf32>, vector<7x7xf32> -> vector<7x7xf32>
    %c0_53 = arith.constant 0 : index
    %c2 = arith.constant 2 : index
    %c0_54 = arith.constant 0 : index
    %c0_55 = arith.constant 0 : index
    %40 = vector.load %arg1[%c0_53, %c2, %c0_54, %c0_55] : memref<2x3x10x10xf32, #tpu.memory_space<vmem>>, vector<1x1x10x10xf32>
    %41 = vector.shape_cast %40 : vector<1x1x10x10xf32> to vector<10x10xf32>
    %c0_56 = arith.constant 0 : index
    %c0_57 = arith.constant 0 : index
    %c0_58 = arith.constant 0 : index
    %42 = vector.load %arg2[%c0_56, %c0_57, %c0_58] : memref<2x7x10xf32, #tpu.memory_space<vmem>>, vector<1x7x10xf32>
    %43 = vector.shape_cast %42 : vector<1x7x10xf32> to vector<7x10xf32>
    %cst_59 = arith.constant dense<0.000000e+00> : vector<7x10xf32>
    %44 = tpu.matmul %43, %41, %cst_59 {dimension_numbers = #tpu.dot_dimension_numbers<[1], [0], [0], [1], [0, 0, 1, 1], [], []>} : vector<7x10xf32>, vector<10x10xf32>, vector<7x10xf32> -> vector<7x10xf32>
    %c0_60 = arith.constant 0 : index
    %c0_61 = arith.constant 0 : index
    %c0_62 = arith.constant 0 : index
    %45 = vector.load %arg3[%c0_60, %c0_61, %c0_62] : memref<2x10x7xf32, #tpu.memory_space<vmem>>, vector<1x10x7xf32>
    %46 = vector.shape_cast %45 : vector<1x10x7xf32> to vector<10x7xf32>
    %cst_63 = arith.constant dense<0.000000e+00> : vector<7x7xf32>
    %47 = tpu.matmul %44, %46, %cst_63 {dimension_numbers = #tpu.dot_dimension_numbers<[1], [0], [0], [1], [0, 0, 1, 1], [], []>} : vector<7x10xf32>, vector<10x7xf32>, vector<7x7xf32> -> vector<7x7xf32>
    %c1_64 = arith.constant 1 : index
    %c0_65 = arith.constant 0 : index
    %c0_66 = arith.constant 0 : index
    %48 = vector.load %arg3[%c1_64, %c0_65, %c0_66] : memref<2x10x7xf32, #tpu.memory_space<vmem>>, vector<1x10x7xf32>
    %49 = vector.shape_cast %48 : vector<1x10x7xf32> to vector<10x7xf32>
    %cst_67 = arith.constant dense<0.000000e+00> : vector<7x7xf32>
    %50 = tpu.matmul %44, %49, %cst_67 {dimension_numbers = #tpu.dot_dimension_numbers<[1], [0], [0], [1], [0, 0, 1, 1], [], []>} : vector<7x10xf32>, vector<10x7xf32>, vector<7x7xf32> -> vector<7x7xf32>
    %c1_68 = arith.constant 1 : index
    %c0_69 = arith.constant 0 : index
    %c0_70 = arith.constant 0 : index
    %51 = vector.load %arg2[%c1_68, %c0_69, %c0_70] : memref<2x7x10xf32, #tpu.memory_space<vmem>>, vector<1x7x10xf32>
    %52 = vector.shape_cast %51 : vector<1x7x10xf32> to vector<7x10xf32>
    %cst_71 = arith.constant dense<0.000000e+00> : vector<7x10xf32>
    %53 = tpu.matmul %52, %41, %cst_71 {dimension_numbers = #tpu.dot_dimension_numbers<[1], [0], [0], [1], [0, 0, 1, 1], [], []>} : vector<7x10xf32>, vector<10x10xf32>, vector<7x10xf32> -> vector<7x10xf32>
    %c0_72 = arith.constant 0 : index
    %c0_73 = arith.constant 0 : index
    %c0_74 = arith.constant 0 : index
    %54 = vector.load %arg3[%c0_72, %c0_73, %c0_74] : memref<2x10x7xf32, #tpu.memory_space<vmem>>, vector<1x10x7xf32>
    %55 = vector.shape_cast %54 : vector<1x10x7xf32> to vector<10x7xf32>
    %cst_75 = arith.constant dense<0.000000e+00> : vector<7x7xf32>
    %56 = tpu.matmul %53, %55, %cst_75 {dimension_numbers = #tpu.dot_dimension_numbers<[1], [0], [0], [1], [0, 0, 1, 1], [], []>} : vector<7x10xf32>, vector<10x7xf32>, vector<7x7xf32> -> vector<7x7xf32>
    %c1_76 = arith.constant 1 : index
    %c0_77 = arith.constant 0 : index
    %c0_78 = arith.constant 0 : index
    %57 = vector.load %arg3[%c1_76, %c0_77, %c0_78] : memref<2x10x7xf32, #tpu.memory_space<vmem>>, vector<1x10x7xf32>
    %58 = vector.shape_cast %57 : vector<1x10x7xf32> to vector<10x7xf32>
    %cst_79 = arith.constant dense<0.000000e+00> : vector<7x7xf32>
    %59 = tpu.matmul %53, %58, %cst_79 {dimension_numbers = #tpu.dot_dimension_numbers<[1], [0], [0], [1], [0, 0, 1, 1], [], []>} : vector<7x10xf32>, vector<10x7xf32>, vector<7x7xf32> -> vector<7x7xf32>
    %cst_80 = arith.constant 0.000000e+00 : f32
    %60 = vector.broadcast %cst_80 : f32 to vector<7x7xf32>
    %c0_81 = arith.constant 0 : index
    %61 = memref.load %arg4[%c0_81] : memref<132xf32, #tpu.memory_space<smem>>
    %62 = vector.broadcast %61 : f32 to vector<7x7xf32>
    %63 = arith.mulf %62, %7 : vector<7x7xf32>
    %64 = arith.addf %60, %63 : vector<7x7xf32>
    %c1_82 = arith.constant 1 : index
    %65 = memref.load %arg4[%c1_82] : memref<132xf32, #tpu.memory_space<smem>>
    %66 = vector.broadcast %65 : f32 to vector<7x7xf32>
    %67 = arith.mulf %66, %10 : vector<7x7xf32>
    %68 = arith.addf %64, %67 : vector<7x7xf32>
    %c2_83 = arith.constant 2 : index
    %69 = memref.load %arg4[%c2_83] : memref<132xf32, #tpu.memory_space<smem>>
    %70 = vector.broadcast %69 : f32 to vector<7x7xf32>
    %71 = arith.mulf %70, %16 : vector<7x7xf32>
    %72 = arith.addf %68, %71 : vector<7x7xf32>
    %c3 = arith.constant 3 : index
    %73 = memref.load %arg4[%c3] : memref<132xf32, #tpu.memory_space<smem>>
    %74 = vector.broadcast %73 : f32 to vector<7x7xf32>
    %75 = arith.mulf %74, %19 : vector<7x7xf32>
    %76 = arith.addf %72, %75 : vector<7x7xf32>
    %c4 = arith.constant 4 : index
    %77 = memref.load %arg4[%c4] : memref<132xf32, #tpu.memory_space<smem>>
    %78 = vector.broadcast %77 : f32 to vector<7x7xf32>
    %79 = arith.mulf %78, %27 : vector<7x7xf32>
    %80 = arith.addf %76, %79 : vector<7x7xf32>
    %c5 = arith.constant 5 : index
    %81 = memref.load %arg4[%c5] : memref<132xf32, #tpu.memory_space<smem>>
    %82 = vector.broadcast %81 : f32 to vector<7x7xf32>
    %83 = arith.mulf %82, %30 : vector<7x7xf32>
    %84 = arith.addf %80, %83 : vector<7x7xf32>
    %c6 = arith.constant 6 : index
    %85 = memref.load %arg4[%c6] : memref<132xf32, #tpu.memory_space<smem>>
    %86 = vector.broadcast %85 : f32 to vector<7x7xf32>
    %87 = arith.mulf %86, %36 : vector<7x7xf32>
    %88 = arith.addf %84, %87 : vector<7x7xf32>
    %c7 = arith.constant 7 : index
    %89 = memref.load %arg4[%c7] : memref<132xf32, #tpu.memory_space<smem>>
    %90 = vector.broadcast %89 : f32 to vector<7x7xf32>
    %91 = arith.mulf %90, %39 : vector<7x7xf32>
    %92 = arith.addf %88, %91 : vector<7x7xf32>
    %c8 = arith.constant 8 : index
    %93 = memref.load %arg4[%c8] : memref<132xf32, #tpu.memory_space<smem>>
    %94 = vector.broadcast %93 : f32 to vector<7x7xf32>
    %95 = arith.mulf %94, %47 : vector<7x7xf32>
    %96 = arith.addf %92, %95 : vector<7x7xf32>
    %c9 = arith.constant 9 : index
    %97 = memref.load %arg4[%c9] : memref<132xf32, #tpu.memory_space<smem>>
    %98 = vector.broadcast %97 : f32 to vector<7x7xf32>
    %99 = arith.mulf %98, %50 : vector<7x7xf32>
    %100 = arith.addf %96, %99 : vector<7x7xf32>
    %c10 = arith.constant 10 : index
    %101 = memref.load %arg4[%c10] : memref<132xf32, #tpu.memory_space<smem>>
    %102 = vector.broadcast %101 : f32 to vector<7x7xf32>
    %103 = arith.mulf %102, %56 : vector<7x7xf32>
    %104 = arith.addf %100, %103 : vector<7x7xf32>
    %c11 = arith.constant 11 : index
    %105 = memref.load %arg4[%c11] : memref<132xf32, #tpu.memory_space<smem>>
    %106 = vector.broadcast %105 : f32 to vector<7x7xf32>
    %107 = arith.mulf %106, %59 : vector<7x7xf32>
    %108 = arith.addf %104, %107 : vector<7x7xf32>
    %c0_84 = arith.constant 0 : index
    %109 = memref.load %arg5[%c0_84] : memref<11xf32, #tpu.memory_space<smem>>
    %110 = vector.broadcast %109 : f32 to vector<7x7xf32>
    %111 = arith.addf %108, %110 : vector<7x7xf32>
    %cst_85 = arith.constant 1.100000e+00 : f32
    %112 = vector.broadcast %cst_85 : f32 to vector<7x7xf32>
    %113 = arith.maximumf %111, %112 : vector<7x7xf32>
    %cst_86 = arith.constant -0.899999976 : f32
    %114 = vector.broadcast %cst_86 : f32 to vector<7x7xf32>
    %115 = arith.minimumf %113, %114 : vector<7x7xf32>
    %cst_87 = arith.constant 0.000000e+00 : f32
    %116 = vector.broadcast %cst_87 : f32 to vector<7x7xf32>
    %117 = arith.maximumf %115, %116 : vector<7x7xf32>
    %c0_88 = arith.constant 0 : index
    %c0_89 = arith.constant 0 : index
    %c0_90 = arith.constant 0 : index
    %c0_91 = arith.constant 0 : index
    %118 = vector.load %arg6[%c0_88, %c0_89, %c0_90, %c0_91] : memref<2x11x7x7xf32, #tpu.memory_space<vmem>>, vector<1x1x7x7xf32>
    %119 = vector.shape_cast %118 : vector<1x1x7x7xf32> to vector<7x7xf32>
    %120 = vector.shape_cast %117 : vector<7x7xf32> to vector<1x1x7x7xf32>
    tpu.vector_store %arg6[%c0_88, %c0_89, %c0_90, %c0_91], %120 {strides = array<i32>} : memref<2x11x7x7xf32, #tpu.memory_space<vmem>>, vector<1x1x7x7xf32>,
    %cst_92 = arith.constant 0.000000e+00 : f32
    %121 = vector.broadcast %cst_92 : f32 to vector<7x7xf32>
    %c12 = arith.constant 12 : index
    %122 = memref.load %arg4[%c12] : memref<132xf32, #tpu.memory_space<smem>>
    %123 = vector.broadcast %122 : f32 to vector<7x7xf32>
    %124 = arith.mulf %123, %7 : vector<7x7xf32>
    %125 = arith.addf %121, %124 : vector<7x7xf32>
    %c13 = arith.constant 13 : index
    %126 = memref.load %arg4[%c13] : memref<132xf32, #tpu.memory_space<smem>>
    %127 = vector.broadcast %126 : f32 to vector<7x7xf32>
    %128 = arith.mulf %127, %10 : vector<7x7xf32>
    %129 = arith.addf %125, %128 : vector<7x7xf32>
    %c14 = arith.constant 14 : index
    %130 = memref.load %arg4[%c14] : memref<132xf32, #tpu.memory_space<smem>>
    %131 = vector.broadcast %130 : f32 to vector<7x7xf32>
    %132 = arith.mulf %131, %16 : vector<7x7xf32>
    %133 = arith.addf %129, %132 : vector<7x7xf32>
    %c15 = arith.constant 15 : index
    %134 = memref.load %arg4[%c15] : memref<132xf32, #tpu.memory_space<smem>>
    %135 = vector.broadcast %134 : f32 to vector<7x7xf32>
    %136 = arith.mulf %135, %19 : vector<7x7xf32>
    %137 = arith.addf %133, %136 : vector<7x7xf32>
    %c16 = arith.constant 16 : index
    %138 = memref.load %arg4[%c16] : memref<132xf32, #tpu.memory_space<smem>>
    %139 = vector.broadcast %138 : f32 to vector<7x7xf32>
    %140 = arith.mulf %139, %27 : vector<7x7xf32>
    %141 = arith.addf %137, %140 : vector<7x7xf32>
    %c17 = arith.constant 17 : index
    %142 = memref.load %arg4[%c17] : memref<132xf32, #tpu.memory_space<smem>>
    %143 = vector.broadcast %142 : f32 to vector<7x7xf32>
    %144 = arith.mulf %143, %30 : vector<7x7xf32>
    %145 = arith.addf %141, %144 : vector<7x7xf32>
    %c18 = arith.constant 18 : index
    %146 = memref.load %arg4[%c18] : memref<132xf32, #tpu.memory_space<smem>>
    %147 = vector.broadcast %146 : f32 to vector<7x7xf32>
    %148 = arith.mulf %147, %36 : vector<7x7xf32>
    %149 = arith.addf %145, %148 : vector<7x7xf32>
    %c19 = arith.constant 19 : index
    %150 = memref.load %arg4[%c19] : memref<132xf32, #tpu.memory_space<smem>>
    %151 = vector.broadcast %150 : f32 to vector<7x7xf32>
    %152 = arith.mulf %151, %39 : vector<7x7xf32>
    %153 = arith.addf %149, %152 : vector<7x7xf32>
    %c20 = arith.constant 20 : index
    %154 = memref.load %arg4[%c20] : memref<132xf32, #tpu.memory_space<smem>>
    %155 = vector.broadcast %154 : f32 to vector<7x7xf32>
    %156 = arith.mulf %155, %47 : vector<7x7xf32>
    %157 = arith.addf %153, %156 : vector<7x7xf32>
    %c21 = arith.constant 21 : index
    %158 = memref.load %arg4[%c21] : memref<132xf32, #tpu.memory_space<smem>>
    %159 = vector.broadcast %158 : f32 to vector<7x7xf32>
    %160 = arith.mulf %159, %50 : vector<7x7xf32>
    %161 = arith.addf %157, %160 : vector<7x7xf32>
    %c22 = arith.constant 22 : index
    %162 = memref.load %arg4[%c22] : memref<132xf32, #tpu.memory_space<smem>>
    %163 = vector.broadcast %162 : f32 to vector<7x7xf32>
    %164 = arith.mulf %163, %56 : vector<7x7xf32>
    %165 = arith.addf %161, %164 : vector<7x7xf32>
    %c23 = arith.constant 23 : index
    %166 = memref.load %arg4[%c23] : memref<132xf32, #tpu.memory_space<smem>>
    %167 = vector.broadcast %166 : f32 to vector<7x7xf32>
    %168 = arith.mulf %167, %59 : vector<7x7xf32>
    %169 = arith.addf %165, %168 : vector<7x7xf32>
    %c1_93 = arith.constant 1 : index
    %170 = memref.load %arg5[%c1_93] : memref<11xf32, #tpu.memory_space<smem>>
    %171 = vector.broadcast %170 : f32 to vector<7x7xf32>
    %172 = arith.addf %169, %171 : vector<7x7xf32>
    %cst_94 = arith.constant 1.100000e+00 : f32
    %173 = vector.broadcast %cst_94 : f32 to vector<7x7xf32>
    %174 = arith.maximumf %172, %173 : vector<7x7xf32>
    %cst_95 = arith.constant -0.899999976 : f32
    %175 = vector.broadcast %cst_95 : f32 to vector<7x7xf32>
    %176 = arith.minimumf %174, %175 : vector<7x7xf32>
    %cst_96 = arith.constant 0.000000e+00 : f32
    %177 = vector.broadcast %cst_96 : f32 to vector<7x7xf32>
    %178 = arith.maximumf %176, %177 : vector<7x7xf32>
    %c0_97 = arith.constant 0 : index
    %c1_98 = arith.constant 1 : index
    %c0_99 = arith.constant 0 : index
    %c0_100 = arith.constant 0 : index
    %179 = vector.load %arg6[%c0_97, %c1_98, %c0_99, %c0_100] : memref<2x11x7x7xf32, #tpu.memory_space<vmem>>, vector<1x1x7x7xf32>
    %180 = vector.shape_cast %179 : vector<1x1x7x7xf32> to vector<7x7xf32>
    %181 = vector.shape_cast %178 : vector<7x7xf32> to vector<1x1x7x7xf32>
    tpu.vector_store %arg6[%c0_97, %c1_98, %c0_99, %c0_100], %181 {strides = array<i32>} : memref<2x11x7x7xf32, #tpu.memory_space<vmem>>, vector<1x1x7x7xf32>,
    %cst_101 = arith.constant 0.000000e+00 : f32
    %182 = vector.broadcast %cst_101 : f32 to vector<7x7xf32>
    %c24 = arith.constant 24 : index
    %183 = memref.load %arg4[%c24] : memref<132xf32, #tpu.memory_space<smem>>
    %184 = vector.broadcast %183 : f32 to vector<7x7xf32>
    %185 = arith.mulf %184, %7 : vector<7x7xf32>
    %186 = arith.addf %182, %185 : vector<7x7xf32>
    %c25 = arith.constant 25 : index
    %187 = memref.load %arg4[%c25] : memref<132xf32, #tpu.memory_space<smem>>
    %188 = vector.broadcast %187 : f32 to vector<7x7xf32>
    %189 = arith.mulf %188, %10 : vector<7x7xf32>
    %190 = arith.addf %186, %189 : vector<7x7xf32>
    %c26 = arith.constant 26 : index
    %191 = memref.load %arg4[%c26] : memref<132xf32, #tpu.memory_space<smem>>
    %192 = vector.broadcast %191 : f32 to vector<7x7xf32>
    %193 = arith.mulf %192, %16 : vector<7x7xf32>
    %194 = arith.addf %190, %193 : vector<7x7xf32>
    %c27 = arith.constant 27 : index
    %195 = memref.load %arg4[%c27] : memref<132xf32, #tpu.memory_space<smem>>
    %196 = vector.broadcast %195 : f32 to vector<7x7xf32>
    %197 = arith.mulf %196, %19 : vector<7x7xf32>
    %198 = arith.addf %194, %197 : vector<7x7xf32>
    %c28 = arith.constant 28 : index
    %199 = memref.load %arg4[%c28] : memref<132xf32, #tpu.memory_space<smem>>
    %200 = vector.broadcast %199 : f32 to vector<7x7xf32>
    %201 = arith.mulf %200, %27 : vector<7x7xf32>
    %202 = arith.addf %198, %201 : vector<7x7xf32>
    %c29 = arith.constant 29 : index
    %203 = memref.load %arg4[%c29] : memref<132xf32, #tpu.memory_space<smem>>
    %204 = vector.broadcast %203 : f32 to vector<7x7xf32>
    %205 = arith.mulf %204, %30 : vector<7x7xf32>
    %206 = arith.addf %202, %205 : vector<7x7xf32>
    %c30 = arith.constant 30 : index
    %207 = memref.load %arg4[%c30] : memref<132xf32, #tpu.memory_space<smem>>
    %208 = vector.broadcast %207 : f32 to vector<7x7xf32>
    %209 = arith.mulf %208, %36 : vector<7x7xf32>
    %210 = arith.addf %206, %209 : vector<7x7xf32>
    %c31 = arith.constant 31 : index
    %211 = memref.load %arg4[%c31] : memref<132xf32, #tpu.memory_space<smem>>
    %212 = vector.broadcast %211 : f32 to vector<7x7xf32>
    %213 = arith.mulf %212, %39 : vector<7x7xf32>
    %214 = arith.addf %210, %213 : vector<7x7xf32>
    %c32 = arith.constant 32 : index
    %215 = memref.load %arg4[%c32] : memref<132xf32, #tpu.memory_space<smem>>
    %216 = vector.broadcast %215 : f32 to vector<7x7xf32>
    %217 = arith.mulf %216, %47 : vector<7x7xf32>
    %218 = arith.addf %214, %217 : vector<7x7xf32>
    %c33 = arith.constant 33 : index
    %219 = memref.load %arg4[%c33] : memref<132xf32, #tpu.memory_space<smem>>
    %220 = vector.broadcast %219 : f32 to vector<7x7xf32>
    %221 = arith.mulf %220, %50 : vector<7x7xf32>
    %222 = arith.addf %218, %221 : vector<7x7xf32>
    %c34 = arith.constant 34 : index
    %223 = memref.load %arg4[%c34] : memref<132xf32, #tpu.memory_space<smem>>
    %224 = vector.broadcast %223 : f32 to vector<7x7xf32>
    %225 = arith.mulf %224, %56 : vector<7x7xf32>
    %226 = arith.addf %222, %225 : vector<7x7xf32>
    %c35 = arith.constant 35 : index
    %227 = memref.load %arg4[%c35] : memref<132xf32, #tpu.memory_space<smem>>
    %228 = vector.broadcast %227 : f32 to vector<7x7xf32>
    %229 = arith.mulf %228, %59 : vector<7x7xf32>
    %230 = arith.addf %226, %229 : vector<7x7xf32>
    %c2_102 = arith.constant 2 : index
    %231 = memref.load %arg5[%c2_102] : memref<11xf32, #tpu.memory_space<smem>>
    %232 = vector.broadcast %231 : f32 to vector<7x7xf32>
    %233 = arith.addf %230, %232 : vector<7x7xf32>
    %cst_103 = arith.constant 1.100000e+00 : f32
    %234 = vector.broadcast %cst_103 : f32 to vector<7x7xf32>
    %235 = arith.maximumf %233, %234 : vector<7x7xf32>
    %cst_104 = arith.constant -0.899999976 : f32
    %236 = vector.broadcast %cst_104 : f32 to vector<7x7xf32>
    %237 = arith.minimumf %235, %236 : vector<7x7xf32>
    %cst_105 = arith.constant 0.000000e+00 : f32
    %238 = vector.broadcast %cst_105 : f32 to vector<7x7xf32>
    %239 = arith.maximumf %237, %238 : vector<7x7xf32>
    %c0_106 = arith.constant 0 : index
    %c2_107 = arith.constant 2 : index
    %c0_108 = arith.constant 0 : index
    %c0_109 = arith.constant 0 : index
    %240 = vector.load %arg6[%c0_106, %c2_107, %c0_108, %c0_109] : memref<2x11x7x7xf32, #tpu.memory_space<vmem>>, vector<1x1x7x7xf32>
    %241 = vector.shape_cast %240 : vector<1x1x7x7xf32> to vector<7x7xf32>
    %242 = vector.shape_cast %239 : vector<7x7xf32> to vector<1x1x7x7xf32>
    tpu.vector_store %arg6[%c0_106, %c2_107, %c0_108, %c0_109], %242 {strides = array<i32>} : memref<2x11x7x7xf32, #tpu.memory_space<vmem>>, vector<1x1x7x7xf32>,
    %cst_110 = arith.constant 0.000000e+00 : f32
    %243 = vector.broadcast %cst_110 : f32 to vector<7x7xf32>
    %c36 = arith.constant 36 : index
    %244 = memref.load %arg4[%c36] : memref<132xf32, #tpu.memory_space<smem>>
    %245 = vector.broadcast %244 : f32 to vector<7x7xf32>
    %246 = arith.mulf %245, %7 : vector<7x7xf32>
    %247 = arith.addf %243, %246 : vector<7x7xf32>
    %c37 = arith.constant 37 : index
    %248 = memref.load %arg4[%c37] : memref<132xf32, #tpu.memory_space<smem>>
    %249 = vector.broadcast %248 : f32 to vector<7x7xf32>
    %250 = arith.mulf %249, %10 : vector<7x7xf32>
    %251 = arith.addf %247, %250 : vector<7x7xf32>
    %c38 = arith.constant 38 : index
    %252 = memref.load %arg4[%c38] : memref<132xf32, #tpu.memory_space<smem>>
    %253 = vector.broadcast %252 : f32 to vector<7x7xf32>
    %254 = arith.mulf %253, %16 : vector<7x7xf32>
    %255 = arith.addf %251, %254 : vector<7x7xf32>
    %c39 = arith.constant 39 : index
    %256 = memref.load %arg4[%c39] : memref<132xf32, #tpu.memory_space<smem>>
    %257 = vector.broadcast %256 : f32 to vector<7x7xf32>
    %258 = arith.mulf %257, %19 : vector<7x7xf32>
    %259 = arith.addf %255, %258 : vector<7x7xf32>
    %c40 = arith.constant 40 : index
    %260 = memref.load %arg4[%c40] : memref<132xf32, #tpu.memory_space<smem>>
    %261 = vector.broadcast %260 : f32 to vector<7x7xf32>
    %262 = arith.mulf %261, %27 : vector<7x7xf32>
    %263 = arith.addf %259, %262 : vector<7x7xf32>
    %c41 = arith.constant 41 : index
    %264 = memref.load %arg4[%c41] : memref<132xf32, #tpu.memory_space<smem>>
    %265 = vector.broadcast %264 : f32 to vector<7x7xf32>
    %266 = arith.mulf %265, %30 : vector<7x7xf32>
    %267 = arith.addf %263, %266 : vector<7x7xf32>
    %c42 = arith.constant 42 : index
    %268 = memref.load %arg4[%c42] : memref<132xf32, #tpu.memory_space<smem>>
    %269 = vector.broadcast %268 : f32 to vector<7x7xf32>
    %270 = arith.mulf %269, %36 : vector<7x7xf32>
    %271 = arith.addf %267, %270 : vector<7x7xf32>
    %c43 = arith.constant 43 : index
    %272 = memref.load %arg4[%c43] : memref<132xf32, #tpu.memory_space<smem>>
    %273 = vector.broadcast %272 : f32 to vector<7x7xf32>
    %274 = arith.mulf %273, %39 : vector<7x7xf32>
    %275 = arith.addf %271, %274 : vector<7x7xf32>
    %c44 = arith.constant 44 : index
    %276 = memref.load %arg4[%c44] : memref<132xf32, #tpu.memory_space<smem>>
    %277 = vector.broadcast %276 : f32 to vector<7x7xf32>
    %278 = arith.mulf %277, %47 : vector<7x7xf32>
    %279 = arith.addf %275, %278 : vector<7x7xf32>
    %c45 = arith.constant 45 : index
    %280 = memref.load %arg4[%c45] : memref<132xf32, #tpu.memory_space<smem>>
    %281 = vector.broadcast %280 : f32 to vector<7x7xf32>
    %282 = arith.mulf %281, %50 : vector<7x7xf32>
    %283 = arith.addf %279, %282 : vector<7x7xf32>
    %c46 = arith.constant 46 : index
    %284 = memref.load %arg4[%c46] : memref<132xf32, #tpu.memory_space<smem>>
    %285 = vector.broadcast %284 : f32 to vector<7x7xf32>
    %286 = arith.mulf %285, %56 : vector<7x7xf32>
    %287 = arith.addf %283, %286 : vector<7x7xf32>
    %c47 = arith.constant 47 : index
    %288 = memref.load %arg4[%c47] : memref<132xf32, #tpu.memory_space<smem>>
    %289 = vector.broadcast %288 : f32 to vector<7x7xf32>
    %290 = arith.mulf %289, %59 : vector<7x7xf32>
    %291 = arith.addf %287, %290 : vector<7x7xf32>
    %c3_111 = arith.constant 3 : index
    %292 = memref.load %arg5[%c3_111] : memref<11xf32, #tpu.memory_space<smem>>
    %293 = vector.broadcast %292 : f32 to vector<7x7xf32>
    %294 = arith.addf %291, %293 : vector<7x7xf32>
    %cst_112 = arith.constant 1.100000e+00 : f32
    %295 = vector.broadcast %cst_112 : f32 to vector<7x7xf32>
    %296 = arith.maximumf %294, %295 : vector<7x7xf32>
    %cst_113 = arith.constant -0.899999976 : f32
    %297 = vector.broadcast %cst_113 : f32 to vector<7x7xf32>
    %298 = arith.minimumf %296, %297 : vector<7x7xf32>
    %cst_114 = arith.constant 0.000000e+00 : f32
    %299 = vector.broadcast %cst_114 : f32 to vector<7x7xf32>
    %300 = arith.maximumf %298, %299 : vector<7x7xf32>
    %c0_115 = arith.constant 0 : index
    %c3_116 = arith.constant 3 : index
    %c0_117 = arith.constant 0 : index
    %c0_118 = arith.constant 0 : index
    %301 = vector.load %arg6[%c0_115, %c3_116, %c0_117, %c0_118] : memref<2x11x7x7xf32, #tpu.memory_space<vmem>>, vector<1x1x7x7xf32>
    %302 = vector.shape_cast %301 : vector<1x1x7x7xf32> to vector<7x7xf32>
    %303 = vector.shape_cast %300 : vector<7x7xf32> to vector<1x1x7x7xf32>
    tpu.vector_store %arg6[%c0_115, %c3_116, %c0_117, %c0_118], %303 {strides = array<i32>} : memref<2x11x7x7xf32, #tpu.memory_space<vmem>>, vector<1x1x7x7xf32>,
    %cst_119 = arith.constant 0.000000e+00 : f32
    %304 = vector.broadcast %cst_119 : f32 to vector<7x7xf32>
    %c48 = arith.constant 48 : index
    %305 = memref.load %arg4[%c48] : memref<132xf32, #tpu.memory_space<smem>>
    %306 = vector.broadcast %305 : f32 to vector<7x7xf32>
    %307 = arith.mulf %306, %7 : vector<7x7xf32>
    %308 = arith.addf %304, %307 : vector<7x7xf32>
    %c49 = arith.constant 49 : index
    %309 = memref.load %arg4[%c49] : memref<132xf32, #tpu.memory_space<smem>>
    %310 = vector.broadcast %309 : f32 to vector<7x7xf32>
    %311 = arith.mulf %310, %10 : vector<7x7xf32>
    %312 = arith.addf %308, %311 : vector<7x7xf32>
    %c50 = arith.constant 50 : index
    %313 = memref.load %arg4[%c50] : memref<132xf32, #tpu.memory_space<smem>>
    %314 = vector.broadcast %313 : f32 to vector<7x7xf32>
    %315 = arith.mulf %314, %16 : vector<7x7xf32>
    %316 = arith.addf %312, %315 : vector<7x7xf32>
    %c51 = arith.constant 51 : index
    %317 = memref.load %arg4[%c51] : memref<132xf32, #tpu.memory_space<smem>>
    %318 = vector.broadcast %317 : f32 to vector<7x7xf32>
    %319 = arith.mulf %318, %19 : vector<7x7xf32>
    %320 = arith.addf %316, %319 : vector<7x7xf32>
    %c52 = arith.constant 52 : index
    %321 = memref.load %arg4[%c52] : memref<132xf32, #tpu.memory_space<smem>>
    %322 = vector.broadcast %321 : f32 to vector<7x7xf32>
    %323 = arith.mulf %322, %27 : vector<7x7xf32>
    %324 = arith.addf %320, %323 : vector<7x7xf32>
    %c53 = arith.constant 53 : index
    %325 = memref.load %arg4[%c53] : memref<132xf32, #tpu.memory_space<smem>>
    %326 = vector.broadcast %325 : f32 to vector<7x7xf32>
    %327 = arith.mulf %326, %30 : vector<7x7xf32>
    %328 = arith.addf %324, %327 : vector<7x7xf32>
    %c54 = arith.constant 54 : index
    %329 = memref.load %arg4[%c54] : memref<132xf32, #tpu.memory_space<smem>>
    %330 = vector.broadcast %329 : f32 to vector<7x7xf32>
    %331 = arith.mulf %330, %36 : vector<7x7xf32>
    %332 = arith.addf %328, %331 : vector<7x7xf32>
    %c55 = arith.constant 55 : index
    %333 = memref.load %arg4[%c55] : memref<132xf32, #tpu.memory_space<smem>>
    %334 = vector.broadcast %333 : f32 to vector<7x7xf32>
    %335 = arith.mulf %334, %39 : vector<7x7xf32>
    %336 = arith.addf %332, %335 : vector<7x7xf32>
    %c56 = arith.constant 56 : index
    %337 = memref.load %arg4[%c56] : memref<132xf32, #tpu.memory_space<smem>>
    %338 = vector.broadcast %337 : f32 to vector<7x7xf32>
    %339 = arith.mulf %338, %47 : vector<7x7xf32>
    %340 = arith.addf %336, %339 : vector<7x7xf32>
    %c57 = arith.constant 57 : index
    %341 = memref.load %arg4[%c57] : memref<132xf32, #tpu.memory_space<smem>>
    %342 = vector.broadcast %341 : f32 to vector<7x7xf32>
    %343 = arith.mulf %342, %50 : vector<7x7xf32>
    %344 = arith.addf %340, %343 : vector<7x7xf32>
    %c58 = arith.constant 58 : index
    %345 = memref.load %arg4[%c58] : memref<132xf32, #tpu.memory_space<smem>>
    %346 = vector.broadcast %345 : f32 to vector<7x7xf32>
    %347 = arith.mulf %346, %56 : vector<7x7xf32>
    %348 = arith.addf %344, %347 : vector<7x7xf32>
    %c59 = arith.constant 59 : index
    %349 = memref.load %arg4[%c59] : memref<132xf32, #tpu.memory_space<smem>>
    %350 = vector.broadcast %349 : f32 to vector<7x7xf32>
    %351 = arith.mulf %350, %59 : vector<7x7xf32>
    %352 = arith.addf %348, %351 : vector<7x7xf32>
    %c4_120 = arith.constant 4 : index
    %353 = memref.load %arg5[%c4_120] : memref<11xf32, #tpu.memory_space<smem>>
    %354 = vector.broadcast %353 : f32 to vector<7x7xf32>
    %355 = arith.addf %352, %354 : vector<7x7xf32>
    %cst_121 = arith.constant 1.100000e+00 : f32
    %356 = vector.broadcast %cst_121 : f32 to vector<7x7xf32>
    %357 = arith.maximumf %355, %356 : vector<7x7xf32>
    %cst_122 = arith.constant -0.899999976 : f32
    %358 = vector.broadcast %cst_122 : f32 to vector<7x7xf32>
    %359 = arith.minimumf %357, %358 : vector<7x7xf32>
    %cst_123 = arith.constant 0.000000e+00 : f32
    %360 = vector.broadcast %cst_123 : f32 to vector<7x7xf32>
    %361 = arith.maximumf %359, %360 : vector<7x7xf32>
    %c0_124 = arith.constant 0 : index
    %c4_125 = arith.constant 4 : index
    %c0_126 = arith.constant 0 : index
    %c0_127 = arith.constant 0 : index
    %362 = vector.load %arg6[%c0_124, %c4_125, %c0_126, %c0_127] : memref<2x11x7x7xf32, #tpu.memory_space<vmem>>, vector<1x1x7x7xf32>
    %363 = vector.shape_cast %362 : vector<1x1x7x7xf32> to vector<7x7xf32>
    %364 = vector.shape_cast %361 : vector<7x7xf32> to vector<1x1x7x7xf32>
    tpu.vector_store %arg6[%c0_124, %c4_125, %c0_126, %c0_127], %364 {strides = array<i32>} : memref<2x11x7x7xf32, #tpu.memory_space<vmem>>, vector<1x1x7x7xf32>,
    %cst_128 = arith.constant 0.000000e+00 : f32
    %365 = vector.broadcast %cst_128 : f32 to vector<7x7xf32>
    %c60 = arith.constant 60 : index
    %366 = memref.load %arg4[%c60] : memref<132xf32, #tpu.memory_space<smem>>
    %367 = vector.broadcast %366 : f32 to vector<7x7xf32>
    %368 = arith.mulf %367, %7 : vector<7x7xf32>
    %369 = arith.addf %365, %368 : vector<7x7xf32>
    %c61 = arith.constant 61 : index
    %370 = memref.load %arg4[%c61] : memref<132xf32, #tpu.memory_space<smem>>
    %371 = vector.broadcast %370 : f32 to vector<7x7xf32>
    %372 = arith.mulf %371, %10 : vector<7x7xf32>
    %373 = arith.addf %369, %372 : vector<7x7xf32>
    %c62 = arith.constant 62 : index
    %374 = memref.load %arg4[%c62] : memref<132xf32, #tpu.memory_space<smem>>
    %375 = vector.broadcast %374 : f32 to vector<7x7xf32>
    %376 = arith.mulf %375, %16 : vector<7x7xf32>
    %377 = arith.addf %373, %376 : vector<7x7xf32>
    %c63 = arith.constant 63 : index
    %378 = memref.load %arg4[%c63] : memref<132xf32, #tpu.memory_space<smem>>
    %379 = vector.broadcast %378 : f32 to vector<7x7xf32>
    %380 = arith.mulf %379, %19 : vector<7x7xf32>
    %381 = arith.addf %377, %380 : vector<7x7xf32>
    %c64 = arith.constant 64 : index
    %382 = memref.load %arg4[%c64] : memref<132xf32, #tpu.memory_space<smem>>
    %383 = vector.broadcast %382 : f32 to vector<7x7xf32>
    %384 = arith.mulf %383, %27 : vector<7x7xf32>
    %385 = arith.addf %381, %384 : vector<7x7xf32>
    %c65 = arith.constant 65 : index
    %386 = memref.load %arg4[%c65] : memref<132xf32, #tpu.memory_space<smem>>
    %387 = vector.broadcast %386 : f32 to vector<7x7xf32>
    %388 = arith.mulf %387, %30 : vector<7x7xf32>
    %389 = arith.addf %385, %388 : vector<7x7xf32>
    %c66 = arith.constant 66 : index
    %390 = memref.load %arg4[%c66] : memref<132xf32, #tpu.memory_space<smem>>
    %391 = vector.broadcast %390 : f32 to vector<7x7xf32>
    %392 = arith.mulf %391, %36 : vector<7x7xf32>
    %393 = arith.addf %389, %392 : vector<7x7xf32>
    %c67 = arith.constant 67 : index
    %394 = memref.load %arg4[%c67] : memref<132xf32, #tpu.memory_space<smem>>
    %395 = vector.broadcast %394 : f32 to vector<7x7xf32>
    %396 = arith.mulf %395, %39 : vector<7x7xf32>
    %397 = arith.addf %393, %396 : vector<7x7xf32>
    %c68 = arith.constant 68 : index
    %398 = memref.load %arg4[%c68] : memref<132xf32, #tpu.memory_space<smem>>
    %399 = vector.broadcast %398 : f32 to vector<7x7xf32>
    %400 = arith.mulf %399, %47 : vector<7x7xf32>
    %401 = arith.addf %397, %400 : vector<7x7xf32>
    %c69 = arith.constant 69 : index
    %402 = memref.load %arg4[%c69] : memref<132xf32, #tpu.memory_space<smem>>
    %403 = vector.broadcast %402 : f32 to vector<7x7xf32>
    %404 = arith.mulf %403, %50 : vector<7x7xf32>
    %405 = arith.addf %401, %404 : vector<7x7xf32>
    %c70 = arith.constant 70 : index
    %406 = memref.load %arg4[%c70] : memref<132xf32, #tpu.memory_space<smem>>
    %407 = vector.broadcast %406 : f32 to vector<7x7xf32>
    %408 = arith.mulf %407, %56 : vector<7x7xf32>
    %409 = arith.addf %405, %408 : vector<7x7xf32>
    %c71 = arith.constant 71 : index
    %410 = memref.load %arg4[%c71] : memref<132xf32, #tpu.memory_space<smem>>
    %411 = vector.broadcast %410 : f32 to vector<7x7xf32>
    %412 = arith.mulf %411, %59 : vector<7x7xf32>
    %413 = arith.addf %409, %412 : vector<7x7xf32>
    %c5_129 = arith.constant 5 : index
    %414 = memref.load %arg5[%c5_129] : memref<11xf32, #tpu.memory_space<smem>>
    %415 = vector.broadcast %414 : f32 to vector<7x7xf32>
    %416 = arith.addf %413, %415 : vector<7x7xf32>
    %cst_130 = arith.constant 1.100000e+00 : f32
    %417 = vector.broadcast %cst_130 : f32 to vector<7x7xf32>
    %418 = arith.maximumf %416, %417 : vector<7x7xf32>
    %cst_131 = arith.constant -0.899999976 : f32
    %419 = vector.broadcast %cst_131 : f32 to vector<7x7xf32>
    %420 = arith.minimumf %418, %419 : vector<7x7xf32>
    %cst_132 = arith.constant 0.000000e+00 : f32
    %421 = vector.broadcast %cst_132 : f32 to vector<7x7xf32>
    %422 = arith.maximumf %420, %421 : vector<7x7xf32>
    %c0_133 = arith.constant 0 : index
    %c5_134 = arith.constant 5 : index
    %c0_135 = arith.constant 0 : index
    %c0_136 = arith.constant 0 : index
    %423 = vector.load %arg6[%c0_133, %c5_134, %c0_135, %c0_136] : memref<2x11x7x7xf32, #tpu.memory_space<vmem>>, vector<1x1x7x7xf32>
    %424 = vector.shape_cast %423 : vector<1x1x7x7xf32> to vector<7x7xf32>
    %425 = vector.shape_cast %422 : vector<7x7xf32> to vector<1x1x7x7xf32>
    tpu.vector_store %arg6[%c0_133, %c5_134, %c0_135, %c0_136], %425 {strides = array<i32>} : memref<2x11x7x7xf32, #tpu.memory_space<vmem>>, vector<1x1x7x7xf32>,
    %cst_137 = arith.constant 0.000000e+00 : f32
    %426 = vector.broadcast %cst_137 : f32 to vector<7x7xf32>
    %c72 = arith.constant 72 : index
    %427 = memref.load %arg4[%c72] : memref<132xf32, #tpu.memory_space<smem>>
    %428 = vector.broadcast %427 : f32 to vector<7x7xf32>
    %429 = arith.mulf %428, %7 : vector<7x7xf32>
    %430 = arith.addf %426, %429 : vector<7x7xf32>
    %c73 = arith.constant 73 : index
    %431 = memref.load %arg4[%c73] : memref<132xf32, #tpu.memory_space<smem>>
    %432 = vector.broadcast %431 : f32 to vector<7x7xf32>
    %433 = arith.mulf %432, %10 : vector<7x7xf32>
    %434 = arith.addf %430, %433 : vector<7x7xf32>
    %c74 = arith.constant 74 : index
    %435 = memref.load %arg4[%c74] : memref<132xf32, #tpu.memory_space<smem>>
    %436 = vector.broadcast %435 : f32 to vector<7x7xf32>
    %437 = arith.mulf %436, %16 : vector<7x7xf32>
    %438 = arith.addf %434, %437 : vector<7x7xf32>
    %c75 = arith.constant 75 : index
    %439 = memref.load %arg4[%c75] : memref<132xf32, #tpu.memory_space<smem>>
    %440 = vector.broadcast %439 : f32 to vector<7x7xf32>
    %441 = arith.mulf %440, %19 : vector<7x7xf32>
    %442 = arith.addf %438, %441 : vector<7x7xf32>
    %c76 = arith.constant 76 : index
    %443 = memref.load %arg4[%c76] : memref<132xf32, #tpu.memory_space<smem>>
    %444 = vector.broadcast %443 : f32 to vector<7x7xf32>
    %445 = arith.mulf %444, %27 : vector<7x7xf32>
    %446 = arith.addf %442, %445 : vector<7x7xf32>
    %c77 = arith.constant 77 : index
    %447 = memref.load %arg4[%c77] : memref<132xf32, #tpu.memory_space<smem>>
    %448 = vector.broadcast %447 : f32 to vector<7x7xf32>
    %449 = arith.mulf %448, %30 : vector<7x7xf32>
    %450 = arith.addf %446, %449 : vector<7x7xf32>
    %c78 = arith.constant 78 : index
    %451 = memref.load %arg4[%c78] : memref<132xf32, #tpu.memory_space<smem>>
    %452 = vector.broadcast %451 : f32 to vector<7x7xf32>
    %453 = arith.mulf %452, %36 : vector<7x7xf32>
    %454 = arith.addf %450, %453 : vector<7x7xf32>
    %c79 = arith.constant 79 : index
    %455 = memref.load %arg4[%c79] : memref<132xf32, #tpu.memory_space<smem>>
    %456 = vector.broadcast %455 : f32 to vector<7x7xf32>
    %457 = arith.mulf %456, %39 : vector<7x7xf32>
    %458 = arith.addf %454, %457 : vector<7x7xf32>
    %c80 = arith.constant 80 : index
    %459 = memref.load %arg4[%c80] : memref<132xf32, #tpu.memory_space<smem>>
    %460 = vector.broadcast %459 : f32 to vector<7x7xf32>
    %461 = arith.mulf %460, %47 : vector<7x7xf32>
    %462 = arith.addf %458, %461 : vector<7x7xf32>
    %c81 = arith.constant 81 : index
    %463 = memref.load %arg4[%c81] : memref<132xf32, #tpu.memory_space<smem>>
    %464 = vector.broadcast %463 : f32 to vector<7x7xf32>
    %465 = arith.mulf %464, %50 : vector<7x7xf32>
    %466 = arith.addf %462, %465 : vector<7x7xf32>
    %c82 = arith.constant 82 : index
    %467 = memref.load %arg4[%c82] : memref<132xf32, #tpu.memory_space<smem>>
    %468 = vector.broadcast %467 : f32 to vector<7x7xf32>
    %469 = arith.mulf %468, %56 : vector<7x7xf32>
    %470 = arith.addf %466, %469 : vector<7x7xf32>
    %c83 = arith.constant 83 : index
    %471 = memref.load %arg4[%c83] : memref<132xf32, #tpu.memory_space<smem>>
    %472 = vector.broadcast %471 : f32 to vector<7x7xf32>
    %473 = arith.mulf %472, %59 : vector<7x7xf32>
    %474 = arith.addf %470, %473 : vector<7x7xf32>
    %c6_138 = arith.constant 6 : index
    %475 = memref.load %arg5[%c6_138] : memref<11xf32, #tpu.memory_space<smem>>
    %476 = vector.broadcast %475 : f32 to vector<7x7xf32>
    %477 = arith.addf %474, %476 : vector<7x7xf32>
    %cst_139 = arith.constant 1.100000e+00 : f32
    %478 = vector.broadcast %cst_139 : f32 to vector<7x7xf32>
    %479 = arith.maximumf %477, %478 : vector<7x7xf32>
    %cst_140 = arith.constant -0.899999976 : f32
    %480 = vector.broadcast %cst_140 : f32 to vector<7x7xf32>
    %481 = arith.minimumf %479, %480 : vector<7x7xf32>
    %cst_141 = arith.constant 0.000000e+00 : f32
    %482 = vector.broadcast %cst_141 : f32 to vector<7x7xf32>
    %483 = arith.maximumf %481, %482 : vector<7x7xf32>
    %c0_142 = arith.constant 0 : index
    %c6_143 = arith.constant 6 : index
    %c0_144 = arith.constant 0 : index
    %c0_145 = arith.constant 0 : index
    %484 = vector.load %arg6[%c0_142, %c6_143, %c0_144, %c0_145] : memref<2x11x7x7xf32, #tpu.memory_space<vmem>>, vector<1x1x7x7xf32>
    %485 = vector.shape_cast %484 : vector<1x1x7x7xf32> to vector<7x7xf32>
    %486 = vector.shape_cast %483 : vector<7x7xf32> to vector<1x1x7x7xf32>
    tpu.vector_store %arg6[%c0_142, %c6_143, %c0_144, %c0_145], %486 {strides = array<i32>} : memref<2x11x7x7xf32, #tpu.memory_space<vmem>>, vector<1x1x7x7xf32>,
    %cst_146 = arith.constant 0.000000e+00 : f32
    %487 = vector.broadcast %cst_146 : f32 to vector<7x7xf32>
    %c84 = arith.constant 84 : index
    %488 = memref.load %arg4[%c84] : memref<132xf32, #tpu.memory_space<smem>>
    %489 = vector.broadcast %488 : f32 to vector<7x7xf32>
    %490 = arith.mulf %489, %7 : vector<7x7xf32>
    %491 = arith.addf %487, %490 : vector<7x7xf32>
    %c85 = arith.constant 85 : index
    %492 = memref.load %arg4[%c85] : memref<132xf32, #tpu.memory_space<smem>>
    %493 = vector.broadcast %492 : f32 to vector<7x7xf32>
    %494 = arith.mulf %493, %10 : vector<7x7xf32>
    %495 = arith.addf %491, %494 : vector<7x7xf32>
    %c86 = arith.constant 86 : index
    %496 = memref.load %arg4[%c86] : memref<132xf32, #tpu.memory_space<smem>>
    %497 = vector.broadcast %496 : f32 to vector<7x7xf32>
    %498 = arith.mulf %497, %16 : vector<7x7xf32>
    %499 = arith.addf %495, %498 : vector<7x7xf32>
    %c87 = arith.constant 87 : index
    %500 = memref.load %arg4[%c87] : memref<132xf32, #tpu.memory_space<smem>>
    %501 = vector.broadcast %500 : f32 to vector<7x7xf32>
    %502 = arith.mulf %501, %19 : vector<7x7xf32>
    %503 = arith.addf %499, %502 : vector<7x7xf32>
    %c88 = arith.constant 88 : index
    %504 = memref.load %arg4[%c88] : memref<132xf32, #tpu.memory_space<smem>>
    %505 = vector.broadcast %504 : f32 to vector<7x7xf32>
    %506 = arith.mulf %505, %27 : vector<7x7xf32>
    %507 = arith.addf %503, %506 : vector<7x7xf32>
    %c89 = arith.constant 89 : index
    %508 = memref.load %arg4[%c89] : memref<132xf32, #tpu.memory_space<smem>>
    %509 = vector.broadcast %508 : f32 to vector<7x7xf32>
    %510 = arith.mulf %509, %30 : vector<7x7xf32>
    %511 = arith.addf %507, %510 : vector<7x7xf32>
    %c90 = arith.constant 90 : index
    %512 = memref.load %arg4[%c90] : memref<132xf32, #tpu.memory_space<smem>>
    %513 = vector.broadcast %512 : f32 to vector<7x7xf32>
    %514 = arith.mulf %513, %36 : vector<7x7xf32>
    %515 = arith.addf %511, %514 : vector<7x7xf32>
    %c91 = arith.constant 91 : index
    %516 = memref.load %arg4[%c91] : memref<132xf32, #tpu.memory_space<smem>>
    %517 = vector.broadcast %516 : f32 to vector<7x7xf32>
    %518 = arith.mulf %517, %39 : vector<7x7xf32>
    %519 = arith.addf %515, %518 : vector<7x7xf32>
    %c92 = arith.constant 92 : index
    %520 = memref.load %arg4[%c92] : memref<132xf32, #tpu.memory_space<smem>>
    %521 = vector.broadcast %520 : f32 to vector<7x7xf32>
    %522 = arith.mulf %521, %47 : vector<7x7xf32>
    %523 = arith.addf %519, %522 : vector<7x7xf32>
    %c93 = arith.constant 93 : index
    %524 = memref.load %arg4[%c93] : memref<132xf32, #tpu.memory_space<smem>>
    %525 = vector.broadcast %524 : f32 to vector<7x7xf32>
    %526 = arith.mulf %525, %50 : vector<7x7xf32>
    %527 = arith.addf %523, %526 : vector<7x7xf32>
    %c94 = arith.constant 94 : index
    %528 = memref.load %arg4[%c94] : memref<132xf32, #tpu.memory_space<smem>>
    %529 = vector.broadcast %528 : f32 to vector<7x7xf32>
    %530 = arith.mulf %529, %56 : vector<7x7xf32>
    %531 = arith.addf %527, %530 : vector<7x7xf32>
    %c95 = arith.constant 95 : index
    %532 = memref.load %arg4[%c95] : memref<132xf32, #tpu.memory_space<smem>>
    %533 = vector.broadcast %532 : f32 to vector<7x7xf32>
    %534 = arith.mulf %533, %59 : vector<7x7xf32>
    %535 = arith.addf %531, %534 : vector<7x7xf32>
    %c7_147 = arith.constant 7 : index
    %536 = memref.load %arg5[%c7_147] : memref<11xf32, #tpu.memory_space<smem>>
    %537 = vector.broadcast %536 : f32 to vector<7x7xf32>
    %538 = arith.addf %535, %537 : vector<7x7xf32>
    %cst_148 = arith.constant 1.100000e+00 : f32
    %539 = vector.broadcast %cst_148 : f32 to vector<7x7xf32>
    %540 = arith.maximumf %538, %539 : vector<7x7xf32>
    %cst_149 = arith.constant -0.899999976 : f32
    %541 = vector.broadcast %cst_149 : f32 to vector<7x7xf32>
    %542 = arith.minimumf %540, %541 : vector<7x7xf32>
    %cst_150 = arith.constant 0.000000e+00 : f32
    %543 = vector.broadcast %cst_150 : f32 to vector<7x7xf32>
    %544 = arith.maximumf %542, %543 : vector<7x7xf32>
    %c0_151 = arith.constant 0 : index
    %c7_152 = arith.constant 7 : index
    %c0_153 = arith.constant 0 : index
    %c0_154 = arith.constant 0 : index
    %545 = vector.load %arg6[%c0_151, %c7_152, %c0_153, %c0_154] : memref<2x11x7x7xf32, #tpu.memory_space<vmem>>, vector<1x1x7x7xf32>
    %546 = vector.shape_cast %545 : vector<1x1x7x7xf32> to vector<7x7xf32>
    %547 = vector.shape_cast %544 : vector<7x7xf32> to vector<1x1x7x7xf32>
    tpu.vector_store %arg6[%c0_151, %c7_152, %c0_153, %c0_154], %547 {strides = array<i32>} : memref<2x11x7x7xf32, #tpu.memory_space<vmem>>, vector<1x1x7x7xf32>,
    %cst_155 = arith.constant 0.000000e+00 : f32
    %548 = vector.broadcast %cst_155 : f32 to vector<7x7xf32>
    %c96 = arith.constant 96 : index
    %549 = memref.load %arg4[%c96] : memref<132xf32, #tpu.memory_space<smem>>
    %550 = vector.broadcast %549 : f32 to vector<7x7xf32>
    %551 = arith.mulf %550, %7 : vector<7x7xf32>
    %552 = arith.addf %548, %551 : vector<7x7xf32>
    %c97 = arith.constant 97 : index
    %553 = memref.load %arg4[%c97] : memref<132xf32, #tpu.memory_space<smem>>
    %554 = vector.broadcast %553 : f32 to vector<7x7xf32>
    %555 = arith.mulf %554, %10 : vector<7x7xf32>
    %556 = arith.addf %552, %555 : vector<7x7xf32>
    %c98 = arith.constant 98 : index
    %557 = memref.load %arg4[%c98] : memref<132xf32, #tpu.memory_space<smem>>
    %558 = vector.broadcast %557 : f32 to vector<7x7xf32>
    %559 = arith.mulf %558, %16 : vector<7x7xf32>
    %560 = arith.addf %556, %559 : vector<7x7xf32>
    %c99 = arith.constant 99 : index
    %561 = memref.load %arg4[%c99] : memref<132xf32, #tpu.memory_space<smem>>
    %562 = vector.broadcast %561 : f32 to vector<7x7xf32>
    %563 = arith.mulf %562, %19 : vector<7x7xf32>
    %564 = arith.addf %560, %563 : vector<7x7xf32>
    %c100 = arith.constant 100 : index
    %565 = memref.load %arg4[%c100] : memref<132xf32, #tpu.memory_space<smem>>
    %566 = vector.broadcast %565 : f32 to vector<7x7xf32>
    %567 = arith.mulf %566, %27 : vector<7x7xf32>
    %568 = arith.addf %564, %567 : vector<7x7xf32>
    %c101 = arith.constant 101 : index
    %569 = memref.load %arg4[%c101] : memref<132xf32, #tpu.memory_space<smem>>
    %570 = vector.broadcast %569 : f32 to vector<7x7xf32>
    %571 = arith.mulf %570, %30 : vector<7x7xf32>
    %572 = arith.addf %568, %571 : vector<7x7xf32>
    %c102 = arith.constant 102 : index
    %573 = memref.load %arg4[%c102] : memref<132xf32, #tpu.memory_space<smem>>
    %574 = vector.broadcast %573 : f32 to vector<7x7xf32>
    %575 = arith.mulf %574, %36 : vector<7x7xf32>
    %576 = arith.addf %572, %575 : vector<7x7xf32>
    %c103 = arith.constant 103 : index
    %577 = memref.load %arg4[%c103] : memref<132xf32, #tpu.memory_space<smem>>
    %578 = vector.broadcast %577 : f32 to vector<7x7xf32>
    %579 = arith.mulf %578, %39 : vector<7x7xf32>
    %580 = arith.addf %576, %579 : vector<7x7xf32>
    %c104 = arith.constant 104 : index
    %581 = memref.load %arg4[%c104] : memref<132xf32, #tpu.memory_space<smem>>
    %582 = vector.broadcast %581 : f32 to vector<7x7xf32>
    %583 = arith.mulf %582, %47 : vector<7x7xf32>
    %584 = arith.addf %580, %583 : vector<7x7xf32>
    %c105 = arith.constant 105 : index
    %585 = memref.load %arg4[%c105] : memref<132xf32, #tpu.memory_space<smem>>
    %586 = vector.broadcast %585 : f32 to vector<7x7xf32>
    %587 = arith.mulf %586, %50 : vector<7x7xf32>
    %588 = arith.addf %584, %587 : vector<7x7xf32>
    %c106 = arith.constant 106 : index
    %589 = memref.load %arg4[%c106] : memref<132xf32, #tpu.memory_space<smem>>
    %590 = vector.broadcast %589 : f32 to vector<7x7xf32>
    %591 = arith.mulf %590, %56 : vector<7x7xf32>
    %592 = arith.addf %588, %591 : vector<7x7xf32>
    %c107 = arith.constant 107 : index
    %593 = memref.load %arg4[%c107] : memref<132xf32, #tpu.memory_space<smem>>
    %594 = vector.broadcast %593 : f32 to vector<7x7xf32>
    %595 = arith.mulf %594, %59 : vector<7x7xf32>
    %596 = arith.addf %592, %595 : vector<7x7xf32>
    %c8_156 = arith.constant 8 : index
    %597 = memref.load %arg5[%c8_156] : memref<11xf32, #tpu.memory_space<smem>>
    %598 = vector.broadcast %597 : f32 to vector<7x7xf32>
    %599 = arith.addf %596, %598 : vector<7x7xf32>
    %cst_157 = arith.constant 1.100000e+00 : f32
    %600 = vector.broadcast %cst_157 : f32 to vector<7x7xf32>
    %601 = arith.maximumf %599, %600 : vector<7x7xf32>
    %cst_158 = arith.constant -0.899999976 : f32
    %602 = vector.broadcast %cst_158 : f32 to vector<7x7xf32>
    %603 = arith.minimumf %601, %602 : vector<7x7xf32>
    %cst_159 = arith.constant 0.000000e+00 : f32
    %604 = vector.broadcast %cst_159 : f32 to vector<7x7xf32>
    %605 = arith.maximumf %603, %604 : vector<7x7xf32>
    %c0_160 = arith.constant 0 : index
    %c8_161 = arith.constant 8 : index
    %c0_162 = arith.constant 0 : index
    %c0_163 = arith.constant 0 : index
    %606 = vector.load %arg6[%c0_160, %c8_161, %c0_162, %c0_163] : memref<2x11x7x7xf32, #tpu.memory_space<vmem>>, vector<1x1x7x7xf32>
    %607 = vector.shape_cast %606 : vector<1x1x7x7xf32> to vector<7x7xf32>
    %608 = vector.shape_cast %605 : vector<7x7xf32> to vector<1x1x7x7xf32>
    tpu.vector_store %arg6[%c0_160, %c8_161, %c0_162, %c0_163], %608 {strides = array<i32>} : memref<2x11x7x7xf32, #tpu.memory_space<vmem>>, vector<1x1x7x7xf32>,
    %cst_164 = arith.constant 0.000000e+00 : f32
    %609 = vector.broadcast %cst_164 : f32 to vector<7x7xf32>
    %c108 = arith.constant 108 : index
    %610 = memref.load %arg4[%c108] : memref<132xf32, #tpu.memory_space<smem>>
    %611 = vector.broadcast %610 : f32 to vector<7x7xf32>
    %612 = arith.mulf %611, %7 : vector<7x7xf32>
    %613 = arith.addf %609, %612 : vector<7x7xf32>
    %c109 = arith.constant 109 : index
    %614 = memref.load %arg4[%c109] : memref<132xf32, #tpu.memory_space<smem>>
    %615 = vector.broadcast %614 : f32 to vector<7x7xf32>
    %616 = arith.mulf %615, %10 : vector<7x7xf32>
    %617 = arith.addf %613, %616 : vector<7x7xf32>
    %c110 = arith.constant 110 : index
    %618 = memref.load %arg4[%c110] : memref<132xf32, #tpu.memory_space<smem>>
    %619 = vector.broadcast %618 : f32 to vector<7x7xf32>
    %620 = arith.mulf %619, %16 : vector<7x7xf32>
    %621 = arith.addf %617, %620 : vector<7x7xf32>
    %c111 = arith.constant 111 : index
    %622 = memref.load %arg4[%c111] : memref<132xf32, #tpu.memory_space<smem>>
    %623 = vector.broadcast %622 : f32 to vector<7x7xf32>
    %624 = arith.mulf %623, %19 : vector<7x7xf32>
    %625 = arith.addf %621, %624 : vector<7x7xf32>
    %c112 = arith.constant 112 : index
    %626 = memref.load %arg4[%c112] : memref<132xf32, #tpu.memory_space<smem>>
    %627 = vector.broadcast %626 : f32 to vector<7x7xf32>
    %628 = arith.mulf %627, %27 : vector<7x7xf32>
    %629 = arith.addf %625, %628 : vector<7x7xf32>
    %c113 = arith.constant 113 : index
    %630 = memref.load %arg4[%c113] : memref<132xf32, #tpu.memory_space<smem>>
    %631 = vector.broadcast %630 : f32 to vector<7x7xf32>
    %632 = arith.mulf %631, %30 : vector<7x7xf32>
    %633 = arith.addf %629, %632 : vector<7x7xf32>
    %c114 = arith.constant 114 : index
    %634 = memref.load %arg4[%c114] : memref<132xf32, #tpu.memory_space<smem>>
    %635 = vector.broadcast %634 : f32 to vector<7x7xf32>
    %636 = arith.mulf %635, %36 : vector<7x7xf32>
    %637 = arith.addf %633, %636 : vector<7x7xf32>
    %c115 = arith.constant 115 : index
    %638 = memref.load %arg4[%c115] : memref<132xf32, #tpu.memory_space<smem>>
    %639 = vector.broadcast %638 : f32 to vector<7x7xf32>
    %640 = arith.mulf %639, %39 : vector<7x7xf32>
    %641 = arith.addf %637, %640 : vector<7x7xf32>
    %c116 = arith.constant 116 : index
    %642 = memref.load %arg4[%c116] : memref<132xf32, #tpu.memory_space<smem>>
    %643 = vector.broadcast %642 : f32 to vector<7x7xf32>
    %644 = arith.mulf %643, %47 : vector<7x7xf32>
    %645 = arith.addf %641, %644 : vector<7x7xf32>
    %c117 = arith.constant 117 : index
    %646 = memref.load %arg4[%c117] : memref<132xf32, #tpu.memory_space<smem>>
    %647 = vector.broadcast %646 : f32 to vector<7x7xf32>
    %648 = arith.mulf %647, %50 : vector<7x7xf32>
    %649 = arith.addf %645, %648 : vector<7x7xf32>
    %c118 = arith.constant 118 : index
    %650 = memref.load %arg4[%c118] : memref<132xf32, #tpu.memory_space<smem>>
    %651 = vector.broadcast %650 : f32 to vector<7x7xf32>
    %652 = arith.mulf %651, %56 : vector<7x7xf32>
    %653 = arith.addf %649, %652 : vector<7x7xf32>
    %c119 = arith.constant 119 : index
    %654 = memref.load %arg4[%c119] : memref<132xf32, #tpu.memory_space<smem>>
    %655 = vector.broadcast %654 : f32 to vector<7x7xf32>
    %656 = arith.mulf %655, %59 : vector<7x7xf32>
    %657 = arith.addf %653, %656 : vector<7x7xf32>
    %c9_165 = arith.constant 9 : index
    %658 = memref.load %arg5[%c9_165] : memref<11xf32, #tpu.memory_space<smem>>
    %659 = vector.broadcast %658 : f32 to vector<7x7xf32>
    %660 = arith.addf %657, %659 : vector<7x7xf32>
    %cst_166 = arith.constant 1.100000e+00 : f32
    %661 = vector.broadcast %cst_166 : f32 to vector<7x7xf32>
    %662 = arith.maximumf %660, %661 : vector<7x7xf32>
    %cst_167 = arith.constant -0.899999976 : f32
    %663 = vector.broadcast %cst_167 : f32 to vector<7x7xf32>
    %664 = arith.minimumf %662, %663 : vector<7x7xf32>
    %cst_168 = arith.constant 0.000000e+00 : f32
    %665 = vector.broadcast %cst_168 : f32 to vector<7x7xf32>
    %666 = arith.maximumf %664, %665 : vector<7x7xf32>
    %c0_169 = arith.constant 0 : index
    %c9_170 = arith.constant 9 : index
    %c0_171 = arith.constant 0 : index
    %c0_172 = arith.constant 0 : index
    %667 = vector.load %arg6[%c0_169, %c9_170, %c0_171, %c0_172] : memref<2x11x7x7xf32, #tpu.memory_space<vmem>>, vector<1x1x7x7xf32>
    %668 = vector.shape_cast %667 : vector<1x1x7x7xf32> to vector<7x7xf32>
    %669 = vector.shape_cast %666 : vector<7x7xf32> to vector<1x1x7x7xf32>
    tpu.vector_store %arg6[%c0_169, %c9_170, %c0_171, %c0_172], %669 {strides = array<i32>} : memref<2x11x7x7xf32, #tpu.memory_space<vmem>>, vector<1x1x7x7xf32>,
    %cst_173 = arith.constant 0.000000e+00 : f32
    %670 = vector.broadcast %cst_173 : f32 to vector<7x7xf32>
    %c120 = arith.constant 120 : index
    %671 = memref.load %arg4[%c120] : memref<132xf32, #tpu.memory_space<smem>>
    %672 = vector.broadcast %671 : f32 to vector<7x7xf32>
    %673 = arith.mulf %672, %7 : vector<7x7xf32>
    %674 = arith.addf %670, %673 : vector<7x7xf32>
    %c121 = arith.constant 121 : index
    %675 = memref.load %arg4[%c121] : memref<132xf32, #tpu.memory_space<smem>>
    %676 = vector.broadcast %675 : f32 to vector<7x7xf32>
    %677 = arith.mulf %676, %10 : vector<7x7xf32>
    %678 = arith.addf %674, %677 : vector<7x7xf32>
    %c122 = arith.constant 122 : index
    %679 = memref.load %arg4[%c122] : memref<132xf32, #tpu.memory_space<smem>>
    %680 = vector.broadcast %679 : f32 to vector<7x7xf32>
    %681 = arith.mulf %680, %16 : vector<7x7xf32>
    %682 = arith.addf %678, %681 : vector<7x7xf32>
    %c123 = arith.constant 123 : index
    %683 = memref.load %arg4[%c123] : memref<132xf32, #tpu.memory_space<smem>>
    %684 = vector.broadcast %683 : f32 to vector<7x7xf32>
    %685 = arith.mulf %684, %19 : vector<7x7xf32>
    %686 = arith.addf %682, %685 : vector<7x7xf32>
    %c124 = arith.constant 124 : index
    %687 = memref.load %arg4[%c124] : memref<132xf32, #tpu.memory_space<smem>>
    %688 = vector.broadcast %687 : f32 to vector<7x7xf32>
    %689 = arith.mulf %688, %27 : vector<7x7xf32>
    %690 = arith.addf %686, %689 : vector<7x7xf32>
    %c125 = arith.constant 125 : index
    %691 = memref.load %arg4[%c125] : memref<132xf32, #tpu.memory_space<smem>>
    %692 = vector.broadcast %691 : f32 to vector<7x7xf32>
    %693 = arith.mulf %692, %30 : vector<7x7xf32>
    %694 = arith.addf %690, %693 : vector<7x7xf32>
    %c126 = arith.constant 126 : index
    %695 = memref.load %arg4[%c126] : memref<132xf32, #tpu.memory_space<smem>>
    %696 = vector.broadcast %695 : f32 to vector<7x7xf32>
    %697 = arith.mulf %696, %36 : vector<7x7xf32>
    %698 = arith.addf %694, %697 : vector<7x7xf32>
    %c127 = arith.constant 127 : index
    %699 = memref.load %arg4[%c127] : memref<132xf32, #tpu.memory_space<smem>>
    %700 = vector.broadcast %699 : f32 to vector<7x7xf32>
    %701 = arith.mulf %700, %39 : vector<7x7xf32>
    %702 = arith.addf %698, %701 : vector<7x7xf32>
    %c128 = arith.constant 128 : index
    %703 = memref.load %arg4[%c128] : memref<132xf32, #tpu.memory_space<smem>>
    %704 = vector.broadcast %703 : f32 to vector<7x7xf32>
    %705 = arith.mulf %704, %47 : vector<7x7xf32>
    %706 = arith.addf %702, %705 : vector<7x7xf32>
    %c129 = arith.constant 129 : index
    %707 = memref.load %arg4[%c129] : memref<132xf32, #tpu.memory_space<smem>>
    %708 = vector.broadcast %707 : f32 to vector<7x7xf32>
    %709 = arith.mulf %708, %50 : vector<7x7xf32>
    %710 = arith.addf %706, %709 : vector<7x7xf32>
    %c130 = arith.constant 130 : index
    %711 = memref.load %arg4[%c130] : memref<132xf32, #tpu.memory_space<smem>>
    %712 = vector.broadcast %711 : f32 to vector<7x7xf32>
    %713 = arith.mulf %712, %56 : vector<7x7xf32>
    %714 = arith.addf %710, %713 : vector<7x7xf32>
    %c131 = arith.constant 131 : index
    %715 = memref.load %arg4[%c131] : memref<132xf32, #tpu.memory_space<smem>>
    %716 = vector.broadcast %715 : f32 to vector<7x7xf32>
    %717 = arith.mulf %716, %59 : vector<7x7xf32>
    %718 = arith.addf %714, %717 : vector<7x7xf32>
    %c10_174 = arith.constant 10 : index
    %719 = memref.load %arg5[%c10_174] : memref<11xf32, #tpu.memory_space<smem>>
    %720 = vector.broadcast %719 : f32 to vector<7x7xf32>
    %721 = arith.addf %718, %720 : vector<7x7xf32>
    %cst_175 = arith.constant 1.100000e+00 : f32
    %722 = vector.broadcast %cst_175 : f32 to vector<7x7xf32>
    %723 = arith.maximumf %721, %722 : vector<7x7xf32>
    %cst_176 = arith.constant -0.899999976 : f32
    %724 = vector.broadcast %cst_176 : f32 to vector<7x7xf32>
    %725 = arith.minimumf %723, %724 : vector<7x7xf32>
    %cst_177 = arith.constant 0.000000e+00 : f32
    %726 = vector.broadcast %cst_177 : f32 to vector<7x7xf32>
    %727 = arith.maximumf %725, %726 : vector<7x7xf32>
    %c0_178 = arith.constant 0 : index
    %c10_179 = arith.constant 10 : index
    %c0_180 = arith.constant 0 : index
    %c0_181 = arith.constant 0 : index
    %728 = vector.load %arg6[%c0_178, %c10_179, %c0_180, %c0_181] : memref<2x11x7x7xf32, #tpu.memory_space<vmem>>, vector<1x1x7x7xf32>
    %729 = vector.shape_cast %728 : vector<1x1x7x7xf32> to vector<7x7xf32>
    %730 = vector.shape_cast %727 : vector<7x7xf32> to vector<1x1x7x7xf32>
    tpu.vector_store %arg6[%c0_178, %c10_179, %c0_180, %c0_181], %730 {strides = array<i32>} : memref<2x11x7x7xf32, #tpu.memory_space<vmem>>, vector<1x1x7x7xf32>,
    %c1_182 = arith.constant 1 : index
    %c0_183 = arith.constant 0 : index
    %c0_184 = arith.constant 0 : index
    %c0_185 = arith.constant 0 : index
    %731 = vector.load %arg1[%c1_182, %c0_183, %c0_184, %c0_185] : memref<2x3x10x10xf32, #tpu.memory_space<vmem>>, vector<1x1x10x10xf32>
    %732 = vector.shape_cast %731 : vector<1x1x10x10xf32> to vector<10x10xf32>
    %c0_186 = arith.constant 0 : index
    %c0_187 = arith.constant 0 : index
    %c0_188 = arith.constant 0 : index
    %733 = vector.load %arg2[%c0_186, %c0_187, %c0_188] : memref<2x7x10xf32, #tpu.memory_space<vmem>>, vector<1x7x10xf32>
    %734 = vector.shape_cast %733 : vector<1x7x10xf32> to vector<7x10xf32>
    %cst_189 = arith.constant dense<0.000000e+00> : vector<7x10xf32>
    %735 = tpu.matmul %734, %732, %cst_189 {dimension_numbers = #tpu.dot_dimension_numbers<[1], [0], [0], [1], [0, 0, 1, 1], [], []>} : vector<7x10xf32>, vector<10x10xf32>, vector<7x10xf32> -> vector<7x10xf32>
    %c0_190 = arith.constant 0 : index
    %c0_191 = arith.constant 0 : index
    %c0_192 = arith.constant 0 : index
    %736 = vector.load %arg3[%c0_190, %c0_191, %c0_192] : memref<2x10x7xf32, #tpu.memory_space<vmem>>, vector<1x10x7xf32>
    %737 = vector.shape_cast %736 : vector<1x10x7xf32> to vector<10x7xf32>
    %cst_193 = arith.constant dense<0.000000e+00> : vector<7x7xf32>
    %738 = tpu.matmul %735, %737, %cst_193 {dimension_numbers = #tpu.dot_dimension_numbers<[1], [0], [0], [1], [0, 0, 1, 1], [], []>} : vector<7x10xf32>, vector<10x7xf32>, vector<7x7xf32> -> vector<7x7xf32>
    %c1_194 = arith.constant 1 : index
    %c0_195 = arith.constant 0 : index
    %c0_196 = arith.constant 0 : index
    %739 = vector.load %arg3[%c1_194, %c0_195, %c0_196] : memref<2x10x7xf32, #tpu.memory_space<vmem>>, vector<1x10x7xf32>
    %740 = vector.shape_cast %739 : vector<1x10x7xf32> to vector<10x7xf32>
    %cst_197 = arith.constant dense<0.000000e+00> : vector<7x7xf32>
    %741 = tpu.matmul %735, %740, %cst_197 {dimension_numbers = #tpu.dot_dimension_numbers<[1], [0], [0], [1], [0, 0, 1, 1], [], []>} : vector<7x10xf32>, vector<10x7xf32>, vector<7x7xf32> -> vector<7x7xf32>
    %c1_198 = arith.constant 1 : index
    %c0_199 = arith.constant 0 : index
    %c0_200 = arith.constant 0 : index
    %742 = vector.load %arg2[%c1_198, %c0_199, %c0_200] : memref<2x7x10xf32, #tpu.memory_space<vmem>>, vector<1x7x10xf32>
    %743 = vector.shape_cast %742 : vector<1x7x10xf32> to vector<7x10xf32>
    %cst_201 = arith.constant dense<0.000000e+00> : vector<7x10xf32>
    %744 = tpu.matmul %743, %732, %cst_201 {dimension_numbers = #tpu.dot_dimension_numbers<[1], [0], [0], [1], [0, 0, 1, 1], [], []>} : vector<7x10xf32>, vector<10x10xf32>, vector<7x10xf32> -> vector<7x10xf32>
    %c0_202 = arith.constant 0 : index
    %c0_203 = arith.constant 0 : index
    %c0_204 = arith.constant 0 : index
    %745 = vector.load %arg3[%c0_202, %c0_203, %c0_204] : memref<2x10x7xf32, #tpu.memory_space<vmem>>, vector<1x10x7xf32>
    %746 = vector.shape_cast %745 : vector<1x10x7xf32> to vector<10x7xf32>
    %cst_205 = arith.constant dense<0.000000e+00> : vector<7x7xf32>
    %747 = tpu.matmul %744, %746, %cst_205 {dimension_numbers = #tpu.dot_dimension_numbers<[1], [0], [0], [1], [0, 0, 1, 1], [], []>} : vector<7x10xf32>, vector<10x7xf32>, vector<7x7xf32> -> vector<7x7xf32>
    %c1_206 = arith.constant 1 : index
    %c0_207 = arith.constant 0 : index
    %c0_208 = arith.constant 0 : index
    %748 = vector.load %arg3[%c1_206, %c0_207, %c0_208] : memref<2x10x7xf32, #tpu.memory_space<vmem>>, vector<1x10x7xf32>
    %749 = vector.shape_cast %748 : vector<1x10x7xf32> to vector<10x7xf32>
    %cst_209 = arith.constant dense<0.000000e+00> : vector<7x7xf32>
    %750 = tpu.matmul %744, %749, %cst_209 {dimension_numbers = #tpu.dot_dimension_numbers<[1], [0], [0], [1], [0, 0, 1, 1], [], []>} : vector<7x10xf32>, vector<10x7xf32>, vector<7x7xf32> -> vector<7x7xf32>
    %c1_210 = arith.constant 1 : index
    %c1_211 = arith.constant 1 : index
    %c0_212 = arith.constant 0 : index
    %c0_213 = arith.constant 0 : index
    %751 = vector.load %arg1[%c1_210, %c1_211, %c0_212, %c0_213] : memref<2x3x10x10xf32, #tpu.memory_space<vmem>>, vector<1x1x10x10xf32>
    %752 = vector.shape_cast %751 : vector<1x1x10x10xf32> to vector<10x10xf32>
    %c0_214 = arith.constant 0 : index
    %c0_215 = arith.constant 0 : index
    %c0_216 = arith.constant 0 : index
    %753 = vector.load %arg2[%c0_214, %c0_215, %c0_216] : memref<2x7x10xf32, #tpu.memory_space<vmem>>, vector<1x7x10xf32>
    %754 = vector.shape_cast %753 : vector<1x7x10xf32> to vector<7x10xf32>
    %cst_217 = arith.constant dense<0.000000e+00> : vector<7x10xf32>
    %755 = tpu.matmul %754, %752, %cst_217 {dimension_numbers = #tpu.dot_dimension_numbers<[1], [0], [0], [1], [0, 0, 1, 1], [], []>} : vector<7x10xf32>, vector<10x10xf32>, vector<7x10xf32> -> vector<7x10xf32>
    %c0_218 = arith.constant 0 : index
    %c0_219 = arith.constant 0 : index
    %c0_220 = arith.constant 0 : index
    %756 = vector.load %arg3[%c0_218, %c0_219, %c0_220] : memref<2x10x7xf32, #tpu.memory_space<vmem>>, vector<1x10x7xf32>
    %757 = vector.shape_cast %756 : vector<1x10x7xf32> to vector<10x7xf32>
    %cst_221 = arith.constant dense<0.000000e+00> : vector<7x7xf32>
    %758 = tpu.matmul %755, %757, %cst_221 {dimension_numbers = #tpu.dot_dimension_numbers<[1], [0], [0], [1], [0, 0, 1, 1], [], []>} : vector<7x10xf32>, vector<10x7xf32>, vector<7x7xf32> -> vector<7x7xf32>
    %c1_222 = arith.constant 1 : index
    %c0_223 = arith.constant 0 : index
    %c0_224 = arith.constant 0 : index
    %759 = vector.load %arg3[%c1_222, %c0_223, %c0_224] : memref<2x10x7xf32, #tpu.memory_space<vmem>>, vector<1x10x7xf32>
    %760 = vector.shape_cast %759 : vector<1x10x7xf32> to vector<10x7xf32>
    %cst_225 = arith.constant dense<0.000000e+00> : vector<7x7xf32>
    %761 = tpu.matmul %755, %760, %cst_225 {dimension_numbers = #tpu.dot_dimension_numbers<[1], [0], [0], [1], [0, 0, 1, 1], [], []>} : vector<7x10xf32>, vector<10x7xf32>, vector<7x7xf32> -> vector<7x7xf32>
    %c1_226 = arith.constant 1 : index
    %c0_227 = arith.constant 0 : index
    %c0_228 = arith.constant 0 : index
    %762 = vector.load %arg2[%c1_226, %c0_227, %c0_228] : memref<2x7x10xf32, #tpu.memory_space<vmem>>, vector<1x7x10xf32>
    %763 = vector.shape_cast %762 : vector<1x7x10xf32> to vector<7x10xf32>
    %cst_229 = arith.constant dense<0.000000e+00> : vector<7x10xf32>
    %764 = tpu.matmul %763, %752, %cst_229 {dimension_numbers = #tpu.dot_dimension_numbers<[1], [0], [0], [1], [0, 0, 1, 1], [], []>} : vector<7x10xf32>, vector<10x10xf32>, vector<7x10xf32> -> vector<7x10xf32>
    %c0_230 = arith.constant 0 : index
    %c0_231 = arith.constant 0 : index
    %c0_232 = arith.constant 0 : index
    %765 = vector.load %arg3[%c0_230, %c0_231, %c0_232] : memref<2x10x7xf32, #tpu.memory_space<vmem>>, vector<1x10x7xf32>
    %766 = vector.shape_cast %765 : vector<1x10x7xf32> to vector<10x7xf32>
    %cst_233 = arith.constant dense<0.000000e+00> : vector<7x7xf32>
    %767 = tpu.matmul %764, %766, %cst_233 {dimension_numbers = #tpu.dot_dimension_numbers<[1], [0], [0], [1], [0, 0, 1, 1], [], []>} : vector<7x10xf32>, vector<10x7xf32>, vector<7x7xf32> -> vector<7x7xf32>
    %c1_234 = arith.constant 1 : index
    %c0_235 = arith.constant 0 : index
    %c0_236 = arith.constant 0 : index
    %768 = vector.load %arg3[%c1_234, %c0_235, %c0_236] : memref<2x10x7xf32, #tpu.memory_space<vmem>>, vector<1x10x7xf32>
    %769 = vector.shape_cast %768 : vector<1x10x7xf32> to vector<10x7xf32>
    %cst_237 = arith.constant dense<0.000000e+00> : vector<7x7xf32>
    %770 = tpu.matmul %764, %769, %cst_237 {dimension_numbers = #tpu.dot_dimension_numbers<[1], [0], [0], [1], [0, 0, 1, 1], [], []>} : vector<7x10xf32>, vector<10x7xf32>, vector<7x7xf32> -> vector<7x7xf32>
    %c1_238 = arith.constant 1 : index
    %c2_239 = arith.constant 2 : index
    %c0_240 = arith.constant 0 : index
    %c0_241 = arith.constant 0 : index
    %771 = vector.load %arg1[%c1_238, %c2_239, %c0_240, %c0_241] : memref<2x3x10x10xf32, #tpu.memory_space<vmem>>, vector<1x1x10x10xf32>
    %772 = vector.shape_cast %771 : vector<1x1x10x10xf32> to vector<10x10xf32>
    %c0_242 = arith.constant 0 : index
    %c0_243 = arith.constant 0 : index
    %c0_244 = arith.constant 0 : index
    %773 = vector.load %arg2[%c0_242, %c0_243, %c0_244] : memref<2x7x10xf32, #tpu.memory_space<vmem>>, vector<1x7x10xf32>
    %774 = vector.shape_cast %773 : vector<1x7x10xf32> to vector<7x10xf32>
    %cst_245 = arith.constant dense<0.000000e+00> : vector<7x10xf32>
    %775 = tpu.matmul %774, %772, %cst_245 {dimension_numbers = #tpu.dot_dimension_numbers<[1], [0], [0], [1], [0, 0, 1, 1], [], []>} : vector<7x10xf32>, vector<10x10xf32>, vector<7x10xf32> -> vector<7x10xf32>
    %c0_246 = arith.constant 0 : index
    %c0_247 = arith.constant 0 : index
    %c0_248 = arith.constant 0 : index
    %776 = vector.load %arg3[%c0_246, %c0_247, %c0_248] : memref<2x10x7xf32, #tpu.memory_space<vmem>>, vector<1x10x7xf32>
    %777 = vector.shape_cast %776 : vector<1x10x7xf32> to vector<10x7xf32>
    %cst_249 = arith.constant dense<0.000000e+00> : vector<7x7xf32>
    %778 = tpu.matmul %775, %777, %cst_249 {dimension_numbers = #tpu.dot_dimension_numbers<[1], [0], [0], [1], [0, 0, 1, 1], [], []>} : vector<7x10xf32>, vector<10x7xf32>, vector<7x7xf32> -> vector<7x7xf32>
    %c1_250 = arith.constant 1 : index
    %c0_251 = arith.constant 0 : index
    %c0_252 = arith.constant 0 : index
    %779 = vector.load %arg3[%c1_250, %c0_251, %c0_252] : memref<2x10x7xf32, #tpu.memory_space<vmem>>, vector<1x10x7xf32>
    %780 = vector.shape_cast %779 : vector<1x10x7xf32> to vector<10x7xf32>
    %cst_253 = arith.constant dense<0.000000e+00> : vector<7x7xf32>
    %781 = tpu.matmul %775, %780, %cst_253 {dimension_numbers = #tpu.dot_dimension_numbers<[1], [0], [0], [1], [0, 0, 1, 1], [], []>} : vector<7x10xf32>, vector<10x7xf32>, vector<7x7xf32> -> vector<7x7xf32>
    %c1_254 = arith.constant 1 : index
    %c0_255 = arith.constant 0 : index
    %c0_256 = arith.constant 0 : index
    %782 = vector.load %arg2[%c1_254, %c0_255, %c0_256] : memref<2x7x10xf32, #tpu.memory_space<vmem>>, vector<1x7x10xf32>
    %783 = vector.shape_cast %782 : vector<1x7x10xf32> to vector<7x10xf32>
    %cst_257 = arith.constant dense<0.000000e+00> : vector<7x10xf32>
    %784 = tpu.matmul %783, %772, %cst_257 {dimension_numbers = #tpu.dot_dimension_numbers<[1], [0], [0], [1], [0, 0, 1, 1], [], []>} : vector<7x10xf32>, vector<10x10xf32>, vector<7x10xf32> -> vector<7x10xf32>
    %c0_258 = arith.constant 0 : index
    %c0_259 = arith.constant 0 : index
    %c0_260 = arith.constant 0 : index
    %785 = vector.load %arg3[%c0_258, %c0_259, %c0_260] : memref<2x10x7xf32, #tpu.memory_space<vmem>>, vector<1x10x7xf32>
    %786 = vector.shape_cast %785 : vector<1x10x7xf32> to vector<10x7xf32>
    %cst_261 = arith.constant dense<0.000000e+00> : vector<7x7xf32>
    %787 = tpu.matmul %784, %786, %cst_261 {dimension_numbers = #tpu.dot_dimension_numbers<[1], [0], [0], [1], [0, 0, 1, 1], [], []>} : vector<7x10xf32>, vector<10x7xf32>, vector<7x7xf32> -> vector<7x7xf32>
    %c1_262 = arith.constant 1 : index
    %c0_263 = arith.constant 0 : index
    %c0_264 = arith.constant 0 : index
    %788 = vector.load %arg3[%c1_262, %c0_263, %c0_264] : memref<2x10x7xf32, #tpu.memory_space<vmem>>, vector<1x10x7xf32>
    %789 = vector.shape_cast %788 : vector<1x10x7xf32> to vector<10x7xf32>
    %cst_265 = arith.constant dense<0.000000e+00> : vector<7x7xf32>
    %790 = tpu.matmul %784, %789, %cst_265 {dimension_numbers = #tpu.dot_dimension_numbers<[1], [0], [0], [1], [0, 0, 1, 1], [], []>} : vector<7x10xf32>, vector<10x7xf32>, vector<7x7xf32> -> vector<7x7xf32>
    %cst_266 = arith.constant 0.000000e+00 : f32
    %791 = vector.broadcast %cst_266 : f32 to vector<7x7xf32>
    %c0_267 = arith.constant 0 : index
    %792 = memref.load %arg4[%c0_267] : memref<132xf32, #tpu.memory_space<smem>>
    %793 = vector.broadcast %792 : f32 to vector<7x7xf32>
    %794 = arith.mulf %793, %738 : vector<7x7xf32>
    %795 = arith.addf %791, %794 : vector<7x7xf32>
    %c1_268 = arith.constant 1 : index
    %796 = memref.load %arg4[%c1_268] : memref<132xf32, #tpu.memory_space<smem>>
    %797 = vector.broadcast %796 : f32 to vector<7x7xf32>
    %798 = arith.mulf %797, %741 : vector<7x7xf32>
    %799 = arith.addf %795, %798 : vector<7x7xf32>
    %c2_269 = arith.constant 2 : index
    %800 = memref.load %arg4[%c2_269] : memref<132xf32, #tpu.memory_space<smem>>
    %801 = vector.broadcast %800 : f32 to vector<7x7xf32>
    %802 = arith.mulf %801, %747 : vector<7x7xf32>
    %803 = arith.addf %799, %802 : vector<7x7xf32>
    %c3_270 = arith.constant 3 : index
    %804 = memref.load %arg4[%c3_270] : memref<132xf32, #tpu.memory_space<smem>>
    %805 = vector.broadcast %804 : f32 to vector<7x7xf32>
    %806 = arith.mulf %805, %750 : vector<7x7xf32>
    %807 = arith.addf %803, %806 : vector<7x7xf32>
    %c4_271 = arith.constant 4 : index
    %808 = memref.load %arg4[%c4_271] : memref<132xf32, #tpu.memory_space<smem>>
    %809 = vector.broadcast %808 : f32 to vector<7x7xf32>
    %810 = arith.mulf %809, %758 : vector<7x7xf32>
    %811 = arith.addf %807, %810 : vector<7x7xf32>
    %c5_272 = arith.constant 5 : index
    %812 = memref.load %arg4[%c5_272] : memref<132xf32, #tpu.memory_space<smem>>
    %813 = vector.broadcast %812 : f32 to vector<7x7xf32>
    %814 = arith.mulf %813, %761 : vector<7x7xf32>
    %815 = arith.addf %811, %814 : vector<7x7xf32>
    %c6_273 = arith.constant 6 : index
    %816 = memref.load %arg4[%c6_273] : memref<132xf32, #tpu.memory_space<smem>>
    %817 = vector.broadcast %816 : f32 to vector<7x7xf32>
    %818 = arith.mulf %817, %767 : vector<7x7xf32>
    %819 = arith.addf %815, %818 : vector<7x7xf32>
    %c7_274 = arith.constant 7 : index
    %820 = memref.load %arg4[%c7_274] : memref<132xf32, #tpu.memory_space<smem>>
    %821 = vector.broadcast %820 : f32 to vector<7x7xf32>
    %822 = arith.mulf %821, %770 : vector<7x7xf32>
    %823 = arith.addf %819, %822 : vector<7x7xf32>
    %c8_275 = arith.constant 8 : index
    %824 = memref.load %arg4[%c8_275] : memref<132xf32, #tpu.memory_space<smem>>
    %825 = vector.broadcast %824 : f32 to vector<7x7xf32>
    %826 = arith.mulf %825, %778 : vector<7x7xf32>
    %827 = arith.addf %823, %826 : vector<7x7xf32>
    %c9_276 = arith.constant 9 : index
    %828 = memref.load %arg4[%c9_276] : memref<132xf32, #tpu.memory_space<smem>>
    %829 = vector.broadcast %828 : f32 to vector<7x7xf32>
    %830 = arith.mulf %829, %781 : vector<7x7xf32>
    %831 = arith.addf %827, %830 : vector<7x7xf32>
    %c10_277 = arith.constant 10 : index
    %832 = memref.load %arg4[%c10_277] : memref<132xf32, #tpu.memory_space<smem>>
    %833 = vector.broadcast %832 : f32 to vector<7x7xf32>
    %834 = arith.mulf %833, %787 : vector<7x7xf32>
    %835 = arith.addf %831, %834 : vector<7x7xf32>
    %c11_278 = arith.constant 11 : index
    %836 = memref.load %arg4[%c11_278] : memref<132xf32, #tpu.memory_space<smem>>
    %837 = vector.broadcast %836 : f32 to vector<7x7xf32>
    %838 = arith.mulf %837, %790 : vector<7x7xf32>
    %839 = arith.addf %835, %838 : vector<7x7xf32>
    %c0_279 = arith.constant 0 : index
    %840 = memref.load %arg5[%c0_279] : memref<11xf32, #tpu.memory_space<smem>>
    %841 = vector.broadcast %840 : f32 to vector<7x7xf32>
    %842 = arith.addf %839, %841 : vector<7x7xf32>
    %cst_280 = arith.constant 1.100000e+00 : f32
    %843 = vector.broadcast %cst_280 : f32 to vector<7x7xf32>
    %844 = arith.maximumf %842, %843 : vector<7x7xf32>
    %cst_281 = arith.constant -0.899999976 : f32
    %845 = vector.broadcast %cst_281 : f32 to vector<7x7xf32>
    %846 = arith.minimumf %844, %845 : vector<7x7xf32>
    %cst_282 = arith.constant 0.000000e+00 : f32
    %847 = vector.broadcast %cst_282 : f32 to vector<7x7xf32>
    %848 = arith.maximumf %846, %847 : vector<7x7xf32>
    %c1_283 = arith.constant 1 : index
    %c0_284 = arith.constant 0 : index
    %c0_285 = arith.constant 0 : index
    %c0_286 = arith.constant 0 : index
    %849 = vector.load %arg6[%c1_283, %c0_284, %c0_285, %c0_286] : memref<2x11x7x7xf32, #tpu.memory_space<vmem>>, vector<1x1x7x7xf32>
    %850 = vector.shape_cast %849 : vector<1x1x7x7xf32> to vector<7x7xf32>
    %851 = vector.shape_cast %848 : vector<7x7xf32> to vector<1x1x7x7xf32>
    tpu.vector_store %arg6[%c1_283, %c0_284, %c0_285, %c0_286], %851 {strides = array<i32>} : memref<2x11x7x7xf32, #tpu.memory_space<vmem>>, vector<1x1x7x7xf32>,
    %cst_287 = arith.constant 0.000000e+00 : f32
    %852 = vector.broadcast %cst_287 : f32 to vector<7x7xf32>
    %c12_288 = arith.constant 12 : index
    %853 = memref.load %arg4[%c12_288] : memref<132xf32, #tpu.memory_space<smem>>
    %854 = vector.broadcast %853 : f32 to vector<7x7xf32>
    %855 = arith.mulf %854, %738 : vector<7x7xf32>
    %856 = arith.addf %852, %855 : vector<7x7xf32>
    %c13_289 = arith.constant 13 : index
    %857 = memref.load %arg4[%c13_289] : memref<132xf32, #tpu.memory_space<smem>>
    %858 = vector.broadcast %857 : f32 to vector<7x7xf32>
    %859 = arith.mulf %858, %741 : vector<7x7xf32>
    %860 = arith.addf %856, %859 : vector<7x7xf32>
    %c14_290 = arith.constant 14 : index
    %861 = memref.load %arg4[%c14_290] : memref<132xf32, #tpu.memory_space<smem>>
    %862 = vector.broadcast %861 : f32 to vector<7x7xf32>
    %863 = arith.mulf %862, %747 : vector<7x7xf32>
    %864 = arith.addf %860, %863 : vector<7x7xf32>
    %c15_291 = arith.constant 15 : index
    %865 = memref.load %arg4[%c15_291] : memref<132xf32, #tpu.memory_space<smem>>
    %866 = vector.broadcast %865 : f32 to vector<7x7xf32>
    %867 = arith.mulf %866, %750 : vector<7x7xf32>
    %868 = arith.addf %864, %867 : vector<7x7xf32>
    %c16_292 = arith.constant 16 : index
    %869 = memref.load %arg4[%c16_292] : memref<132xf32, #tpu.memory_space<smem>>
    %870 = vector.broadcast %869 : f32 to vector<7x7xf32>
    %871 = arith.mulf %870, %758 : vector<7x7xf32>
    %872 = arith.addf %868, %871 : vector<7x7xf32>
    %c17_293 = arith.constant 17 : index
    %873 = memref.load %arg4[%c17_293] : memref<132xf32, #tpu.memory_space<smem>>
    %874 = vector.broadcast %873 : f32 to vector<7x7xf32>
    %875 = arith.mulf %874, %761 : vector<7x7xf32>
    %876 = arith.addf %872, %875 : vector<7x7xf32>
    %c18_294 = arith.constant 18 : index
    %877 = memref.load %arg4[%c18_294] : memref<132xf32, #tpu.memory_space<smem>>
    %878 = vector.broadcast %877 : f32 to vector<7x7xf32>
    %879 = arith.mulf %878, %767 : vector<7x7xf32>
    %880 = arith.addf %876, %879 : vector<7x7xf32>
    %c19_295 = arith.constant 19 : index
    %881 = memref.load %arg4[%c19_295] : memref<132xf32, #tpu.memory_space<smem>>
    %882 = vector.broadcast %881 : f32 to vector<7x7xf32>
    %883 = arith.mulf %882, %770 : vector<7x7xf32>
    %884 = arith.addf %880, %883 : vector<7x7xf32>
    %c20_296 = arith.constant 20 : index
    %885 = memref.load %arg4[%c20_296] : memref<132xf32, #tpu.memory_space<smem>>
    %886 = vector.broadcast %885 : f32 to vector<7x7xf32>
    %887 = arith.mulf %886, %778 : vector<7x7xf32>
    %888 = arith.addf %884, %887 : vector<7x7xf32>
    %c21_297 = arith.constant 21 : index
    %889 = memref.load %arg4[%c21_297] : memref<132xf32, #tpu.memory_space<smem>>
    %890 = vector.broadcast %889 : f32 to vector<7x7xf32>
    %891 = arith.mulf %890, %781 : vector<7x7xf32>
    %892 = arith.addf %888, %891 : vector<7x7xf32>
    %c22_298 = arith.constant 22 : index
    %893 = memref.load %arg4[%c22_298] : memref<132xf32, #tpu.memory_space<smem>>
    %894 = vector.broadcast %893 : f32 to vector<7x7xf32>
    %895 = arith.mulf %894, %787 : vector<7x7xf32>
    %896 = arith.addf %892, %895 : vector<7x7xf32>
    %c23_299 = arith.constant 23 : index
    %897 = memref.load %arg4[%c23_299] : memref<132xf32, #tpu.memory_space<smem>>
    %898 = vector.broadcast %897 : f32 to vector<7x7xf32>
    %899 = arith.mulf %898, %790 : vector<7x7xf32>
    %900 = arith.addf %896, %899 : vector<7x7xf32>
    %c1_300 = arith.constant 1 : index
    %901 = memref.load %arg5[%c1_300] : memref<11xf32, #tpu.memory_space<smem>>
    %902 = vector.broadcast %901 : f32 to vector<7x7xf32>
    %903 = arith.addf %900, %902 : vector<7x7xf32>
    %cst_301 = arith.constant 1.100000e+00 : f32
    %904 = vector.broadcast %cst_301 : f32 to vector<7x7xf32>
    %905 = arith.maximumf %903, %904 : vector<7x7xf32>
    %cst_302 = arith.constant -0.899999976 : f32
    %906 = vector.broadcast %cst_302 : f32 to vector<7x7xf32>
    %907 = arith.minimumf %905, %906 : vector<7x7xf32>
    %cst_303 = arith.constant 0.000000e+00 : f32
    %908 = vector.broadcast %cst_303 : f32 to vector<7x7xf32>
    %909 = arith.maximumf %907, %908 : vector<7x7xf32>
    %c1_304 = arith.constant 1 : index
    %c1_305 = arith.constant 1 : index
    %c0_306 = arith.constant 0 : index
    %c0_307 = arith.constant 0 : index
    %910 = vector.load %arg6[%c1_304, %c1_305, %c0_306, %c0_307] : memref<2x11x7x7xf32, #tpu.memory_space<vmem>>, vector<1x1x7x7xf32>
    %911 = vector.shape_cast %910 : vector<1x1x7x7xf32> to vector<7x7xf32>
    %912 = vector.shape_cast %909 : vector<7x7xf32> to vector<1x1x7x7xf32>
    tpu.vector_store %arg6[%c1_304, %c1_305, %c0_306, %c0_307], %912 {strides = array<i32>} : memref<2x11x7x7xf32, #tpu.memory_space<vmem>>, vector<1x1x7x7xf32>,
    %cst_308 = arith.constant 0.000000e+00 : f32
    %913 = vector.broadcast %cst_308 : f32 to vector<7x7xf32>
    %c24_309 = arith.constant 24 : index
    %914 = memref.load %arg4[%c24_309] : memref<132xf32, #tpu.memory_space<smem>>
    %915 = vector.broadcast %914 : f32 to vector<7x7xf32>
    %916 = arith.mulf %915, %738 : vector<7x7xf32>
    %917 = arith.addf %913, %916 : vector<7x7xf32>
    %c25_310 = arith.constant 25 : index
    %918 = memref.load %arg4[%c25_310] : memref<132xf32, #tpu.memory_space<smem>>
    %919 = vector.broadcast %918 : f32 to vector<7x7xf32>
    %920 = arith.mulf %919, %741 : vector<7x7xf32>
    %921 = arith.addf %917, %920 : vector<7x7xf32>
    %c26_311 = arith.constant 26 : index
    %922 = memref.load %arg4[%c26_311] : memref<132xf32, #tpu.memory_space<smem>>
    %923 = vector.broadcast %922 : f32 to vector<7x7xf32>
    %924 = arith.mulf %923, %747 : vector<7x7xf32>
    %925 = arith.addf %921, %924 : vector<7x7xf32>
    %c27_312 = arith.constant 27 : index
    %926 = memref.load %arg4[%c27_312] : memref<132xf32, #tpu.memory_space<smem>>
    %927 = vector.broadcast %926 : f32 to vector<7x7xf32>
    %928 = arith.mulf %927, %750 : vector<7x7xf32>
    %929 = arith.addf %925, %928 : vector<7x7xf32>
    %c28_313 = arith.constant 28 : index
    %930 = memref.load %arg4[%c28_313] : memref<132xf32, #tpu.memory_space<smem>>
    %931 = vector.broadcast %930 : f32 to vector<7x7xf32>
    %932 = arith.mulf %931, %758 : vector<7x7xf32>
    %933 = arith.addf %929, %932 : vector<7x7xf32>
    %c29_314 = arith.constant 29 : index
    %934 = memref.load %arg4[%c29_314] : memref<132xf32, #tpu.memory_space<smem>>
    %935 = vector.broadcast %934 : f32 to vector<7x7xf32>
    %936 = arith.mulf %935, %761 : vector<7x7xf32>
    %937 = arith.addf %933, %936 : vector<7x7xf32>
    %c30_315 = arith.constant 30 : index
    %938 = memref.load %arg4[%c30_315] : memref<132xf32, #tpu.memory_space<smem>>
    %939 = vector.broadcast %938 : f32 to vector<7x7xf32>
    %940 = arith.mulf %939, %767 : vector<7x7xf32>
    %941 = arith.addf %937, %940 : vector<7x7xf32>
    %c31_316 = arith.constant 31 : index
    %942 = memref.load %arg4[%c31_316] : memref<132xf32, #tpu.memory_space<smem>>
    %943 = vector.broadcast %942 : f32 to vector<7x7xf32>
    %944 = arith.mulf %943, %770 : vector<7x7xf32>
    %945 = arith.addf %941, %944 : vector<7x7xf32>
    %c32_317 = arith.constant 32 : index
    %946 = memref.load %arg4[%c32_317] : memref<132xf32, #tpu.memory_space<smem>>
    %947 = vector.broadcast %946 : f32 to vector<7x7xf32>
    %948 = arith.mulf %947, %778 : vector<7x7xf32>
    %949 = arith.addf %945, %948 : vector<7x7xf32>
    %c33_318 = arith.constant 33 : index
    %950 = memref.load %arg4[%c33_318] : memref<132xf32, #tpu.memory_space<smem>>
    %951 = vector.broadcast %950 : f32 to vector<7x7xf32>
    %952 = arith.mulf %951, %781 : vector<7x7xf32>
    %953 = arith.addf %949, %952 : vector<7x7xf32>
    %c34_319 = arith.constant 34 : index
    %954 = memref.load %arg4[%c34_319] : memref<132xf32, #tpu.memory_space<smem>>
    %955 = vector.broadcast %954 : f32 to vector<7x7xf32>
    %956 = arith.mulf %955, %787 : vector<7x7xf32>
    %957 = arith.addf %953, %956 : vector<7x7xf32>
    %c35_320 = arith.constant 35 : index
    %958 = memref.load %arg4[%c35_320] : memref<132xf32, #tpu.memory_space<smem>>
    %959 = vector.broadcast %958 : f32 to vector<7x7xf32>
    %960 = arith.mulf %959, %790 : vector<7x7xf32>
    %961 = arith.addf %957, %960 : vector<7x7xf32>
    %c2_321 = arith.constant 2 : index
    %962 = memref.load %arg5[%c2_321] : memref<11xf32, #tpu.memory_space<smem>>
    %963 = vector.broadcast %962 : f32 to vector<7x7xf32>
    %964 = arith.addf %961, %963 : vector<7x7xf32>
    %cst_322 = arith.constant 1.100000e+00 : f32
    %965 = vector.broadcast %cst_322 : f32 to vector<7x7xf32>
    %966 = arith.maximumf %964, %965 : vector<7x7xf32>
    %cst_323 = arith.constant -0.899999976 : f32
    %967 = vector.broadcast %cst_323 : f32 to vector<7x7xf32>
    %968 = arith.minimumf %966, %967 : vector<7x7xf32>
    %cst_324 = arith.constant 0.000000e+00 : f32
    %969 = vector.broadcast %cst_324 : f32 to vector<7x7xf32>
    %970 = arith.maximumf %968, %969 : vector<7x7xf32>
    %c1_325 = arith.constant 1 : index
    %c2_326 = arith.constant 2 : index
    %c0_327 = arith.constant 0 : index
    %c0_328 = arith.constant 0 : index
    %971 = vector.load %arg6[%c1_325, %c2_326, %c0_327, %c0_328] : memref<2x11x7x7xf32, #tpu.memory_space<vmem>>, vector<1x1x7x7xf32>
    %972 = vector.shape_cast %971 : vector<1x1x7x7xf32> to vector<7x7xf32>
    %973 = vector.shape_cast %970 : vector<7x7xf32> to vector<1x1x7x7xf32>
    tpu.vector_store %arg6[%c1_325, %c2_326, %c0_327, %c0_328], %973 {strides = array<i32>} : memref<2x11x7x7xf32, #tpu.memory_space<vmem>>, vector<1x1x7x7xf32>,
    %cst_329 = arith.constant 0.000000e+00 : f32
    %974 = vector.broadcast %cst_329 : f32 to vector<7x7xf32>
    %c36_330 = arith.constant 36 : index
    %975 = memref.load %arg4[%c36_330] : memref<132xf32, #tpu.memory_space<smem>>
    %976 = vector.broadcast %975 : f32 to vector<7x7xf32>
    %977 = arith.mulf %976, %738 : vector<7x7xf32>
    %978 = arith.addf %974, %977 : vector<7x7xf32>
    %c37_331 = arith.constant 37 : index
    %979 = memref.load %arg4[%c37_331] : memref<132xf32, #tpu.memory_space<smem>>
    %980 = vector.broadcast %979 : f32 to vector<7x7xf32>
    %981 = arith.mulf %980, %741 : vector<7x7xf32>
    %982 = arith.addf %978, %981 : vector<7x7xf32>
    %c38_332 = arith.constant 38 : index
    %983 = memref.load %arg4[%c38_332] : memref<132xf32, #tpu.memory_space<smem>>
    %984 = vector.broadcast %983 : f32 to vector<7x7xf32>
    %985 = arith.mulf %984, %747 : vector<7x7xf32>
    %986 = arith.addf %982, %985 : vector<7x7xf32>
    %c39_333 = arith.constant 39 : index
    %987 = memref.load %arg4[%c39_333] : memref<132xf32, #tpu.memory_space<smem>>
    %988 = vector.broadcast %987 : f32 to vector<7x7xf32>
    %989 = arith.mulf %988, %750 : vector<7x7xf32>
    %990 = arith.addf %986, %989 : vector<7x7xf32>
    %c40_334 = arith.constant 40 : index
    %991 = memref.load %arg4[%c40_334] : memref<132xf32, #tpu.memory_space<smem>>
    %992 = vector.broadcast %991 : f32 to vector<7x7xf32>
    %993 = arith.mulf %992, %758 : vector<7x7xf32>
    %994 = arith.addf %990, %993 : vector<7x7xf32>
    %c41_335 = arith.constant 41 : index
    %995 = memref.load %arg4[%c41_335] : memref<132xf32, #tpu.memory_space<smem>>
    %996 = vector.broadcast %995 : f32 to vector<7x7xf32>
    %997 = arith.mulf %996, %761 : vector<7x7xf32>
    %998 = arith.addf %994, %997 : vector<7x7xf32>
    %c42_336 = arith.constant 42 : index
    %999 = memref.load %arg4[%c42_336] : memref<132xf32, #tpu.memory_space<smem>>
    %1000 = vector.broadcast %999 : f32 to vector<7x7xf32>
    %1001 = arith.mulf %1000, %767 : vector<7x7xf32>
    %1002 = arith.addf %998, %1001 : vector<7x7xf32>
    %c43_337 = arith.constant 43 : index
    %1003 = memref.load %arg4[%c43_337] : memref<132xf32, #tpu.memory_space<smem>>
    %1004 = vector.broadcast %1003 : f32 to vector<7x7xf32>
    %1005 = arith.mulf %1004, %770 : vector<7x7xf32>
    %1006 = arith.addf %1002, %1005 : vector<7x7xf32>
    %c44_338 = arith.constant 44 : index
    %1007 = memref.load %arg4[%c44_338] : memref<132xf32, #tpu.memory_space<smem>>
    %1008 = vector.broadcast %1007 : f32 to vector<7x7xf32>
    %1009 = arith.mulf %1008, %778 : vector<7x7xf32>
    %1010 = arith.addf %1006, %1009 : vector<7x7xf32>
    %c45_339 = arith.constant 45 : index
    %1011 = memref.load %arg4[%c45_339] : memref<132xf32, #tpu.memory_space<smem>>
    %1012 = vector.broadcast %1011 : f32 to vector<7x7xf32>
    %1013 = arith.mulf %1012, %781 : vector<7x7xf32>
    %1014 = arith.addf %1010, %1013 : vector<7x7xf32>
    %c46_340 = arith.constant 46 : index
    %1015 = memref.load %arg4[%c46_340] : memref<132xf32, #tpu.memory_space<smem>>
    %1016 = vector.broadcast %1015 : f32 to vector<7x7xf32>
    %1017 = arith.mulf %1016, %787 : vector<7x7xf32>
    %1018 = arith.addf %1014, %1017 : vector<7x7xf32>
    %c47_341 = arith.constant 47 : index
    %1019 = memref.load %arg4[%c47_341] : memref<132xf32, #tpu.memory_space<smem>>
    %1020 = vector.broadcast %1019 : f32 to vector<7x7xf32>
    %1021 = arith.mulf %1020, %790 : vector<7x7xf32>
    %1022 = arith.addf %1018, %1021 : vector<7x7xf32>
    %c3_342 = arith.constant 3 : index
    %1023 = memref.load %arg5[%c3_342] : memref<11xf32, #tpu.memory_space<smem>>
    %1024 = vector.broadcast %1023 : f32 to vector<7x7xf32>
    %1025 = arith.addf %1022, %1024 : vector<7x7xf32>
    %cst_343 = arith.constant 1.100000e+00 : f32
    %1026 = vector.broadcast %cst_343 : f32 to vector<7x7xf32>
    %1027 = arith.maximumf %1025, %1026 : vector<7x7xf32>
    %cst_344 = arith.constant -0.899999976 : f32
    %1028 = vector.broadcast %cst_344 : f32 to vector<7x7xf32>
    %1029 = arith.minimumf %1027, %1028 : vector<7x7xf32>
    %cst_345 = arith.constant 0.000000e+00 : f32
    %1030 = vector.broadcast %cst_345 : f32 to vector<7x7xf32>
    %1031 = arith.maximumf %1029, %1030 : vector<7x7xf32>
    %c1_346 = arith.constant 1 : index
    %c3_347 = arith.constant 3 : index
    %c0_348 = arith.constant 0 : index
    %c0_349 = arith.constant 0 : index
    %1032 = vector.load %arg6[%c1_346, %c3_347, %c0_348, %c0_349] : memref<2x11x7x7xf32, #tpu.memory_space<vmem>>, vector<1x1x7x7xf32>
    %1033 = vector.shape_cast %1032 : vector<1x1x7x7xf32> to vector<7x7xf32>
    %1034 = vector.shape_cast %1031 : vector<7x7xf32> to vector<1x1x7x7xf32>
    tpu.vector_store %arg6[%c1_346, %c3_347, %c0_348, %c0_349], %1034 {strides = array<i32>} : memref<2x11x7x7xf32, #tpu.memory_space<vmem>>, vector<1x1x7x7xf32>,
    %cst_350 = arith.constant 0.000000e+00 : f32
    %1035 = vector.broadcast %cst_350 : f32 to vector<7x7xf32>
    %c48_351 = arith.constant 48 : index
    %1036 = memref.load %arg4[%c48_351] : memref<132xf32, #tpu.memory_space<smem>>
    %1037 = vector.broadcast %1036 : f32 to vector<7x7xf32>
    %1038 = arith.mulf %1037, %738 : vector<7x7xf32>
    %1039 = arith.addf %1035, %1038 : vector<7x7xf32>
    %c49_352 = arith.constant 49 : index
    %1040 = memref.load %arg4[%c49_352] : memref<132xf32, #tpu.memory_space<smem>>
    %1041 = vector.broadcast %1040 : f32 to vector<7x7xf32>
    %1042 = arith.mulf %1041, %741 : vector<7x7xf32>
    %1043 = arith.addf %1039, %1042 : vector<7x7xf32>
    %c50_353 = arith.constant 50 : index
    %1044 = memref.load %arg4[%c50_353] : memref<132xf32, #tpu.memory_space<smem>>
    %1045 = vector.broadcast %1044 : f32 to vector<7x7xf32>
    %1046 = arith.mulf %1045, %747 : vector<7x7xf32>
    %1047 = arith.addf %1043, %1046 : vector<7x7xf32>
    %c51_354 = arith.constant 51 : index
    %1048 = memref.load %arg4[%c51_354] : memref<132xf32, #tpu.memory_space<smem>>
    %1049 = vector.broadcast %1048 : f32 to vector<7x7xf32>
    %1050 = arith.mulf %1049, %750 : vector<7x7xf32>
    %1051 = arith.addf %1047, %1050 : vector<7x7xf32>
    %c52_355 = arith.constant 52 : index
    %1052 = memref.load %arg4[%c52_355] : memref<132xf32, #tpu.memory_space<smem>>
    %1053 = vector.broadcast %1052 : f32 to vector<7x7xf32>
    %1054 = arith.mulf %1053, %758 : vector<7x7xf32>
    %1055 = arith.addf %1051, %1054 : vector<7x7xf32>
    %c53_356 = arith.constant 53 : index
    %1056 = memref.load %arg4[%c53_356] : memref<132xf32, #tpu.memory_space<smem>>
    %1057 = vector.broadcast %1056 : f32 to vector<7x7xf32>
    %1058 = arith.mulf %1057, %761 : vector<7x7xf32>
    %1059 = arith.addf %1055, %1058 : vector<7x7xf32>
    %c54_357 = arith.constant 54 : index
    %1060 = memref.load %arg4[%c54_357] : memref<132xf32, #tpu.memory_space<smem>>
    %1061 = vector.broadcast %1060 : f32 to vector<7x7xf32>
    %1062 = arith.mulf %1061, %767 : vector<7x7xf32>
    %1063 = arith.addf %1059, %1062 : vector<7x7xf32>
    %c55_358 = arith.constant 55 : index
    %1064 = memref.load %arg4[%c55_358] : memref<132xf32, #tpu.memory_space<smem>>
    %1065 = vector.broadcast %1064 : f32 to vector<7x7xf32>
    %1066 = arith.mulf %1065, %770 : vector<7x7xf32>
    %1067 = arith.addf %1063, %1066 : vector<7x7xf32>
    %c56_359 = arith.constant 56 : index
    %1068 = memref.load %arg4[%c56_359] : memref<132xf32, #tpu.memory_space<smem>>
    %1069 = vector.broadcast %1068 : f32 to vector<7x7xf32>
    %1070 = arith.mulf %1069, %778 : vector<7x7xf32>
    %1071 = arith.addf %1067, %1070 : vector<7x7xf32>
    %c57_360 = arith.constant 57 : index
    %1072 = memref.load %arg4[%c57_360] : memref<132xf32, #tpu.memory_space<smem>>
    %1073 = vector.broadcast %1072 : f32 to vector<7x7xf32>
    %1074 = arith.mulf %1073, %781 : vector<7x7xf32>
    %1075 = arith.addf %1071, %1074 : vector<7x7xf32>
    %c58_361 = arith.constant 58 : index
    %1076 = memref.load %arg4[%c58_361] : memref<132xf32, #tpu.memory_space<smem>>
    %1077 = vector.broadcast %1076 : f32 to vector<7x7xf32>
    %1078 = arith.mulf %1077, %787 : vector<7x7xf32>
    %1079 = arith.addf %1075, %1078 : vector<7x7xf32>
    %c59_362 = arith.constant 59 : index
    %1080 = memref.load %arg4[%c59_362] : memref<132xf32, #tpu.memory_space<smem>>
    %1081 = vector.broadcast %1080 : f32 to vector<7x7xf32>
    %1082 = arith.mulf %1081, %790 : vector<7x7xf32>
    %1083 = arith.addf %1079, %1082 : vector<7x7xf32>
    %c4_363 = arith.constant 4 : index
    %1084 = memref.load %arg5[%c4_363] : memref<11xf32, #tpu.memory_space<smem>>
    %1085 = vector.broadcast %1084 : f32 to vector<7x7xf32>
    %1086 = arith.addf %1083, %1085 : vector<7x7xf32>
    %cst_364 = arith.constant 1.100000e+00 : f32
    %1087 = vector.broadcast %cst_364 : f32 to vector<7x7xf32>
    %1088 = arith.maximumf %1086, %1087 : vector<7x7xf32>
    %cst_365 = arith.constant -0.899999976 : f32
    %1089 = vector.broadcast %cst_365 : f32 to vector<7x7xf32>
    %1090 = arith.minimumf %1088, %1089 : vector<7x7xf32>
    %cst_366 = arith.constant 0.000000e+00 : f32
    %1091 = vector.broadcast %cst_366 : f32 to vector<7x7xf32>
    %1092 = arith.maximumf %1090, %1091 : vector<7x7xf32>
    %c1_367 = arith.constant 1 : index
    %c4_368 = arith.constant 4 : index
    %c0_369 = arith.constant 0 : index
    %c0_370 = arith.constant 0 : index
    %1093 = vector.load %arg6[%c1_367, %c4_368, %c0_369, %c0_370] : memref<2x11x7x7xf32, #tpu.memory_space<vmem>>, vector<1x1x7x7xf32>
    %1094 = vector.shape_cast %1093 : vector<1x1x7x7xf32> to vector<7x7xf32>
    %1095 = vector.shape_cast %1092 : vector<7x7xf32> to vector<1x1x7x7xf32>
    tpu.vector_store %arg6[%c1_367, %c4_368, %c0_369, %c0_370], %1095 {strides = array<i32>} : memref<2x11x7x7xf32, #tpu.memory_space<vmem>>, vector<1x1x7x7xf32>,
    %cst_371 = arith.constant 0.000000e+00 : f32
    %1096 = vector.broadcast %cst_371 : f32 to vector<7x7xf32>
    %c60_372 = arith.constant 60 : index
    %1097 = memref.load %arg4[%c60_372] : memref<132xf32, #tpu.memory_space<smem>>
    %1098 = vector.broadcast %1097 : f32 to vector<7x7xf32>
    %1099 = arith.mulf %1098, %738 : vector<7x7xf32>
    %1100 = arith.addf %1096, %1099 : vector<7x7xf32>
    %c61_373 = arith.constant 61 : index
    %1101 = memref.load %arg4[%c61_373] : memref<132xf32, #tpu.memory_space<smem>>
    %1102 = vector.broadcast %1101 : f32 to vector<7x7xf32>
    %1103 = arith.mulf %1102, %741 : vector<7x7xf32>
    %1104 = arith.addf %1100, %1103 : vector<7x7xf32>
    %c62_374 = arith.constant 62 : index
    %1105 = memref.load %arg4[%c62_374] : memref<132xf32, #tpu.memory_space<smem>>
    %1106 = vector.broadcast %1105 : f32 to vector<7x7xf32>
    %1107 = arith.mulf %1106, %747 : vector<7x7xf32>
    %1108 = arith.addf %1104, %1107 : vector<7x7xf32>
    %c63_375 = arith.constant 63 : index
    %1109 = memref.load %arg4[%c63_375] : memref<132xf32, #tpu.memory_space<smem>>
    %1110 = vector.broadcast %1109 : f32 to vector<7x7xf32>
    %1111 = arith.mulf %1110, %750 : vector<7x7xf32>
    %1112 = arith.addf %1108, %1111 : vector<7x7xf32>
    %c64_376 = arith.constant 64 : index
    %1113 = memref.load %arg4[%c64_376] : memref<132xf32, #tpu.memory_space<smem>>
    %1114 = vector.broadcast %1113 : f32 to vector<7x7xf32>
    %1115 = arith.mulf %1114, %758 : vector<7x7xf32>
    %1116 = arith.addf %1112, %1115 : vector<7x7xf32>
    %c65_377 = arith.constant 65 : index
    %1117 = memref.load %arg4[%c65_377] : memref<132xf32, #tpu.memory_space<smem>>
    %1118 = vector.broadcast %1117 : f32 to vector<7x7xf32>
    %1119 = arith.mulf %1118, %761 : vector<7x7xf32>
    %1120 = arith.addf %1116, %1119 : vector<7x7xf32>
    %c66_378 = arith.constant 66 : index
    %1121 = memref.load %arg4[%c66_378] : memref<132xf32, #tpu.memory_space<smem>>
    %1122 = vector.broadcast %1121 : f32 to vector<7x7xf32>
    %1123 = arith.mulf %1122, %767 : vector<7x7xf32>
    %1124 = arith.addf %1120, %1123 : vector<7x7xf32>
    %c67_379 = arith.constant 67 : index
    %1125 = memref.load %arg4[%c67_379] : memref<132xf32, #tpu.memory_space<smem>>
    %1126 = vector.broadcast %1125 : f32 to vector<7x7xf32>
    %1127 = arith.mulf %1126, %770 : vector<7x7xf32>
    %1128 = arith.addf %1124, %1127 : vector<7x7xf32>
    %c68_380 = arith.constant 68 : index
    %1129 = memref.load %arg4[%c68_380] : memref<132xf32, #tpu.memory_space<smem>>
    %1130 = vector.broadcast %1129 : f32 to vector<7x7xf32>
    %1131 = arith.mulf %1130, %778 : vector<7x7xf32>
    %1132 = arith.addf %1128, %1131 : vector<7x7xf32>
    %c69_381 = arith.constant 69 : index
    %1133 = memref.load %arg4[%c69_381] : memref<132xf32, #tpu.memory_space<smem>>
    %1134 = vector.broadcast %1133 : f32 to vector<7x7xf32>
    %1135 = arith.mulf %1134, %781 : vector<7x7xf32>
    %1136 = arith.addf %1132, %1135 : vector<7x7xf32>
    %c70_382 = arith.constant 70 : index
    %1137 = memref.load %arg4[%c70_382] : memref<132xf32, #tpu.memory_space<smem>>
    %1138 = vector.broadcast %1137 : f32 to vector<7x7xf32>
    %1139 = arith.mulf %1138, %787 : vector<7x7xf32>
    %1140 = arith.addf %1136, %1139 : vector<7x7xf32>
    %c71_383 = arith.constant 71 : index
    %1141 = memref.load %arg4[%c71_383] : memref<132xf32, #tpu.memory_space<smem>>
    %1142 = vector.broadcast %1141 : f32 to vector<7x7xf32>
    %1143 = arith.mulf %1142, %790 : vector<7x7xf32>
    %1144 = arith.addf %1140, %1143 : vector<7x7xf32>
    %c5_384 = arith.constant 5 : index
    %1145 = memref.load %arg5[%c5_384] : memref<11xf32, #tpu.memory_space<smem>>
    %1146 = vector.broadcast %1145 : f32 to vector<7x7xf32>
    %1147 = arith.addf %1144, %1146 : vector<7x7xf32>
    %cst_385 = arith.constant 1.100000e+00 : f32
    %1148 = vector.broadcast %cst_385 : f32 to vector<7x7xf32>
    %1149 = arith.maximumf %1147, %1148 : vector<7x7xf32>
    %cst_386 = arith.constant -0.899999976 : f32
    %1150 = vector.broadcast %cst_386 : f32 to vector<7x7xf32>
    %1151 = arith.minimumf %1149, %1150 : vector<7x7xf32>
    %cst_387 = arith.constant 0.000000e+00 : f32
    %1152 = vector.broadcast %cst_387 : f32 to vector<7x7xf32>
    %1153 = arith.maximumf %1151, %1152 : vector<7x7xf32>
    %c1_388 = arith.constant 1 : index
    %c5_389 = arith.constant 5 : index
    %c0_390 = arith.constant 0 : index
    %c0_391 = arith.constant 0 : index
    %1154 = vector.load %arg6[%c1_388, %c5_389, %c0_390, %c0_391] : memref<2x11x7x7xf32, #tpu.memory_space<vmem>>, vector<1x1x7x7xf32>
    %1155 = vector.shape_cast %1154 : vector<1x1x7x7xf32> to vector<7x7xf32>
    %1156 = vector.shape_cast %1153 : vector<7x7xf32> to vector<1x1x7x7xf32>
    tpu.vector_store %arg6[%c1_388, %c5_389, %c0_390, %c0_391], %1156 {strides = array<i32>} : memref<2x11x7x7xf32, #tpu.memory_space<vmem>>, vector<1x1x7x7xf32>,
    %cst_392 = arith.constant 0.000000e+00 : f32
    %1157 = vector.broadcast %cst_392 : f32 to vector<7x7xf32>
    %c72_393 = arith.constant 72 : index
    %1158 = memref.load %arg4[%c72_393] : memref<132xf32, #tpu.memory_space<smem>>
    %1159 = vector.broadcast %1158 : f32 to vector<7x7xf32>
    %1160 = arith.mulf %1159, %738 : vector<7x7xf32>
    %1161 = arith.addf %1157, %1160 : vector<7x7xf32>
    %c73_394 = arith.constant 73 : index
    %1162 = memref.load %arg4[%c73_394] : memref<132xf32, #tpu.memory_space<smem>>
    %1163 = vector.broadcast %1162 : f32 to vector<7x7xf32>
    %1164 = arith.mulf %1163, %741 : vector<7x7xf32>
    %1165 = arith.addf %1161, %1164 : vector<7x7xf32>
    %c74_395 = arith.constant 74 : index
    %1166 = memref.load %arg4[%c74_395] : memref<132xf32, #tpu.memory_space<smem>>
    %1167 = vector.broadcast %1166 : f32 to vector<7x7xf32>
    %1168 = arith.mulf %1167, %747 : vector<7x7xf32>
    %1169 = arith.addf %1165, %1168 : vector<7x7xf32>
    %c75_396 = arith.constant 75 : index
    %1170 = memref.load %arg4[%c75_396] : memref<132xf32, #tpu.memory_space<smem>>
    %1171 = vector.broadcast %1170 : f32 to vector<7x7xf32>
    %1172 = arith.mulf %1171, %750 : vector<7x7xf32>
    %1173 = arith.addf %1169, %1172 : vector<7x7xf32>
    %c76_397 = arith.constant 76 : index
    %1174 = memref.load %arg4[%c76_397] : memref<132xf32, #tpu.memory_space<smem>>
    %1175 = vector.broadcast %1174 : f32 to vector<7x7xf32>
    %1176 = arith.mulf %1175, %758 : vector<7x7xf32>
    %1177 = arith.addf %1173, %1176 : vector<7x7xf32>
    %c77_398 = arith.constant 77 : index
    %1178 = memref.load %arg4[%c77_398] : memref<132xf32, #tpu.memory_space<smem>>
    %1179 = vector.broadcast %1178 : f32 to vector<7x7xf32>
    %1180 = arith.mulf %1179, %761 : vector<7x7xf32>
    %1181 = arith.addf %1177, %1180 : vector<7x7xf32>
    %c78_399 = arith.constant 78 : index
    %1182 = memref.load %arg4[%c78_399] : memref<132xf32, #tpu.memory_space<smem>>
    %1183 = vector.broadcast %1182 : f32 to vector<7x7xf32>
    %1184 = arith.mulf %1183, %767 : vector<7x7xf32>
    %1185 = arith.addf %1181, %1184 : vector<7x7xf32>
    %c79_400 = arith.constant 79 : index
    %1186 = memref.load %arg4[%c79_400] : memref<132xf32, #tpu.memory_space<smem>>
    %1187 = vector.broadcast %1186 : f32 to vector<7x7xf32>
    %1188 = arith.mulf %1187, %770 : vector<7x7xf32>
    %1189 = arith.addf %1185, %1188 : vector<7x7xf32>
    %c80_401 = arith.constant 80 : index
    %1190 = memref.load %arg4[%c80_401] : memref<132xf32, #tpu.memory_space<smem>>
    %1191 = vector.broadcast %1190 : f32 to vector<7x7xf32>
    %1192 = arith.mulf %1191, %778 : vector<7x7xf32>
    %1193 = arith.addf %1189, %1192 : vector<7x7xf32>
    %c81_402 = arith.constant 81 : index
    %1194 = memref.load %arg4[%c81_402] : memref<132xf32, #tpu.memory_space<smem>>
    %1195 = vector.broadcast %1194 : f32 to vector<7x7xf32>
    %1196 = arith.mulf %1195, %781 : vector<7x7xf32>
    %1197 = arith.addf %1193, %1196 : vector<7x7xf32>
    %c82_403 = arith.constant 82 : index
    %1198 = memref.load %arg4[%c82_403] : memref<132xf32, #tpu.memory_space<smem>>
    %1199 = vector.broadcast %1198 : f32 to vector<7x7xf32>
    %1200 = arith.mulf %1199, %787 : vector<7x7xf32>
    %1201 = arith.addf %1197, %1200 : vector<7x7xf32>
    %c83_404 = arith.constant 83 : index
    %1202 = memref.load %arg4[%c83_404] : memref<132xf32, #tpu.memory_space<smem>>
    %1203 = vector.broadcast %1202 : f32 to vector<7x7xf32>
    %1204 = arith.mulf %1203, %790 : vector<7x7xf32>
    %1205 = arith.addf %1201, %1204 : vector<7x7xf32>
    %c6_405 = arith.constant 6 : index
    %1206 = memref.load %arg5[%c6_405] : memref<11xf32, #tpu.memory_space<smem>>
    %1207 = vector.broadcast %1206 : f32 to vector<7x7xf32>
    %1208 = arith.addf %1205, %1207 : vector<7x7xf32>
    %cst_406 = arith.constant 1.100000e+00 : f32
    %1209 = vector.broadcast %cst_406 : f32 to vector<7x7xf32>
    %1210 = arith.maximumf %1208, %1209 : vector<7x7xf32>
    %cst_407 = arith.constant -0.899999976 : f32
    %1211 = vector.broadcast %cst_407 : f32 to vector<7x7xf32>
    %1212 = arith.minimumf %1210, %1211 : vector<7x7xf32>
    %cst_408 = arith.constant 0.000000e+00 : f32
    %1213 = vector.broadcast %cst_408 : f32 to vector<7x7xf32>
    %1214 = arith.maximumf %1212, %1213 : vector<7x7xf32>
    %c1_409 = arith.constant 1 : index
    %c6_410 = arith.constant 6 : index
    %c0_411 = arith.constant 0 : index
    %c0_412 = arith.constant 0 : index
    %1215 = vector.load %arg6[%c1_409, %c6_410, %c0_411, %c0_412] : memref<2x11x7x7xf32, #tpu.memory_space<vmem>>, vector<1x1x7x7xf32>
    %1216 = vector.shape_cast %1215 : vector<1x1x7x7xf32> to vector<7x7xf32>
    %1217 = vector.shape_cast %1214 : vector<7x7xf32> to vector<1x1x7x7xf32>
    tpu.vector_store %arg6[%c1_409, %c6_410, %c0_411, %c0_412], %1217 {strides = array<i32>} : memref<2x11x7x7xf32, #tpu.memory_space<vmem>>, vector<1x1x7x7xf32>,
    %cst_413 = arith.constant 0.000000e+00 : f32
    %1218 = vector.broadcast %cst_413 : f32 to vector<7x7xf32>
    %c84_414 = arith.constant 84 : index
    %1219 = memref.load %arg4[%c84_414] : memref<132xf32, #tpu.memory_space<smem>>
    %1220 = vector.broadcast %1219 : f32 to vector<7x7xf32>
    %1221 = arith.mulf %1220, %738 : vector<7x7xf32>
    %1222 = arith.addf %1218, %1221 : vector<7x7xf32>
    %c85_415 = arith.constant 85 : index
    %1223 = memref.load %arg4[%c85_415] : memref<132xf32, #tpu.memory_space<smem>>
    %1224 = vector.broadcast %1223 : f32 to vector<7x7xf32>
    %1225 = arith.mulf %1224, %741 : vector<7x7xf32>
    %1226 = arith.addf %1222, %1225 : vector<7x7xf32>
    %c86_416 = arith.constant 86 : index
    %1227 = memref.load %arg4[%c86_416] : memref<132xf32, #tpu.memory_space<smem>>
    %1228 = vector.broadcast %1227 : f32 to vector<7x7xf32>
    %1229 = arith.mulf %1228, %747 : vector<7x7xf32>
    %1230 = arith.addf %1226, %1229 : vector<7x7xf32>
    %c87_417 = arith.constant 87 : index
    %1231 = memref.load %arg4[%c87_417] : memref<132xf32, #tpu.memory_space<smem>>
    %1232 = vector.broadcast %1231 : f32 to vector<7x7xf32>
    %1233 = arith.mulf %1232, %750 : vector<7x7xf32>
    %1234 = arith.addf %1230, %1233 : vector<7x7xf32>
    %c88_418 = arith.constant 88 : index
    %1235 = memref.load %arg4[%c88_418] : memref<132xf32, #tpu.memory_space<smem>>
    %1236 = vector.broadcast %1235 : f32 to vector<7x7xf32>
    %1237 = arith.mulf %1236, %758 : vector<7x7xf32>
    %1238 = arith.addf %1234, %1237 : vector<7x7xf32>
    %c89_419 = arith.constant 89 : index
    %1239 = memref.load %arg4[%c89_419] : memref<132xf32, #tpu.memory_space<smem>>
    %1240 = vector.broadcast %1239 : f32 to vector<7x7xf32>
    %1241 = arith.mulf %1240, %761 : vector<7x7xf32>
    %1242 = arith.addf %1238, %1241 : vector<7x7xf32>
    %c90_420 = arith.constant 90 : index
    %1243 = memref.load %arg4[%c90_420] : memref<132xf32, #tpu.memory_space<smem>>
    %1244 = vector.broadcast %1243 : f32 to vector<7x7xf32>
    %1245 = arith.mulf %1244, %767 : vector<7x7xf32>
    %1246 = arith.addf %1242, %1245 : vector<7x7xf32>
    %c91_421 = arith.constant 91 : index
    %1247 = memref.load %arg4[%c91_421] : memref<132xf32, #tpu.memory_space<smem>>
    %1248 = vector.broadcast %1247 : f32 to vector<7x7xf32>
    %1249 = arith.mulf %1248, %770 : vector<7x7xf32>
    %1250 = arith.addf %1246, %1249 : vector<7x7xf32>
    %c92_422 = arith.constant 92 : index
    %1251 = memref.load %arg4[%c92_422] : memref<132xf32, #tpu.memory_space<smem>>
    %1252 = vector.broadcast %1251 : f32 to vector<7x7xf32>
    %1253 = arith.mulf %1252, %778 : vector<7x7xf32>
    %1254 = arith.addf %1250, %1253 : vector<7x7xf32>
    %c93_423 = arith.constant 93 : index
    %1255 = memref.load %arg4[%c93_423] : memref<132xf32, #tpu.memory_space<smem>>
    %1256 = vector.broadcast %1255 : f32 to vector<7x7xf32>
    %1257 = arith.mulf %1256, %781 : vector<7x7xf32>
    %1258 = arith.addf %1254, %1257 : vector<7x7xf32>
    %c94_424 = arith.constant 94 : index
    %1259 = memref.load %arg4[%c94_424] : memref<132xf32, #tpu.memory_space<smem>>
    %1260 = vector.broadcast %1259 : f32 to vector<7x7xf32>
    %1261 = arith.mulf %1260, %787 : vector<7x7xf32>
    %1262 = arith.addf %1258, %1261 : vector<7x7xf32>
    %c95_425 = arith.constant 95 : index
    %1263 = memref.load %arg4[%c95_425] : memref<132xf32, #tpu.memory_space<smem>>
    %1264 = vector.broadcast %1263 : f32 to vector<7x7xf32>
    %1265 = arith.mulf %1264, %790 : vector<7x7xf32>
    %1266 = arith.addf %1262, %1265 : vector<7x7xf32>
    %c7_426 = arith.constant 7 : index
    %1267 = memref.load %arg5[%c7_426] : memref<11xf32, #tpu.memory_space<smem>>
    %1268 = vector.broadcast %1267 : f32 to vector<7x7xf32>
    %1269 = arith.addf %1266, %1268 : vector<7x7xf32>
    %cst_427 = arith.constant 1.100000e+00 : f32
    %1270 = vector.broadcast %cst_427 : f32 to vector<7x7xf32>
    %1271 = arith.maximumf %1269, %1270 : vector<7x7xf32>
    %cst_428 = arith.constant -0.899999976 : f32
    %1272 = vector.broadcast %cst_428 : f32 to vector<7x7xf32>
    %1273 = arith.minimumf %1271, %1272 : vector<7x7xf32>
    %cst_429 = arith.constant 0.000000e+00 : f32
    %1274 = vector.broadcast %cst_429 : f32 to vector<7x7xf32>
    %1275 = arith.maximumf %1273, %1274 : vector<7x7xf32>
    %c1_430 = arith.constant 1 : index
    %c7_431 = arith.constant 7 : index
    %c0_432 = arith.constant 0 : index
    %c0_433 = arith.constant 0 : index
    %1276 = vector.load %arg6[%c1_430, %c7_431, %c0_432, %c0_433] : memref<2x11x7x7xf32, #tpu.memory_space<vmem>>, vector<1x1x7x7xf32>
    %1277 = vector.shape_cast %1276 : vector<1x1x7x7xf32> to vector<7x7xf32>
    %1278 = vector.shape_cast %1275 : vector<7x7xf32> to vector<1x1x7x7xf32>
    tpu.vector_store %arg6[%c1_430, %c7_431, %c0_432, %c0_433], %1278 {strides = array<i32>} : memref<2x11x7x7xf32, #tpu.memory_space<vmem>>, vector<1x1x7x7xf32>,
    %cst_434 = arith.constant 0.000000e+00 : f32
    %1279 = vector.broadcast %cst_434 : f32 to vector<7x7xf32>
    %c96_435 = arith.constant 96 : index
    %1280 = memref.load %arg4[%c96_435] : memref<132xf32, #tpu.memory_space<smem>>
    %1281 = vector.broadcast %1280 : f32 to vector<7x7xf32>
    %1282 = arith.mulf %1281, %738 : vector<7x7xf32>
    %1283 = arith.addf %1279, %1282 : vector<7x7xf32>
    %c97_436 = arith.constant 97 : index
    %1284 = memref.load %arg4[%c97_436] : memref<132xf32, #tpu.memory_space<smem>>
    %1285 = vector.broadcast %1284 : f32 to vector<7x7xf32>
    %1286 = arith.mulf %1285, %741 : vector<7x7xf32>
    %1287 = arith.addf %1283, %1286 : vector<7x7xf32>
    %c98_437 = arith.constant 98 : index
    %1288 = memref.load %arg4[%c98_437] : memref<132xf32, #tpu.memory_space<smem>>
    %1289 = vector.broadcast %1288 : f32 to vector<7x7xf32>
    %1290 = arith.mulf %1289, %747 : vector<7x7xf32>
    %1291 = arith.addf %1287, %1290 : vector<7x7xf32>
    %c99_438 = arith.constant 99 : index
    %1292 = memref.load %arg4[%c99_438] : memref<132xf32, #tpu.memory_space<smem>>
    %1293 = vector.broadcast %1292 : f32 to vector<7x7xf32>
    %1294 = arith.mulf %1293, %750 : vector<7x7xf32>
    %1295 = arith.addf %1291, %1294 : vector<7x7xf32>
    %c100_439 = arith.constant 100 : index
    %1296 = memref.load %arg4[%c100_439] : memref<132xf32, #tpu.memory_space<smem>>
    %1297 = vector.broadcast %1296 : f32 to vector<7x7xf32>
    %1298 = arith.mulf %1297, %758 : vector<7x7xf32>
    %1299 = arith.addf %1295, %1298 : vector<7x7xf32>
    %c101_440 = arith.constant 101 : index
    %1300 = memref.load %arg4[%c101_440] : memref<132xf32, #tpu.memory_space<smem>>
    %1301 = vector.broadcast %1300 : f32 to vector<7x7xf32>
    %1302 = arith.mulf %1301, %761 : vector<7x7xf32>
    %1303 = arith.addf %1299, %1302 : vector<7x7xf32>
    %c102_441 = arith.constant 102 : index
    %1304 = memref.load %arg4[%c102_441] : memref<132xf32, #tpu.memory_space<smem>>
    %1305 = vector.broadcast %1304 : f32 to vector<7x7xf32>
    %1306 = arith.mulf %1305, %767 : vector<7x7xf32>
    %1307 = arith.addf %1303, %1306 : vector<7x7xf32>
    %c103_442 = arith.constant 103 : index
    %1308 = memref.load %arg4[%c103_442] : memref<132xf32, #tpu.memory_space<smem>>
    %1309 = vector.broadcast %1308 : f32 to vector<7x7xf32>
    %1310 = arith.mulf %1309, %770 : vector<7x7xf32>
    %1311 = arith.addf %1307, %1310 : vector<7x7xf32>
    %c104_443 = arith.constant 104 : index
    %1312 = memref.load %arg4[%c104_443] : memref<132xf32, #tpu.memory_space<smem>>
    %1313 = vector.broadcast %1312 : f32 to vector<7x7xf32>
    %1314 = arith.mulf %1313, %778 : vector<7x7xf32>
    %1315 = arith.addf %1311, %1314 : vector<7x7xf32>
    %c105_444 = arith.constant 105 : index
    %1316 = memref.load %arg4[%c105_444] : memref<132xf32, #tpu.memory_space<smem>>
    %1317 = vector.broadcast %1316 : f32 to vector<7x7xf32>
    %1318 = arith.mulf %1317, %781 : vector<7x7xf32>
    %1319 = arith.addf %1315, %1318 : vector<7x7xf32>
    %c106_445 = arith.constant 106 : index
    %1320 = memref.load %arg4[%c106_445] : memref<132xf32, #tpu.memory_space<smem>>
    %1321 = vector.broadcast %1320 : f32 to vector<7x7xf32>
    %1322 = arith.mulf %1321, %787 : vector<7x7xf32>
    %1323 = arith.addf %1319, %1322 : vector<7x7xf32>
    %c107_446 = arith.constant 107 : index
    %1324 = memref.load %arg4[%c107_446] : memref<132xf32, #tpu.memory_space<smem>>
    %1325 = vector.broadcast %1324 : f32 to vector<7x7xf32>
    %1326 = arith.mulf %1325, %790 : vector<7x7xf32>
    %1327 = arith.addf %1323, %1326 : vector<7x7xf32>
    %c8_447 = arith.constant 8 : index
    %1328 = memref.load %arg5[%c8_447] : memref<11xf32, #tpu.memory_space<smem>>
    %1329 = vector.broadcast %1328 : f32 to vector<7x7xf32>
    %1330 = arith.addf %1327, %1329 : vector<7x7xf32>
    %cst_448 = arith.constant 1.100000e+00 : f32
    %1331 = vector.broadcast %cst_448 : f32 to vector<7x7xf32>
    %1332 = arith.maximumf %1330, %1331 : vector<7x7xf32>
    %cst_449 = arith.constant -0.899999976 : f32
    %1333 = vector.broadcast %cst_449 : f32 to vector<7x7xf32>
    %1334 = arith.minimumf %1332, %1333 : vector<7x7xf32>
    %cst_450 = arith.constant 0.000000e+00 : f32
    %1335 = vector.broadcast %cst_450 : f32 to vector<7x7xf32>
    %1336 = arith.maximumf %1334, %1335 : vector<7x7xf32>
    %c1_451 = arith.constant 1 : index
    %c8_452 = arith.constant 8 : index
    %c0_453 = arith.constant 0 : index
    %c0_454 = arith.constant 0 : index
    %1337 = vector.load %arg6[%c1_451, %c8_452, %c0_453, %c0_454] : memref<2x11x7x7xf32, #tpu.memory_space<vmem>>, vector<1x1x7x7xf32>
    %1338 = vector.shape_cast %1337 : vector<1x1x7x7xf32> to vector<7x7xf32>
    %1339 = vector.shape_cast %1336 : vector<7x7xf32> to vector<1x1x7x7xf32>
    tpu.vector_store %arg6[%c1_451, %c8_452, %c0_453, %c0_454], %1339 {strides = array<i32>} : memref<2x11x7x7xf32, #tpu.memory_space<vmem>>, vector<1x1x7x7xf32>,
    %cst_455 = arith.constant 0.000000e+00 : f32
    %1340 = vector.broadcast %cst_455 : f32 to vector<7x7xf32>
    %c108_456 = arith.constant 108 : index
    %1341 = memref.load %arg4[%c108_456] : memref<132xf32, #tpu.memory_space<smem>>
    %1342 = vector.broadcast %1341 : f32 to vector<7x7xf32>
    %1343 = arith.mulf %1342, %738 : vector<7x7xf32>
    %1344 = arith.addf %1340, %1343 : vector<7x7xf32>
    %c109_457 = arith.constant 109 : index
    %1345 = memref.load %arg4[%c109_457] : memref<132xf32, #tpu.memory_space<smem>>
    %1346 = vector.broadcast %1345 : f32 to vector<7x7xf32>
    %1347 = arith.mulf %1346, %741 : vector<7x7xf32>
    %1348 = arith.addf %1344, %1347 : vector<7x7xf32>
    %c110_458 = arith.constant 110 : index
    %1349 = memref.load %arg4[%c110_458] : memref<132xf32, #tpu.memory_space<smem>>
    %1350 = vector.broadcast %1349 : f32 to vector<7x7xf32>
    %1351 = arith.mulf %1350, %747 : vector<7x7xf32>
    %1352 = arith.addf %1348, %1351 : vector<7x7xf32>
    %c111_459 = arith.constant 111 : index
    %1353 = memref.load %arg4[%c111_459] : memref<132xf32, #tpu.memory_space<smem>>
    %1354 = vector.broadcast %1353 : f32 to vector<7x7xf32>
    %1355 = arith.mulf %1354, %750 : vector<7x7xf32>
    %1356 = arith.addf %1352, %1355 : vector<7x7xf32>
    %c112_460 = arith.constant 112 : index
    %1357 = memref.load %arg4[%c112_460] : memref<132xf32, #tpu.memory_space<smem>>
    %1358 = vector.broadcast %1357 : f32 to vector<7x7xf32>
    %1359 = arith.mulf %1358, %758 : vector<7x7xf32>
    %1360 = arith.addf %1356, %1359 : vector<7x7xf32>
    %c113_461 = arith.constant 113 : index
    %1361 = memref.load %arg4[%c113_461] : memref<132xf32, #tpu.memory_space<smem>>
    %1362 = vector.broadcast %1361 : f32 to vector<7x7xf32>
    %1363 = arith.mulf %1362, %761 : vector<7x7xf32>
    %1364 = arith.addf %1360, %1363 : vector<7x7xf32>
    %c114_462 = arith.constant 114 : index
    %1365 = memref.load %arg4[%c114_462] : memref<132xf32, #tpu.memory_space<smem>>
    %1366 = vector.broadcast %1365 : f32 to vector<7x7xf32>
    %1367 = arith.mulf %1366, %767 : vector<7x7xf32>
    %1368 = arith.addf %1364, %1367 : vector<7x7xf32>
    %c115_463 = arith.constant 115 : index
    %1369 = memref.load %arg4[%c115_463] : memref<132xf32, #tpu.memory_space<smem>>
    %1370 = vector.broadcast %1369 : f32 to vector<7x7xf32>
    %1371 = arith.mulf %1370, %770 : vector<7x7xf32>
    %1372 = arith.addf %1368, %1371 : vector<7x7xf32>
    %c116_464 = arith.constant 116 : index
    %1373 = memref.load %arg4[%c116_464] : memref<132xf32, #tpu.memory_space<smem>>
    %1374 = vector.broadcast %1373 : f32 to vector<7x7xf32>
    %1375 = arith.mulf %1374, %778 : vector<7x7xf32>
    %1376 = arith.addf %1372, %1375 : vector<7x7xf32>
    %c117_465 = arith.constant 117 : index
    %1377 = memref.load %arg4[%c117_465] : memref<132xf32, #tpu.memory_space<smem>>
    %1378 = vector.broadcast %1377 : f32 to vector<7x7xf32>
    %1379 = arith.mulf %1378, %781 : vector<7x7xf32>
    %1380 = arith.addf %1376, %1379 : vector<7x7xf32>
    %c118_466 = arith.constant 118 : index
    %1381 = memref.load %arg4[%c118_466] : memref<132xf32, #tpu.memory_space<smem>>
    %1382 = vector.broadcast %1381 : f32 to vector<7x7xf32>
    %1383 = arith.mulf %1382, %787 : vector<7x7xf32>
    %1384 = arith.addf %1380, %1383 : vector<7x7xf32>
    %c119_467 = arith.constant 119 : index
    %1385 = memref.load %arg4[%c119_467] : memref<132xf32, #tpu.memory_space<smem>>
    %1386 = vector.broadcast %1385 : f32 to vector<7x7xf32>
    %1387 = arith.mulf %1386, %790 : vector<7x7xf32>
    %1388 = arith.addf %1384, %1387 : vector<7x7xf32>
    %c9_468 = arith.constant 9 : index
    %1389 = memref.load %arg5[%c9_468] : memref<11xf32, #tpu.memory_space<smem>>
    %1390 = vector.broadcast %1389 : f32 to vector<7x7xf32>
    %1391 = arith.addf %1388, %1390 : vector<7x7xf32>
    %cst_469 = arith.constant 1.100000e+00 : f32
    %1392 = vector.broadcast %cst_469 : f32 to vector<7x7xf32>
    %1393 = arith.maximumf %1391, %1392 : vector<7x7xf32>
    %cst_470 = arith.constant -0.899999976 : f32
    %1394 = vector.broadcast %cst_470 : f32 to vector<7x7xf32>
    %1395 = arith.minimumf %1393, %1394 : vector<7x7xf32>
    %cst_471 = arith.constant 0.000000e+00 : f32
    %1396 = vector.broadcast %cst_471 : f32 to vector<7x7xf32>
    %1397 = arith.maximumf %1395, %1396 : vector<7x7xf32>
    %c1_472 = arith.constant 1 : index
    %c9_473 = arith.constant 9 : index
    %c0_474 = arith.constant 0 : index
    %c0_475 = arith.constant 0 : index
    %1398 = vector.load %arg6[%c1_472, %c9_473, %c0_474, %c0_475] : memref<2x11x7x7xf32, #tpu.memory_space<vmem>>, vector<1x1x7x7xf32>
    %1399 = vector.shape_cast %1398 : vector<1x1x7x7xf32> to vector<7x7xf32>
    %1400 = vector.shape_cast %1397 : vector<7x7xf32> to vector<1x1x7x7xf32>
    tpu.vector_store %arg6[%c1_472, %c9_473, %c0_474, %c0_475], %1400 {strides = array<i32>} : memref<2x11x7x7xf32, #tpu.memory_space<vmem>>, vector<1x1x7x7xf32>,
    %cst_476 = arith.constant 0.000000e+00 : f32
    %1401 = vector.broadcast %cst_476 : f32 to vector<7x7xf32>
    %c120_477 = arith.constant 120 : index
    %1402 = memref.load %arg4[%c120_477] : memref<132xf32, #tpu.memory_space<smem>>
    %1403 = vector.broadcast %1402 : f32 to vector<7x7xf32>
    %1404 = arith.mulf %1403, %738 : vector<7x7xf32>
    %1405 = arith.addf %1401, %1404 : vector<7x7xf32>
    %c121_478 = arith.constant 121 : index
    %1406 = memref.load %arg4[%c121_478] : memref<132xf32, #tpu.memory_space<smem>>
    %1407 = vector.broadcast %1406 : f32 to vector<7x7xf32>
    %1408 = arith.mulf %1407, %741 : vector<7x7xf32>
    %1409 = arith.addf %1405, %1408 : vector<7x7xf32>
    %c122_479 = arith.constant 122 : index
    %1410 = memref.load %arg4[%c122_479] : memref<132xf32, #tpu.memory_space<smem>>
    %1411 = vector.broadcast %1410 : f32 to vector<7x7xf32>
    %1412 = arith.mulf %1411, %747 : vector<7x7xf32>
    %1413 = arith.addf %1409, %1412 : vector<7x7xf32>
    %c123_480 = arith.constant 123 : index
    %1414 = memref.load %arg4[%c123_480] : memref<132xf32, #tpu.memory_space<smem>>
    %1415 = vector.broadcast %1414 : f32 to vector<7x7xf32>
    %1416 = arith.mulf %1415, %750 : vector<7x7xf32>
    %1417 = arith.addf %1413, %1416 : vector<7x7xf32>
    %c124_481 = arith.constant 124 : index
    %1418 = memref.load %arg4[%c124_481] : memref<132xf32, #tpu.memory_space<smem>>
    %1419 = vector.broadcast %1418 : f32 to vector<7x7xf32>
    %1420 = arith.mulf %1419, %758 : vector<7x7xf32>
    %1421 = arith.addf %1417, %1420 : vector<7x7xf32>
    %c125_482 = arith.constant 125 : index
    %1422 = memref.load %arg4[%c125_482] : memref<132xf32, #tpu.memory_space<smem>>
    %1423 = vector.broadcast %1422 : f32 to vector<7x7xf32>
    %1424 = arith.mulf %1423, %761 : vector<7x7xf32>
    %1425 = arith.addf %1421, %1424 : vector<7x7xf32>
    %c126_483 = arith.constant 126 : index
    %1426 = memref.load %arg4[%c126_483] : memref<132xf32, #tpu.memory_space<smem>>
    %1427 = vector.broadcast %1426 : f32 to vector<7x7xf32>
    %1428 = arith.mulf %1427, %767 : vector<7x7xf32>
    %1429 = arith.addf %1425, %1428 : vector<7x7xf32>
    %c127_484 = arith.constant 127 : index
    %1430 = memref.load %arg4[%c127_484] : memref<132xf32, #tpu.memory_space<smem>>
    %1431 = vector.broadcast %1430 : f32 to vector<7x7xf32>
    %1432 = arith.mulf %1431, %770 : vector<7x7xf32>
    %1433 = arith.addf %1429, %1432 : vector<7x7xf32>
    %c128_485 = arith.constant 128 : index
    %1434 = memref.load %arg4[%c128_485] : memref<132xf32, #tpu.memory_space<smem>>
    %1435 = vector.broadcast %1434 : f32 to vector<7x7xf32>
    %1436 = arith.mulf %1435, %778 : vector<7x7xf32>
    %1437 = arith.addf %1433, %1436 : vector<7x7xf32>
    %c129_486 = arith.constant 129 : index
    %1438 = memref.load %arg4[%c129_486] : memref<132xf32, #tpu.memory_space<smem>>
    %1439 = vector.broadcast %1438 : f32 to vector<7x7xf32>
    %1440 = arith.mulf %1439, %781 : vector<7x7xf32>
    %1441 = arith.addf %1437, %1440 : vector<7x7xf32>
    %c130_487 = arith.constant 130 : index
    %1442 = memref.load %arg4[%c130_487] : memref<132xf32, #tpu.memory_space<smem>>
    %1443 = vector.broadcast %1442 : f32 to vector<7x7xf32>
    %1444 = arith.mulf %1443, %787 : vector<7x7xf32>
    %1445 = arith.addf %1441, %1444 : vector<7x7xf32>
    %c131_488 = arith.constant 131 : index
    %1446 = memref.load %arg4[%c131_488] : memref<132xf32, #tpu.memory_space<smem>>
    %1447 = vector.broadcast %1446 : f32 to vector<7x7xf32>
    %1448 = arith.mulf %1447, %790 : vector<7x7xf32>
    %1449 = arith.addf %1445, %1448 : vector<7x7xf32>
    %c10_489 = arith.constant 10 : index
    %1450 = memref.load %arg5[%c10_489] : memref<11xf32, #tpu.memory_space<smem>>
    %1451 = vector.broadcast %1450 : f32 to vector<7x7xf32>
    %1452 = arith.addf %1449, %1451 : vector<7x7xf32>
    %cst_490 = arith.constant 1.100000e+00 : f32
    %1453 = vector.broadcast %cst_490 : f32 to vector<7x7xf32>
    %1454 = arith.maximumf %1452, %1453 : vector<7x7xf32>
    %cst_491 = arith.constant -0.899999976 : f32
    %1455 = vector.broadcast %cst_491 : f32 to vector<7x7xf32>
    %1456 = arith.minimumf %1454, %1455 : vector<7x7xf32>
    %cst_492 = arith.constant 0.000000e+00 : f32
    %1457 = vector.broadcast %cst_492 : f32 to vector<7x7xf32>
    %1458 = arith.maximumf %1456, %1457 : vector<7x7xf32>
    %c1_493 = arith.constant 1 : index
    %c10_494 = arith.constant 10 : index
    %c0_495 = arith.constant 0 : index
    %c0_496 = arith.constant 0 : index
    %1459 = vector.load %arg6[%c1_493, %c10_494, %c0_495, %c0_496] : memref<2x11x7x7xf32, #tpu.memory_space<vmem>>, vector<1x1x7x7xf32>
    %1460 = vector.shape_cast %1459 : vector<1x1x7x7xf32> to vector<7x7xf32>
    %1461 = vector.shape_cast %1458 : vector<7x7xf32> to vector<1x1x7x7xf32>
    tpu.vector_store %arg6[%c1_493, %c10_494, %c0_495, %c0_496], %1461 {strides = array<i32>} : memref<2x11x7x7xf32, #tpu.memory_space<vmem>>, vector<1x1x7x7xf32>,
    return
  }
  func.func @transform_0(%arg0: i32) -> (i32, i32, i32, i32) {
    %c0_i32 = arith.constant 0 : i32
    %c0_i32_0 = arith.constant 0 : i32
    %c0_i32_1 = arith.constant 0 : i32
    %c0_i32_2 = arith.constant 0 : i32
    %c0_i32_3 = arith.constant 0 : i32
    return %c0_i32, %c0_i32_0, %c0_i32_1, %c0_i32_2 : i32, i32, i32, i32
  }
  func.func @transform_1(%arg0: i32) -> (i32, i32, i32) {
    %c0_i32 = arith.constant 0 : i32
    %c0_i32_0 = arith.constant 0 : i32
    %c0_i32_1 = arith.constant 0 : i32
    %c0_i32_2 = arith.constant 0 : i32
    return %c0_i32, %c0_i32_0, %c0_i32_1 : i32, i32, i32
  }
  func.func @transform_2(%arg0: i32) -> (i32, i32, i32) {
    %c0_i32 = arith.constant 0 : i32
    %c0_i32_0 = arith.constant 0 : i32
    %c0_i32_1 = arith.constant 0 : i32
    %c0_i32_2 = arith.constant 0 : i32
    return %c0_i32, %c0_i32_0, %c0_i32_1 : i32, i32, i32
  }
  func.func @transform_3(%arg0: i32) -> i32 {
    %c0_i32 = arith.constant 0 : i32
    %c0_i32_0 = arith.constant 0 : i32
    return %c0_i32 : i32
  }
  func.func @transform_4(%arg0: i32) -> i32 {
    %c0_i32 = arith.constant 0 : i32
    %c0_i32_0 = arith.constant 0 : i32
    return %c0_i32 : i32
  }
  func.func @transform_5(%arg0: i32) -> (i32, i32, i32, i32) {
    %c0_i32 = arith.constant 0 : i32
    %c0_i32_0 = arith.constant 0 : i32
    %c0_i32_1 = arith.constant 0 : i32
    %c0_i32_2 = arith.constant 0 : i32
    %c0_i32_3 = arith.constant 0 : i32
    return %c0_i32, %c0_i32_0, %c0_i32_1, %c0_i32_2 : i32, i32, i32, i32
  }
}

</mosaic_0001>

<bundles_post_ra>
// kernel: conv2d_clamp_relu.1
= control target key start
LH: loop header
LB: loop body
LE: loop exit
PB: predicated region body
PF: predicated region fallthrough
CT: control target
= control target key end

     0   :  { %s6592_s0 = inlined_call_operand.vmem [shape: f32[2,3,10,10], index: 0, kind: input, shape index: {}]   ;;  %s6593_s1 = inlined_call_operand.vmem [shape: f32[2,7,10], index: 1, kind: input, shape index: {}]   ;;  %s6594_s2 = inlined_call_operand.vmem [shape: f32[2,10,7], index: 2, kind: input, shape index: {}]   ;;  %s6595_s3 = inlined_call_operand.vmem [shape: f32[132], index: 3, kind: input, shape index: {}]   ;;  %s6596_s4 = inlined_call_operand.vmem [shape: f32[11], index: 4, kind: input, shape index: {}]   ;;  %s6597_s5 = inlined_call_operand.vmem [shape: f32[2,11,7,7], index: 5, kind: output, shape index: {}]  }
   0x1   :  { %6604 = sst [smem:[#allocation8_spill]] %s6592_s0 }
   0x2   :  { %6605 = sst [smem:[#allocation9_spill]] %s6593_s1 }
   0x3   :  { %6606 = sst [smem:[#allocation10_spill]] %s6597_s5 }
   0x4   :  { %10 = vsyncpa [#allocation3], 0  ;;  %s24_s20 = sshll.u32 %s6595_s3, 4  ;;  %s25_s20 = int_to_ptr.vmem [resolvable:$true] %s24_s20 }
   0x5   :  { %11 = vsyncpa [#allocation5], 0  ;;  %s34_s23 = sshll.u32 %s6596_s4, 4  ;;  %s4816_s24 = scalar_lea.vmem %s25_s20, 32  ;;  %s35_s23 = int_to_ptr.vmem [resolvable:$true] %s34_s23 }
   0x6   :  { %p4817_p0 = scmp.ne.s32.totalorder %s25_s20, %s4816_s24  ;;  %p4821_p1 = scmp.lt.s32.totalorder %s25_s20, %s25_s20 }
   0x7   :  { %p4822_p2 = scmp.lt.s32.totalorder %s4816_s24, %s4816_s24 }
   0x9   :  { %p4823_p3 = por %p4822_p2, %p4821_p1 }
   0xb   :  { %p4824_p4 = pnand %p4823_p3, %p4817_p0 }
   0xd   :  { %4827 = shalt.err (!%p4824_p4)
}
   0xe   :  { %s4844_s25 = smov [#allocation2]   ;;  %s4828_s26 = scalar_lea.vmem %s35_s23, 16 }
   0xf   :  { %27 = dma.vmem_to_smem %s25_s20, 32, %s4844_s25, [#allocation3]  }
  0x10   :  { %p4829_p5 = scmp.ne.s32.totalorder %s35_s23, %s4828_s26  ;;  %p4833_p6 = scmp.lt.s32.totalorder %s35_s23, %s35_s23 }
  0x11   :  { %p4834_p7 = scmp.lt.s32.totalorder %s4828_s26, %s4828_s26 }
  0x13   :  { %p4835_p8 = por %p4834_p7, %p4833_p6 }
  0x15   :  { %p4836_p9 = pnand %p4835_p8, %p4829_p5 }
  0x17   :  { %4839 = shalt.err (!%p4836_p9)
}
  0x18   :  { %s4845_s3 = smov [#allocation4]  }
  0x19   :  { %37 = dma.vmem_to_smem %s35_s23, 16, %s4845_s3, [#allocation5]  }
  0x1a   :  { %4840 = dma.done.wait [#allocation3], 32  }
  0x1b   :  { %4841 = vsyncadd [#allocation3], 4294967264 }
  0x1c   :  { %4842 = dma.done.wait [#allocation5], 16  }
  0x1d   :  { %4843 = vsyncadd [#allocation5], 4294967280 }
  0x1e   :  { %44 = sfence }
  0x1f   :  { %v45_v0 = vld [vmem:[%s6592_s0] sm:$0xff]  ;;  %v46_v1 = vld [vmem:[%s6592_s0 + $0x8] sm:$0x3]  ;;  %vm52_vm0 = vcmask 1041408   ;;  %v4846_v2 = vmov 0.0|0.0   ;;  %vm4847_vm1 = vmmov 1  }
  0x20   :  { %4665 = vmatprep.subr.bf16.mxu0 %v4846_v2  ;;  %v4666_v3 = vpack.c.bf16 %v46_v1, %v45_v0  ;;  %vm4893_vm2 = vmpackc.low %vm52_vm0, %vm4847_vm1  ;;  %4669 = vmatprep.subr.bf16.mxu1 %v4846_v2  ;;  %v126_v5 = vld [vmem:[%s6594_s2] sm:$0xff]  ;;  %vm4848_vm3 = vmmov 0   ;;  %v4849_v6 = vmov 0.0   ;;  %v127_v7 = vld [vmem:[%s6594_s2 + $0x8] sm:$0x3]  ;;  %vm48_vm4 = vcmask 80896  }
  0x21   :  { %4417 = vmatprep.mubr.msk.f32.mxu0 %vm4848_vm3, %v4849_v6  ;;  %v3918_v8 = vld [vmem:[%s6594_s2 + $0x10] sm:$0xff]  ;;  %v3919_v9 = vld [vmem:[%s6594_s2 + $0x18] sm:$0x3]  ;;  %4424 = vmatprep.mubr.msk.f32.mxu1 %vm4848_vm3, %v4849_v6  ;;  %v4919_v10 = vld [vmem:[%s6593_s1] sm:$0x7f]  ;;  %v4921_v11 = vpack.c.bf16 %v127_v7, %v126_v5  ;;  %s4964_s17 = sld [smem:[#allocation2]] }
  0x22   :  { %4668 = vmatpush3.bf16.msk.msra.mxu0 %vm4893_vm2, %v4666_v3  ;;  %v4923_v12 = vpack.c.bf16 %v3919_v9, %v3918_v8  ;;  %v4947_v15 = vld [vmem:[%s6593_s1 + $0x8] sm:$0x7f]  ;;  %s4966_s18 = sld [smem:[#allocation2 + $0xc]]  ;;  %s4968_s19 = sld [smem:[#allocation2 + $0x18]]  ;;  %v3929_v27 = vld [vmem:[%s6592_s0 + $0x10] sm:$0xff]  ;;  %vm1416_vm5 = vcmask 55296  }
  0x23   :  { %4673 = vmatprep.subr.bf16.mxu0 %v4846_v2  ;;  %4672 = vmatpush3.bf16.msk.msra.mxu1 %vm4893_vm2, %v4921_v11  ;;  %s4970_s20 = sld [smem:[#allocation2 + $0x24]]  ;;  %s4972_s21 = sld [smem:[#allocation2 + $0x30]]  ;;  %v3930_v28 = vld [vmem:[%s6592_s0 + $0x18] sm:$0x3] }
  0x24   :  { %4677 = vmatprep.subr.bf16.mxu1 %v4846_v2  ;;  %s4974_s22 = sld [smem:[#allocation2 + $0x3c]]  ;;  %s4976_s23 = sld [smem:[#allocation2 + $0x48]]  ;;  %v5036_v42 = vpack.c.bf16 %v3930_v28, %v3929_v27 }
  0x25   :  { %4418 = vmatmul.mubr.msk.f32.vlgmr.msra.gmra.mrb[0].mxu0 %vm48_vm4, %v4919_v10  ;;  %s4978_s24 = sld [smem:[#allocation2 + $0x54]]  ;;  %s4980_s25 = sld [smem:[#allocation2 + $0x60]] }
  0x26   :  { %4676 = vmatpush3.bf16.msk.msra.mxu0 %vm4893_vm2, %v4923_v12  ;;  %4431 = vmatprep.mubr.msk.f32.mxu0 %vm4848_vm3, %v4849_v6  ;;  %s4982_s26 = sld [smem:[#allocation2 + $0x6c]]  ;;  %s4984_s3 = sld [smem:[#allocation2 + $0x78]] }
  0x27   :  { %4681 = vmatprep.subr.bf16.mxu0 %v4846_v2  ;;  %s4986_s4 = sld [smem:[#allocation2 + $0x1]]  ;;  %s4988_s27 = sld [smem:[#allocation2 + $0xd]]  ;;  %v1363_v16 = vstv %s4964_s17 }
  0x28   :  { %s4990_s28 = sld [smem:[#allocation2 + $0x19]]  ;;  %s4992_s29 = sld [smem:[#allocation2 + $0x25]]  ;;  %v1419_v17 = vstv %s4966_s18  ;;  %v1475_v18 = vstv %s4968_s19 }
  0x29   :  { %s4994_s30 = sld [smem:[#allocation2 + $0x31]]  ;;  %s4996_s6 = sld [smem:[#allocation2 + $0x3d]]  ;;  %v1531_v19 = vstv %s4970_s20  ;;  %v1587_v20 = vstv %s4972_s21 }
  0x2a   :  { %s4998_s7 = sld [smem:[#allocation2 + $0x49]]  ;;  %s5000_s8 = sld [smem:[#allocation2 + $0x55]]  ;;  %v1643_v21 = vstv %s4974_s22  ;;  %v1699_v22 = vstv %s4976_s23 }
  0x2b   :  { %s5002_s9 = sld [smem:[#allocation2 + $0x61]]  ;;  %s5004_s10 = sld [smem:[#allocation2 + $0x6d]]  ;;  %v1755_v23 = vstv %s4978_s24  ;;  %v1811_v24 = vstv %s4980_s25 }
  0x2c   :  { %s5006_s11 = sld [smem:[#allocation2 + $0x79]]  ;;  %v1867_v25 = vstv %s4982_s26  ;;  %v1923_v26 = vstv %s4984_s3  ;;  %s5082_s16 = sld [smem:[#allocation2 + $0x2]] }
  0x2d   :  { %v1367_v29 = vstv %s4986_s4  ;;  %v1423_v30 = vstv %s4988_s27  ;;  %s5084_s17 = sld [smem:[#allocation2 + $0xe]]  ;;  %s5086_s18 = sld [smem:[#allocation2 + $0x1a]] }
  0x2e   :  { %v1479_v31 = vstv %s4990_s28  ;;  %v1535_v32 = vstv %s4992_s29  ;;  %s5088_s19 = sld [smem:[#allocation2 + $0x26]]  ;;  %s5090_s20 = sld [smem:[#allocation2 + $0x32]] }
  0x2f   :  { %v1591_v33 = vstv %s4994_s30  ;;  %v1647_v34 = vstv %s4996_s6  ;;  %s5092_s21 = sld [smem:[#allocation2 + $0x3e]]  ;;  %s5094_s22 = sld [smem:[#allocation2 + $0x4a]] }
  0x30   :  { %v1703_v35 = vstv %s4998_s7  ;;  %v1759_v36 = vstv %s5000_s8  ;;  %s5096_s23 = sld [smem:[#allocation2 + $0x56]]  ;;  %s5098_s24 = sld [smem:[#allocation2 + $0x62]] }
  0x31   :  { %v1815_v39 = vstv %s5002_s9  ;;  %v1871_v40 = vstv %s5004_s10  ;;  %s5100_s25 = sld [smem:[#allocation2 + $0x6e]]  ;;  %s5102_s26 = sld [smem:[#allocation2 + $0x7a]] }
  0x32   :  { %v1927_v41 = vstv %s5006_s11  ;;  %s5104_s3 = sld [smem:[#allocation2 + $0x3]]  ;;  %s5106_s4 = sld [smem:[#allocation2 + $0xf]] }
  0x33   :  { %s5108_s27 = sld [smem:[#allocation2 + $0x1b]]  ;;  %s5110_s28 = sld [smem:[#allocation2 + $0x27]] }
  0x34   :  { %s5112_s29 = sld [smem:[#allocation2 + $0x33]]  ;;  %s5114_s30 = sld [smem:[#allocation2 + $0x3f]]  ;;  %v1595_v27 = vstv %s5090_s20 }
  0x35   :  { %s5116_s6 = sld [smem:[#allocation2 + $0x4b]]  ;;  %s5118_s7 = sld [smem:[#allocation2 + $0x57]]  ;;  %v1651_v28 = vstv %s5092_s21 }
  0x36   :  { %s5120_s8 = sld [smem:[#allocation2 + $0x63]]  ;;  %s5122_s9 = sld [smem:[#allocation2 + $0x6f]] }
  0x37   :  { %s5124_s10 = sld [smem:[#allocation2 + $0x7b]]  ;;  %s5203_s11 = sld [smem:[#allocation2 + $0x4]] }
  0x38   :  { %s5205_s12 = sld [smem:[#allocation2 + $0x10]]  ;;  %s5207_s13 = sld [smem:[#allocation2 + $0x1c]] }
  0x39   :  { %s5209_s14 = sld [smem:[#allocation2 + $0x28]]  ;;  %s5211_s15 = sld [smem:[#allocation2 + $0x34]] }
  0x3a   :  { %s5221_s20 = sld [smem:[#allocation2 + $0x70]]  ;;  %s5223_s21 = sld [smem:[#allocation2 + $0x7c]] }
  0x3b   :  { %s5661_s5 = sld [smem:[#allocation2 + $0x77]] }
  0xf8   :  { %v122_v13 = vpop.f32.mrb[0].mxu0 }
  0xf9   :  { %v4419_v14 = vpop.f32.mrb[1].mxu0  ;;  %4425 = vmatmul.mubr.msk.f32.vlgmr.msra.gmra.mrb[0].mxu1 %vm48_vm4, %v122_v13  ;;  %4432 = vmatmul.mubr.msk.f32.vlgmr.msra.gmra.mrb[2].mxu0 %vm48_vm4, %v122_v13 }
  0xfa   :  { %4680 = vmatpush3.bf16.msk.msra.mxu1 %vm4893_vm2, %v4666_v3  ;;  %4438 = vmatprep.mubr.msk.f32.mxu1 %vm4848_vm3, %v4849_v6 }
  0xfb   :  { %4684 = vmatpush3.bf16.msk.msra.mxu0 %vm4893_vm2, %v4921_v11  ;;  %4685 = vmatprep.subr.bf16.mxu1 %v4846_v2 }
  0xfc   :  { %4445 = vmatprep.mubr.msk.f32.mxu0 %vm4848_vm3, %v4849_v6  ;;  %4689 = vmatprep.subr.bf16.mxu0 %v4846_v2 }
  0xfd   :  { %4439 = vmatmul.mubr.msk.f32.vlgmr.msra.gmra.mrb[2].mxu1 %vm48_vm4, %v4947_v15 }
  0xfe   :  { %4688 = vmatpush3.bf16.msk.msra.mxu1 %vm4893_vm2, %v4923_v12  ;;  %4452 = vmatprep.mubr.msk.f32.mxu1 %vm4848_vm3, %v4849_v6 }
  0xff   :  { %4693 = vmatprep.subr.bf16.mxu1 %v4846_v2 }
 0x1cc   :  { %v200_v37 = vpop.f32.mrb[0].mxu1  ;;  %v276_v38 = vpop.f32.mrb[2].mxu0 }
 0x1cd   :  { %v1364_v43 = vmul.f32 %v1363_v16, %v200_v37  ;;  %v1420_v44 = vmul.f32 %v1419_v17, %v200_v37  ;;  %v1476_v45 = vmul.f32 %v1475_v18, %v200_v37  ;;  %v1532_v46 = vmul.f32 %v1531_v19, %v200_v37  ;;  %v4426_v47 = vpop.f32.mrb[1].mxu1  ;;  %v4433_v48 = vpop.f32.mrb[3].mxu0 }
 0x1ce   :  { %v1588_v49 = vmul.f32 %v1587_v20, %v200_v37  ;;  %v1644_v50 = vmul.f32 %v1643_v21, %v200_v37  ;;  %v1700_v51 = vmul.f32 %v1699_v22, %v200_v37  ;;  %v1756_v52 = vmul.f32 %v1755_v23, %v200_v37 }
 0x1cf   :  { %v1812_v53 = vmul.f32 %v1811_v24, %v200_v37  ;;  %v1868_v54 = vmul.f32 %v1867_v25, %v200_v37  ;;  %v1924_v55 = vmul.f32 %v1923_v26, %v200_v37  ;;  %v1368_v56 = vmul.f32 %v1367_v29, %v276_v38 }
 0x1d0   :  { %v1424_v57 = vmul.f32 %v1423_v30, %v276_v38  ;;  %v1480_v58 = vmul.f32 %v1479_v31, %v276_v38  ;;  %v1536_v59 = vmul.f32 %v1535_v32, %v276_v38  ;;  %v1592_v60 = vmul.f32 %v1591_v33, %v276_v38  ;;  %v351_v61 = vpop.f32.mrb[2].mxu1 }
 0x1d1   :  { %v5038_v62 = vadd.f32 %v1368_v56, %v1364_v43  ;;  %v1648_v63 = vmul.f32 %v1647_v34, %v276_v38  ;;  %v1704_v0 = vmul.f32 %v1703_v35, %v276_v38  ;;  %v1760_v1 = vmul.f32 %v1759_v36, %v276_v38  ;;  %v4440_v3 = vpop.f32.mrb[3].mxu1  ;;  %4446 = vmatmul.mubr.msk.f32.vlgmr.msra.gmra.mrb[4].mxu0 %vm48_vm4, %v351_v61 }
 0x1d2   :  { %v5041_v5 = vadd.f32 %v1424_v57, %v1420_v44  ;;  %v5043_v7 = vadd.f32 %v1480_v58, %v1476_v45  ;;  %v5045_v8 = vadd.f32 %v1536_v59, %v1532_v46  ;;  %v5047_v9 = vadd.f32 %v1592_v60, %v1588_v49  ;;  %4453 = vmatmul.mubr.msk.f32.vlgmr.msra.gmra.mrb[4].mxu1 %vm48_vm4, %v351_v61 }
 0x1d3   :  { %v5050_v13 = vadd.f32 %v1648_v63, %v1644_v50  ;;  %v5052_v14 = vadd.f32 %v1704_v0, %v1700_v51  ;;  %v5054_v16 = vadd.f32 %v1760_v1, %v1756_v52  ;;  %v1816_v17 = vmul.f32 %v1815_v39, %v276_v38  ;;  %4692 = vmatpush3.bf16.msk.msra.mxu0 %vm4893_vm2, %v5036_v42 }
 0x1d4   :  { %v1872_v18 = vmul.f32 %v1871_v40, %v276_v38  ;;  %v1928_v19 = vmul.f32 %v1927_v41, %v276_v38  ;;  %4459 = vmatprep.mubr.msk.f32.mxu0 %vm4848_vm3, %v4849_v6  ;;  %4696 = vmatpush3.bf16.msk.msra.mxu1 %vm4893_vm2, %v4921_v11  ;;  %v1371_v23 = vstv %s5082_s16  ;;  %v1427_v24 = vstv %s5084_s17  ;;  %s5213_s16 = sld [smem:[#allocation2 + $0x40]]  ;;  %s5215_s17 = sld [smem:[#allocation2 + $0x4c]] }
 0x1d5   :  { %v5064_v20 = vadd.f32 %v1816_v17, %v1812_v53  ;;  %4697 = vmatprep.subr.bf16.mxu0 %v4846_v2  ;;  %4466 = vmatprep.mubr.msk.f32.mxu1 %vm4848_vm3, %v4849_v6  ;;  %v1483_v25 = vstv %s5086_s18  ;;  %v1539_v26 = vstv %s5088_s19  ;;  %v1707_v29 = vstv %s5094_s22  ;;  %s5217_s18 = sld [smem:[#allocation2 + $0x58]]  ;;  %s5219_s19 = sld [smem:[#allocation2 + $0x64]] }
 0x1d6   :  { %v5069_v21 = vadd.f32 %v1872_v18, %v1868_v54  ;;  %v5071_v22 = vadd.f32 %v1928_v19, %v1924_v55  ;;  %4460 = vmatmul.mubr.msk.f32.vlgmr.msra.gmra.mrb[6].mxu0 %vm48_vm4, %v4919_v10  ;;  %4701 = vmatprep.subr.bf16.mxu1 %v4846_v2  ;;  %v1763_v30 = vstv %s5096_s23  ;;  %v1819_v31 = vstv %s5098_s24  ;;  %s5225_s22 = sld [smem:[#allocation2 + $0x5]]  ;;  %s5227_s23 = sld [smem:[#allocation2 + $0x11]] }
 0x1d7   :  { %4700 = vmatpush3.bf16.msk.msra.mxu0 %vm4893_vm2, %v4923_v12  ;;  %4473 = vmatprep.mubr.msk.f32.mxu0 %vm4848_vm3, %v4849_v6  ;;  %v1875_v32 = vstv %s5100_s25  ;;  %v1931_v33 = vstv %s5102_s26  ;;  %v1375_v34 = vstv %s5104_s3  ;;  %v1431_v35 = vstv %s5106_s4  ;;  %s5229_s24 = sld [smem:[#allocation2 + $0x1d]]  ;;  %s5231_s25 = sld [smem:[#allocation2 + $0x29]] }
 0x1d8   :  { %4705 = vmatprep.subr.bf16.mxu0 %v4846_v2  ;;  %v1487_v36 = vstv %s5108_s27  ;;  %v1543_v37 = vstv %s5110_s28  ;;  %v1599_v38 = vstv %s5112_s29  ;;  %v1655_v39 = vstv %s5114_s30  ;;  %s5233_s26 = sld [smem:[#allocation2 + $0x35]]  ;;  %s5235_s3 = sld [smem:[#allocation2 + $0x41]] }
 0x1d9   :  { %v1711_v40 = vstv %s5116_s6  ;;  %v1767_v43 = vstv %s5118_s7  ;;  %v1823_v44 = vstv %s5120_s8  ;;  %v1879_v45 = vstv %s5122_s9  ;;  %s5237_s4 = sld [smem:[#allocation2 + $0x4d]]  ;;  %s5239_s27 = sld [smem:[#allocation2 + $0x59]] }
 0x1da   :  { %v1935_v46 = vstv %s5124_s10  ;;  %s5241_s28 = sld [smem:[#allocation2 + $0x65]]  ;;  %s5243_s29 = sld [smem:[#allocation2 + $0x71]] }
 0x1db   :  { %s5245_s30 = sld [smem:[#allocation2 + $0x7d]]  ;;  %s5332_s10 = sld [smem:[#allocation2 + $0x6]] }
 0x1dc   :  { %s5455_s6 = sld [smem:[#allocation2 + $0x14]]  ;;  %s5457_s7 = sld [smem:[#allocation2 + $0x20]] }
 0x1dd   :  { %s5459_s8 = sld [smem:[#allocation2 + $0x2c]]  ;;  %s5461_s9 = sld [smem:[#allocation2 + $0x38]] }
 0x2a4   :  { %v424_v41 = vpop.f32.mrb[4].mxu0 }
 0x2a5   :  { %v1372_v47 = vmul.f32 %v1371_v23, %v424_v41  ;;  %v1428_v48 = vmul.f32 %v1427_v24, %v424_v41  ;;  %v1484_v49 = vmul.f32 %v1483_v25, %v424_v41  ;;  %v1540_v50 = vmul.f32 %v1539_v26, %v424_v41  ;;  %v494_v51 = vpop.f32.mrb[4].mxu1  ;;  %v4447_v52 = vpop.f32.mrb[5].mxu0 }
 0x2a6   :  { %v1596_v53 = vmul.f32 %v1595_v27, %v424_v41  ;;  %v1652_v54 = vmul.f32 %v1651_v28, %v424_v41  ;;  %v1708_v55 = vmul.f32 %v1707_v29, %v424_v41  ;;  %v1764_v56 = vmul.f32 %v1763_v30, %v424_v41  ;;  %v4454_v57 = vpop.f32.mrb[5].mxu1 }
 0x2a7   :  { %v1373_v58 = vadd.f32 %v1372_v47, %v5038_v62  ;;  %v1429_v59 = vadd.f32 %v1428_v48, %v5041_v5  ;;  %v1485_v60 = vadd.f32 %v1484_v49, %v5043_v7  ;;  %v1541_v61 = vadd.f32 %v1540_v50, %v5045_v8 }
 0x2a8   :  { %v1597_v63 = vadd.f32 %v1596_v53, %v5047_v9  ;;  %v1653_v0 = vadd.f32 %v1652_v54, %v5050_v13  ;;  %v1709_v1 = vadd.f32 %v1708_v55, %v5052_v14  ;;  %v1765_v3 = vadd.f32 %v1764_v56, %v5054_v16 }
 0x2a9   :  { %v1820_v17 = vmul.f32 %v1819_v31, %v424_v41  ;;  %v1876_v18 = vmul.f32 %v1875_v32, %v424_v41  ;;  %v1932_v19 = vmul.f32 %v1931_v33, %v424_v41  ;;  %v1376_v23 = vmul.f32 %v1375_v34, %v494_v51  ;;  %v570_v24 = vpop.f32.mrb[6].mxu0  ;;  %v3943_v41 = vld [vmem:[%s6592_s0 + $0x20] sm:$0xff] }
 0x2aa   :  { %v1432_v62 = vmul.f32 %v1431_v35, %v494_v51  ;;  %v1488_v25 = vmul.f32 %v1487_v36, %v494_v51  ;;  %v1544_v5 = vmul.f32 %v1543_v37, %v494_v51  ;;  %v1600_v26 = vmul.f32 %v1599_v38, %v494_v51  ;;  %v4461_v7 = vpop.f32.mrb[7].mxu0  ;;  %4467 = vmatmul.mubr.msk.f32.vlgmr.msra.gmra.mrb[6].mxu1 %vm48_vm4, %v570_v24 }
 0x2ab   :  { %v1821_v8 = vadd.f32 %v1820_v17, %v5064_v20  ;;  %v1877_v9 = vadd.f32 %v1876_v18, %v5069_v21  ;;  %v1933_v13 = vadd.f32 %v1932_v19, %v5071_v22  ;;  %v5160_v14 = vadd.f32 %v1376_v23, %v1373_v58  ;;  %4474 = vmatmul.mubr.msk.f32.vlgmr.msra.gmra.mrb[8].mxu0 %vm48_vm4, %v570_v24 }
 0x2ac   :  { %v5163_v16 = vadd.f32 %v1432_v62, %v1429_v59  ;;  %v5165_v27 = vadd.f32 %v1488_v25, %v1485_v60  ;;  %v5167_v28 = vadd.f32 %v1544_v5, %v1541_v61  ;;  %v5169_v29 = vadd.f32 %v1600_v26, %v1597_v63  ;;  %4704 = vmatpush3.bf16.msk.msra.mxu1 %vm4893_vm2, %v5036_v42 }
 0x2ad   :  { %v1656_v20 = vmul.f32 %v1655_v39, %v494_v51  ;;  %v1712_v21 = vmul.f32 %v1711_v40, %v494_v51  ;;  %v1768_v30 = vmul.f32 %v1767_v43, %v494_v51  ;;  %v1824_v22 = vmul.f32 %v1823_v44, %v494_v51  ;;  %4480 = vmatprep.mubr.msk.f32.mxu1 %vm4848_vm3, %v4849_v6  ;;  %v3944_v43 = vld [vmem:[%s6592_s0 + $0x28] sm:$0x3] }
 0x2ae   :  { %v1880_v31 = vmul.f32 %v1879_v45, %v494_v51  ;;  %v1936_v32 = vmul.f32 %v1935_v46, %v494_v51  ;;  %4708 = vmatpush3.bf16.msk.msra.mxu0 %vm4893_vm2, %v4921_v11  ;;  %4709 = vmatprep.subr.bf16.mxu1 %v4846_v2  ;;  %v1379_v38 = vstv %s5203_s11  ;;  %v1435_v39 = vstv %s5205_s12  ;;  %s5334_s11 = sld [smem:[#allocation2 + $0x12]]  ;;  %s5336_s12 = sld [smem:[#allocation2 + $0x1e]] }
 0x2af   :  { %v5180_v33 = vadd.f32 %v1656_v20, %v1653_v0  ;;  %v5182_v34 = vadd.f32 %v1712_v21, %v1709_v1  ;;  %v5184_v42 = vadd.f32 %v1768_v30, %v1765_v3  ;;  %v5186_v35 = vadd.f32 %v1824_v22, %v1821_v8  ;;  %4481 = vmatmul.mubr.msk.f32.vlgmr.msra.gmra.mrb[8].mxu1 %vm48_vm4, %v4947_v15 }
 0x2b0   :  { %v5190_v36 = vadd.f32 %v1880_v31, %v1877_v9  ;;  %v5192_v37 = vadd.f32 %v1936_v32, %v1933_v13  ;;  %4712 = vmatpush3.bf16.msk.msra.mxu1 %vm4893_vm2, %v4923_v12  ;;  %4487 = vmatprep.mubr.msk.f32.mxu0 %vm4848_vm3, %v4849_v6  ;;  %v1491_v40 = vstv %s5207_s13  ;;  %v1547_v44 = vstv %s5209_s14  ;;  %s5338_s13 = sld [smem:[#allocation2 + $0x2a]]  ;;  %s5340_s14 = sld [smem:[#allocation2 + $0x36]] }
 0x2b1   :  { %4494 = vmatprep.mubr.msk.f32.mxu1 %vm4848_vm3, %v4849_v6  ;;  %4713 = vmatprep.subr.bf16.mxu0 %v4846_v2  ;;  %v1603_v45 = vstv %s5211_s15  ;;  %v1659_v46 = vstv %s5213_s16  ;;  %v1715_v47 = vstv %s5215_s17  ;;  %v1771_v48 = vstv %s5217_s18  ;;  %s5342_s15 = sld [smem:[#allocation2 + $0x42]]  ;;  %s5344_s16 = sld [smem:[#allocation2 + $0x4e]] }
 0x2b2   :  { %4717 = vmatprep.subr.bf16.mxu1 %v4846_v2  ;;  %v1827_v49 = vstv %s5219_s19  ;;  %v1883_v50 = vstv %s5221_s20  ;;  %v1939_v51 = vstv %s5223_s21  ;;  %v1383_v52 = vstv %s5225_s22  ;;  %s5346_s17 = sld [smem:[#allocation2 + $0x5a]]  ;;  %s5348_s18 = sld [smem:[#allocation2 + $0x66]] }
 0x2b3   :  { %v1439_v53 = vstv %s5227_s23  ;;  %v1495_v54 = vstv %s5229_s24  ;;  %v5267_v55 = vpack.c.bf16 %v3944_v43, %v3943_v41  ;;  %v1551_v56 = vstv %s5231_s25  ;;  %s5350_s19 = sld [smem:[#allocation2 + $0x72]]  ;;  %s5352_s20 = sld [smem:[#allocation2 + $0x7e]] }
 0x2b4   :  { %v1607_v57 = vstv %s5233_s26  ;;  %v1663_v58 = vstv %s5235_s3  ;;  %v1719_v59 = vstv %s5237_s4  ;;  %v1775_v61 = vstv %s5239_s27  ;;  %s5354_s21 = sld [smem:[#allocation2 + $0x7]]  ;;  %s5356_s22 = sld [smem:[#allocation2 + $0x13]] }
 0x2b5   :  { %v1831_v63 = vstv %s5241_s28  ;;  %v1887_v0 = vstv %s5243_s29  ;;  %v1943_v1 = vstv %s5245_s30  ;;  %s5358_s23 = sld [smem:[#allocation2 + $0x1f]]  ;;  %s5360_s24 = sld [smem:[#allocation2 + $0x2b]] }
 0x2b6   :  { %s5362_s25 = sld [smem:[#allocation2 + $0x37]]  ;;  %s5364_s26 = sld [smem:[#allocation2 + $0x43]] }
 0x2b7   :  { %s5366_s3 = sld [smem:[#allocation2 + $0x4f]]  ;;  %s5368_s4 = sld [smem:[#allocation2 + $0x5b]] }
 0x2b8   :  { %s5370_s27 = sld [smem:[#allocation2 + $0x67]]  ;;  %s5372_s28 = sld [smem:[#allocation2 + $0x73]] }
 0x2b9   :  { %s5374_s29 = sld [smem:[#allocation2 + $0x7f]]  ;;  %s5453_s30 = sld [smem:[#allocation2 + $0x8]] }
 0x37d   :  { %v643_v60 = vpop.f32.mrb[6].mxu1 }
 0x37e   :  { %v1380_v3 = vmul.f32 %v1379_v38, %v643_v60  ;;  %v1436_v17 = vmul.f32 %v1435_v39, %v643_v60  ;;  %v1492_v18 = vmul.f32 %v1491_v40, %v643_v60  ;;  %v1548_v19 = vmul.f32 %v1547_v44, %v643_v60  ;;  %v713_v23 = vpop.f32.mrb[8].mxu0  ;;  %v4468_v24 = vpop.f32.mrb[7].mxu1 }
 0x37f   :  { %v1604_v62 = vmul.f32 %v1603_v45, %v643_v60  ;;  %v1660_v25 = vmul.f32 %v1659_v46, %v643_v60  ;;  %v1716_v5 = vmul.f32 %v1715_v47, %v643_v60  ;;  %v1772_v26 = vmul.f32 %v1771_v48, %v643_v60  ;;  %v4475_v7 = vpop.f32.mrb[9].mxu0 }
 0x380   :  { %v1381_v8 = vadd.f32 %v1380_v3, %v5160_v14  ;;  %v1437_v9 = vadd.f32 %v1436_v17, %v5163_v16  ;;  %v1493_v13 = vadd.f32 %v1492_v18, %v5165_v27  ;;  %v1549_v20 = vadd.f32 %v1548_v19, %v5167_v28 }
 0x381   :  { %v1605_v21 = vadd.f32 %v1604_v62, %v5169_v29  ;;  %v1661_v30 = vadd.f32 %v1660_v25, %v5180_v33  ;;  %v1717_v22 = vadd.f32 %v1716_v5, %v5182_v34  ;;  %v1773_v31 = vadd.f32 %v1772_v26, %v5184_v42 }
 0x382   :  { %v1828_v32 = vmul.f32 %v1827_v49, %v643_v60  ;;  %v1884_v38 = vmul.f32 %v1883_v50, %v643_v60  ;;  %v1940_v39 = vmul.f32 %v1939_v51, %v643_v60  ;;  %v1384_v40 = vmul.f32 %v1383_v52, %v713_v23  ;;  %v783_v41 = vpop.f32.mrb[8].mxu1 }
 0x383   :  { %v1440_v14 = vmul.f32 %v1439_v53, %v713_v23  ;;  %v1496_v43 = vmul.f32 %v1495_v54, %v713_v23  ;;  %v1552_v16 = vmul.f32 %v1551_v56, %v713_v23  ;;  %v1608_v44 = vmul.f32 %v1607_v57, %v713_v23  ;;  %v4482_v27 = vpop.f32.mrb[9].mxu1  ;;  %4488 = vmatmul.mubr.msk.f32.vlgmr.msra.gmra.mrb[10].mxu0 %vm48_vm4, %v783_v41 }
 0x384   :  { %v1829_v28 = vadd.f32 %v1828_v32, %v5186_v35  ;;  %v1885_v29 = vadd.f32 %v1884_v38, %v5190_v36  ;;  %v1941_v33 = vadd.f32 %v1940_v39, %v5192_v37  ;;  %v5289_v34 = vadd.f32 %v1384_v40, %v1381_v8  ;;  %4495 = vmatmul.mubr.msk.f32.vlgmr.msra.gmra.mrb[10].mxu1 %vm48_vm4, %v783_v41 }
 0x385   :  { %v5292_v42 = vadd.f32 %v1440_v14, %v1437_v9  ;;  %v5294_v45 = vadd.f32 %v1496_v43, %v1493_v13  ;;  %v5296_v46 = vadd.f32 %v1552_v16, %v1549_v20  ;;  %v5298_v47 = vadd.f32 %v1608_v44, %v1605_v21  ;;  %4716 = vmatpush3.bf16.msk.msra.mxu0 %vm4893_vm2, %v5267_v55 }
 0x386   :  { %v1664_v35 = vmul.f32 %v1663_v58, %v713_v23  ;;  %v1720_v36 = vmul.f32 %v1719_v59, %v713_v23  ;;  %v1776_v48 = vmul.f32 %v1775_v61, %v713_v23  ;;  %v1832_v37 = vmul.f32 %v1831_v63, %v713_v23  ;;  %4501 = vmatprep.mubr.msk.f32.mxu0 %vm4848_vm3, %v4849_v6 }
 0x387   :  { %v1888_v49 = vmul.f32 %v1887_v0, %v713_v23  ;;  %v1944_v50 = vmul.f32 %v1943_v1, %v713_v23  ;;  %4720 = vmatpush3.bf16.msk.msra.mxu1 %vm4893_vm2, %v4921_v11  ;;  %4721 = vmatprep.subr.bf16.mxu0 %v4846_v2  ;;  %v1443_v58 = vstv %s5334_s11  ;;  %v1499_v59 = vstv %s5336_s12  ;;  %s5465_s11 = sld [smem:[#allocation2 + $0x50]]  ;;  %s5467_s12 = sld [smem:[#allocation2 + $0x5c]] }
 0x388   :  { %v5309_v51 = vadd.f32 %v1664_v35, %v1661_v30  ;;  %v5311_v52 = vadd.f32 %v1720_v36, %v1717_v22  ;;  %v5313_v53 = vadd.f32 %v1776_v48, %v1773_v31  ;;  %v5315_v54 = vadd.f32 %v1832_v37, %v1829_v28  ;;  %4502 = vmatmul.mubr.msk.f32.vlgmr.msra.gmra.mrb[12].mxu0 %vm48_vm4, %v4919_v10 }
 0x389   :  { %v5319_v56 = vadd.f32 %v1888_v49, %v1885_v29  ;;  %v5321_v57 = vadd.f32 %v1944_v50, %v1941_v33  ;;  %4724 = vmatpush3.bf16.msk.msra.mxu0 %vm4893_vm2, %v4923_v12  ;;  %4508 = vmatprep.mubr.msk.f32.mxu1 %vm4848_vm3, %v4849_v6  ;;  %v1387_v10 = vstv %s5332_s10  ;;  %v1555_v60 = vstv %s5338_s13  ;;  %s5463_s10 = sld [smem:[#allocation2 + $0x44]]  ;;  %s5469_s13 = sld [smem:[#allocation2 + $0x68]] }
 0x38a   :  { %4515 = vmatprep.mubr.msk.f32.mxu0 %vm4848_vm3, %v4849_v6  ;;  %4725 = vmatprep.subr.bf16.mxu1 %v4846_v2  ;;  %v1611_v61 = vstv %s5340_s14  ;;  %v1667_v63 = vstv %s5342_s15  ;;  %v1723_v0 = vstv %s5344_s16  ;;  %v1779_v1 = vstv %s5346_s17  ;;  %s5471_s14 = sld [smem:[#allocation2 + $0x74]]  ;;  %s5473_s15 = sld [smem:[#allocation2 + $0x80]] }
 0x38b   :  { %4729 = vmatprep.subr.bf16.mxu0 %v4846_v2  ;;  %v1835_v3 = vstv %s5348_s18  ;;  %v1891_v17 = vstv %s5350_s19  ;;  %v1947_v18 = vstv %s5352_s20  ;;  %v1391_v19 = vstv %s5354_s21  ;;  %s5475_s16 = sld [smem:[#allocation2 + $0x9]]  ;;  %s5477_s17 = sld [smem:[#allocation2 + $0x15]] }
 0x38c   :  { %v1447_v23 = vstv %s5356_s22  ;;  %v1503_v24 = vstv %s5358_s23  ;;  %v1559_v62 = vstv %s5360_s24  ;;  %v1615_v25 = vstv %s5362_s25  ;;  %s5479_s18 = sld [smem:[#allocation2 + $0x21]]  ;;  %s5481_s19 = sld [smem:[#allocation2 + $0x2d]] }
 0x38d   :  { %v1671_v5 = vstv %s5364_s26  ;;  %v1727_v26 = vstv %s5366_s3  ;;  %v1783_v8 = vstv %s5368_s4  ;;  %v1839_v9 = vstv %s5370_s27  ;;  %s5483_s20 = sld [smem:[#allocation2 + $0x39]]  ;;  %s5485_s21 = sld [smem:[#allocation2 + $0x45]] }
 0x38e   :  { %v1895_v13 = vstv %s5372_s28  ;;  %v1951_v20 = vstv %s5374_s29  ;;  %s5487_s22 = sld [smem:[#allocation2 + $0x51]]  ;;  %s5489_s23 = sld [smem:[#allocation2 + $0x5d]] }
 0x38f   :  { %s5491_s24 = sld [smem:[#allocation2 + $0x69]]  ;;  %s5493_s25 = sld [smem:[#allocation2 + $0x75]] }
 0x390   :  { %s5495_s26 = sld [smem:[#allocation2 + $0x81]]  ;;  %s5633_s4 = sld [smem:[#allocation2 + $0x23]] }
 0x391   :  { %s5631_s3 = sld [smem:[#allocation4 + $0x1]]  ;;  %s5635_s27 = sld [smem:[#allocation4 + $0x2]] }
 0x392   :  { %s5637_s28 = sld [smem:[#allocation2 + $0x2f]]  ;;  %s5639_s29 = sld [smem:[#allocation4 + $0x3]] }
 0x456   :  { %v856_v7 = vpop.f32.mrb[10].mxu0 }
 0x457   :  { %v1388_v21 = vmul.f32 %v1387_v10, %v856_v7  ;;  %v1444_v30 = vmul.f32 %v1443_v58, %v856_v7  ;;  %v1500_v22 = vmul.f32 %v1499_v59, %v856_v7  ;;  %v1556_v31 = vmul.f32 %v1555_v60, %v856_v7  ;;  %v926_v32 = vpop.f32.mrb[10].mxu1  ;;  %v4489_v38 = vpop.f32.mrb[11].mxu0 }
 0x458   :  { %v1612_v39 = vmul.f32 %v1611_v61, %v856_v7  ;;  %v1668_v40 = vmul.f32 %v1667_v63, %v856_v7  ;;  %v1724_v41 = vmul.f32 %v1723_v0, %v856_v7  ;;  %v1780_v14 = vmul.f32 %v1779_v1, %v856_v7  ;;  %v4496_v43 = vpop.f32.mrb[11].mxu1 }
 0x459   :  { %v1389_v16 = vadd.f32 %v1388_v21, %v5289_v34  ;;  %v1445_v44 = vadd.f32 %v1444_v30, %v5292_v42  ;;  %v1501_v27 = vadd.f32 %v1500_v22, %v5294_v45  ;;  %v1557_v28 = vadd.f32 %v1556_v31, %v5296_v46 }
 0x45a   :  { %v1613_v29 = vadd.f32 %v1612_v39, %v5298_v47  ;;  %v1669_v33 = vadd.f32 %v1668_v40, %v5309_v51  ;;  %v1725_v35 = vadd.f32 %v1724_v41, %v5311_v52  ;;  %v1781_v36 = vadd.f32 %v1780_v14, %v5313_v53 }
 0x45b   :  { %v1836_v48 = vmul.f32 %v1835_v3, %v856_v7  ;;  %v1892_v37 = vmul.f32 %v1891_v17, %v856_v7  ;;  %v1948_v49 = vmul.f32 %v1947_v18, %v856_v7  ;;  %v1392_v50 = vmul.f32 %v1391_v19, %v926_v32  ;;  %v1002_v10 = vpop.f32.mrb[12].mxu0 }
 0x45c   :  { %v1448_v34 = vmul.f32 %v1447_v23, %v926_v32  ;;  %v1504_v58 = vmul.f32 %v1503_v24, %v926_v32  ;;  %v1560_v42 = vmul.f32 %v1559_v62, %v926_v32  ;;  %v1616_v59 = vmul.f32 %v1615_v25, %v926_v32  ;;  %v4503_v45 = vpop.f32.mrb[13].mxu0  ;;  %4509 = vmatmul.mubr.msk.f32.vlgmr.msra.gmra.mrb[12].mxu1 %vm48_vm4, %v1002_v10  ;;  %v4108_v62 = vld [vmem:[%s6592_s0 + $0x30] sm:$0xff]  ;;  %v4109_v25 = vld [vmem:[%s6592_s0 + $0x38] sm:$0x3]  ;;  %s5659_s0 = sld [smem:[#allocation4 + $0x8]] }
 0x45d   :  { %v1837_v46 = vadd.f32 %v1836_v48, %v5315_v54  ;;  %v1893_v47 = vadd.f32 %v1892_v37, %v5319_v56  ;;  %v1949_v51 = vadd.f32 %v1948_v49, %v5321_v57  ;;  %v5410_v52 = vadd.f32 %v1392_v50, %v1389_v16  ;;  %4516 = vmatmul.mubr.msk.f32.vlgmr.msra.gmra.mrb[14].mxu0 %vm48_vm4, %v1002_v10 }
 0x45e   :  { %v5413_v53 = vadd.f32 %v1448_v34, %v1445_v44  ;;  %v5415_v60 = vadd.f32 %v1504_v58, %v1501_v27  ;;  %v5417_v61 = vadd.f32 %v1560_v42, %v1557_v28  ;;  %v5419_v63 = vadd.f32 %v1616_v59, %v1613_v29  ;;  %4728 = vmatpush3.bf16.msk.msra.mxu1 %vm4893_vm2, %v5267_v55 }
 0x45f   :  { %v1672_v54 = vmul.f32 %v1671_v5, %v926_v32  ;;  %v1728_v56 = vmul.f32 %v1727_v26, %v926_v32  ;;  %v1784_v0 = vmul.f32 %v1783_v8, %v926_v32  ;;  %v1840_v57 = vmul.f32 %v1839_v9, %v926_v32  ;;  %4522 = vmatprep.mubr.msk.f32.mxu1 %vm4848_vm3, %v4849_v6 }
 0x460   :  { %v1896_v1 = vmul.f32 %v1895_v13, %v926_v32  ;;  %v1952_v3 = vmul.f32 %v1951_v20, %v926_v32  ;;  %4732 = vmatpush3.bf16.msk.msra.mxu0 %vm4893_vm2, %v4921_v11  ;;  %4733 = vmatprep.subr.bf16.mxu1 %v4846_v2  ;;  %v1395_v11 = vstv %s5453_s30  ;;  %v1563_v5 = vstv %s5459_s8  ;;  %s5641_s30 = sld [smem:[#allocation2 + $0x3b]]  ;;  %s5647_s8 = sld [smem:[#allocation4 + $0x5]] }
 0x461   :  { %v5430_v17 = vadd.f32 %v1672_v54, %v1669_v33  ;;  %v5432_v18 = vadd.f32 %v1728_v56, %v1725_v35  ;;  %v5434_v55 = vadd.f32 %v1784_v0, %v1781_v36  ;;  %v5436_v19 = vadd.f32 %v1840_v57, %v1837_v46  ;;  %4523 = vmatmul.mubr.msk.f32.vlgmr.msra.gmra.mrb[14].mxu1 %vm48_vm4, %v4947_v15 }
 0x462   :  { %v5440_v23 = vadd.f32 %v1896_v1, %v1893_v47  ;;  %v5442_v24 = vadd.f32 %v1952_v3, %v1949_v51  ;;  %4736 = vmatpush3.bf16.msk.msra.mxu1 %vm4893_vm2, %v4923_v12  ;;  %4529 = vmatprep.mubr.msk.f32.mxu0 %vm4848_vm3, %v4849_v6  ;;  %v1451_v12 = vstv %s5455_s6  ;;  %v1507_v15 = vstv %s5457_s7  ;;  %s5643_s6 = sld [smem:[#allocation4 + $0x4]]  ;;  %s5645_s7 = sld [smem:[#allocation2 + $0x47]] }
 0x463   :  { %4536 = vmatprep.mubr.msk.f32.mxu1 %vm4848_vm3, %v4849_v6  ;;  %4737 = vmatprep.subr.bf16.mxu0 %v4846_v2  ;;  %v1619_v26 = vstv %s5461_s9  ;;  %v1675_v7 = vstv %s5463_s10  ;;  %v1731_v8 = vstv %s5465_s11  ;;  %v1787_v9 = vstv %s5467_s12  ;;  %s5649_s9 = sld [smem:[#allocation2 + $0x53]]  ;;  %s5651_s10 = sld [smem:[#allocation4 + $0x6]] }
 0x464   :  { %4741 = vmatprep.subr.bf16.mxu1 %v4846_v2  ;;  %v1843_v13 = vstv %s5469_s13  ;;  %v1899_v20 = vstv %s5471_s14  ;;  %v1955_v21 = vstv %s5473_s15  ;;  %v1399_v30 = vstv %s5475_s16  ;;  %s5603_s14 = sld [smem:[#allocation2 + $0xa]]  ;;  %s5605_s15 = sld [smem:[#allocation2 + $0x16]] }
 0x465   :  { %v1455_v22 = vstv %s5477_s17  ;;  %v1511_v31 = vstv %s5479_s18  ;;  %v5517_v32 = vpack.c.bf16 %v4109_v25, %v4108_v62  ;;  %v1567_v38 = vstv %s5481_s19  ;;  %s5607_s16 = sld [smem:[#allocation2 + $0x22]]  ;;  %s5613_s18 = sld [smem:[#allocation2 + $0x46]] }
 0x466   :  { %v1623_v39 = vstv %s5483_s20  ;;  %v1679_v40 = vstv %s5485_s21  ;;  %v1735_v41 = vstv %s5487_s22  ;;  %v1791_v43 = vstv %s5489_s23  ;;  %s5611_s17 = sld [smem:[#allocation2 + $0x3a]]  ;;  %s5617_s20 = sld [smem:[#allocation2 + $0x5e]] }
 0x467   :  { %v1847_v16 = vstv %s5491_s24  ;;  %v1903_v44 = vstv %s5493_s25  ;;  %v1959_v27 = vstv %s5495_s26  ;;  %s5615_s19 = sld [smem:[#allocation2 + $0x52]]  ;;  %s5621_s22 = sld [smem:[#allocation2 + $0x76]] }
 0x468   :  { %s5619_s21 = sld [smem:[#allocation2 + $0x6a]]  ;;  %s5625_s24 = sld [smem:[#allocation2 + $0xb]] }
 0x469   :  { %s5623_s23 = sld [smem:[#allocation2 + $0x82]]  ;;  %s5627_s25 = sld [smem:[#allocation4]] }
 0x46a   :  { %s5629_s26 = sld [smem:[#allocation2 + $0x17]]  ;;  %s5657_s13 = sld [smem:[#allocation2 + $0x6b]] }
 0x46b   :  { %s5653_s11 = sld [smem:[#allocation2 + $0x5f]] }
 0x46c   :  { %s5655_s12 = sld [smem:[#allocation4 + $0x7]] }
 0x52f   :  { %v1075_v14 = vpop.f32.mrb[12].mxu1 }
 0x530   :  { %v1396_v28 = vmul.f32 %v1395_v11, %v1075_v14  ;;  %v1452_v29 = vmul.f32 %v1451_v12, %v1075_v14  ;;  %v1508_v33 = vmul.f32 %v1507_v15, %v1075_v14  ;;  %v1564_v35 = vmul.f32 %v1563_v5, %v1075_v14  ;;  %v1145_v36 = vpop.f32.mrb[14].mxu0  ;;  %v4510_v48 = vpop.f32.mrb[13].mxu1 }
 0x531   :  { %v1620_v37 = vmul.f32 %v1619_v26, %v1075_v14  ;;  %v1676_v49 = vmul.f32 %v1675_v7, %v1075_v14  ;;  %v1732_v50 = vmul.f32 %v1731_v8, %v1075_v14  ;;  %v1788_v10 = vmul.f32 %v1787_v9, %v1075_v14  ;;  %v4517_v34 = vpop.f32.mrb[15].mxu0 }
 0x532   :  { %v1397_v58 = vadd.f32 %v1396_v28, %v5410_v52  ;;  %v1453_v42 = vadd.f32 %v1452_v29, %v5413_v53  ;;  %v1509_v59 = vadd.f32 %v1508_v33, %v5415_v60  ;;  %v1565_v45 = vadd.f32 %v1564_v35, %v5417_v61 }
 0x533   :  { %v1621_v46 = vadd.f32 %v1620_v37, %v5419_v63  ;;  %v1677_v47 = vadd.f32 %v1676_v49, %v5430_v17  ;;  %v1733_v51 = vadd.f32 %v1732_v50, %v5432_v18  ;;  %v1789_v54 = vadd.f32 %v1788_v10, %v5434_v55 }
 0x534   :  { %v1844_v56 = vmul.f32 %v1843_v13, %v1075_v14  ;;  %v1900_v0 = vmul.f32 %v1899_v20, %v1075_v14  ;;  %v1956_v57 = vmul.f32 %v1955_v21, %v1075_v14  ;;  %v1400_v1 = vmul.f32 %v1399_v30, %v1145_v36  ;;  %v1215_v3 = vpop.f32.mrb[14].mxu1 }
 0x535   :  { %v1456_v52 = vmul.f32 %v1455_v22, %v1145_v36  ;;  %v1512_v11 = vmul.f32 %v1511_v31, %v1145_v36  ;;  %v1568_v53 = vmul.f32 %v1567_v38, %v1145_v36  ;;  %v1624_v12 = vmul.f32 %v1623_v39, %v1145_v36  ;;  %v4524_v60 = vpop.f32.mrb[15].mxu1  ;;  %4530 = vmatmul.mubr.msk.f32.vlgmr.msra.gmra.mrb[16].mxu0 %vm48_vm4, %v1215_v3  ;;  %v2058_v31 = vld [vmem:[%s6594_s2] sm:$0xff]  ;;  %v4114_v38 = vld [vmem:[%s6594_s2 + $0x10] sm:$0xff]  ;;  %v2059_v39 = vld [vmem:[%s6594_s2 + $0x8] sm:$0x3] }
 0x536   :  { %v1845_v61 = vadd.f32 %v1844_v56, %v5436_v19  ;;  %v1901_v63 = vadd.f32 %v1900_v0, %v5440_v23  ;;  %v1957_v17 = vadd.f32 %v1956_v57, %v5442_v24  ;;  %v5539_v18 = vadd.f32 %v1400_v1, %v1397_v58  ;;  %4537 = vmatmul.mubr.msk.f32.vlgmr.msra.gmra.mrb[16].mxu1 %vm48_vm4, %v1215_v3  ;;  %v5556_v19 = vld [vmem:[%s6593_s1] sm:$0x7f]  ;;  %s5663_s1 = sld [smem:[#allocation2 + $0x83]] }
 0x537   :  { %v5542_v55 = vadd.f32 %v1456_v52, %v1453_v42  ;;  %v5544_v15 = vadd.f32 %v1512_v11, %v1509_v59  ;;  %v5546_v62 = vadd.f32 %v1568_v53, %v1565_v45  ;;  %v5548_v25 = vadd.f32 %v1624_v12, %v1621_v46  ;;  %4740 = vmatpush3.bf16.msk.msra.mxu0 %vm4893_vm2, %v5517_v32 }
 0x538   :  { %v1680_v23 = vmul.f32 %v1679_v40, %v1145_v36  ;;  %v1736_v24 = vmul.f32 %v1735_v41, %v1145_v36  ;;  %v1792_v5 = vmul.f32 %v1791_v43, %v1145_v36  ;;  %v1848_v26 = vmul.f32 %v1847_v16, %v1145_v36  ;;  %4543 = vmatprep.mubr.msk.f32.mxu0 %vm4848_vm3, %v4849_v6  ;;  %v4115_v41 = vld [vmem:[%s6594_s2 + $0x18] sm:$0x3]  ;;  %s5609_s2 = sld [smem:[#allocation2 + $0x2e]] }
 0x539   :  { %v1904_v7 = vmul.f32 %v1903_v44, %v1145_v36  ;;  %v1960_v8 = vmul.f32 %v1959_v27, %v1145_v36  ;;  %4745 = vmatprep.subr.bf16.mxu0 %v4846_v2  ;;  %4550 = vmatprep.mubr.msk.f32.mxu1 %vm4848_vm3, %v4849_v6  ;;  %v5588_v40 = vpack.c.bf16 %v2059_v39, %v2058_v31  ;;  %v1403_v43 = vstv %s5603_s14  ;;  %s5829_s14 = sld [smem:[#allocation2 + $0x24]] }
 0x53a   :  { %v5563_v9 = vadd.f32 %v1680_v23, %v1677_v47  ;;  %v5565_v13 = vadd.f32 %v1736_v24, %v1733_v51  ;;  %v5567_v20 = vadd.f32 %v1792_v5, %v1789_v54  ;;  %v5569_v21 = vadd.f32 %v1848_v26, %v1845_v61  ;;  %4544 = vmatmul.mubr.msk.f32.vlgmr.msra.gmra.mrb[18].mxu0 %vm48_vm4, %v5556_v19 }
 0x53b   :  { %v5573_v30 = vadd.f32 %v1904_v7, %v1901_v63  ;;  %v5575_v22 = vadd.f32 %v1960_v8, %v1957_v17  ;;  %4557 = vmatprep.mubr.msk.f32.mxu0 %vm4848_vm3, %v4849_v6  ;;  %v5593_v14 = vpack.c.bf16 %v4115_v41, %v4114_v38  ;;  %4744 = vmatpush3.bf16.msk.msra.mxu1 %vm4893_vm2, %v5588_v40  ;;  %v1459_v16 = vstv %s5605_s15  ;;  %s5831_s15 = sld [smem:[#allocation2 + $0x30]] }
 0x53c   :  { %4749 = vmatprep.subr.bf16.mxu1 %v4846_v2  ;;  %v1515_v44 = vstv %s5607_s16  ;;  %v1627_v28 = vstv %s5611_s17  ;;  %v1683_v29 = vstv %s5613_s18  ;;  %v1739_v33 = vstv %s5615_s19  ;;  %s6609_s16 = sld [smem:[#allocation9_spill]]  ;;  %s5744_s17 = sld [smem:[#allocation4 + $0xa]] }
 0x53d   :  { %4748 = vmatpush3.bf16.msk.msra.mxu0 %vm4893_vm2, %v5593_v14  ;;  %v1795_v35 = vstv %s5617_s20  ;;  %v1851_v36 = vstv %s5619_s21  ;;  %v1907_v48 = vstv %s5621_s22  ;;  %v1963_v37 = vstv %s5623_s23  ;;  %s6610_s20 = sld [smem:[#allocation10_spill]]  ;;  %s5837_s18 = sld [smem:[#allocation2 + $0x54]] }
 0x53e   :  { %4753 = vmatprep.subr.bf16.mxu0 %v4846_v2  ;;  %v1571_v27 = vstv %s5609_s2  ;;  %v1407_v49 = vstv %s5625_s24  ;;  %v1411_v50 = vstv %s5627_s25  ;;  %v1463_v10 = vstv %s5629_s26  ;;  %s5739_s2 = sld [smem:[#allocation4 + $0x9]]  ;;  %s5839_s19 = sld [smem:[#allocation2 + $0x60]] }
 0x53f   :  { %v1467_v34 = vstv %s5631_s3  ;;  %v1519_v58 = vstv %s5633_s4  ;;  %v1523_v42 = vstv %s5635_s27  ;;  %v1575_v59 = vstv %s5637_s28  ;;  %s5841_s21 = sld [smem:[#allocation2 + $0x6c]]  ;;  %s5843_s22 = sld [smem:[#allocation2 + $0x78]] }
 0x540   :  { %v1579_v45 = vstv %s5639_s29  ;;  %v1631_v46 = vstv %s5641_s30  ;;  %v1635_v47 = vstv %s5643_s6  ;;  %v1687_v51 = vstv %s5645_s7  ;;  %s5845_s23 = sld [smem:[#allocation2 + $0x1]]  ;;  %s5847_s24 = sld [smem:[#allocation2 + $0xd]] }
 0x541   :  { %v1691_v54 = vstv %s5647_s8  ;;  %v1743_v56 = vstv %s5649_s9  ;;  %v1747_v0 = vstv %s5651_s10  ;;  %v1799_v57 = vstv %s5653_s11  ;;  %s5823_s11 = sld [smem:[#allocation2]]  ;;  %s5849_s25 = sld [smem:[#allocation2 + $0x19]] }
 0x542   :  { %v1803_v1 = vstv %s5655_s12  ;;  %v1855_v52 = vstv %s5657_s13  ;;  %v1859_v11 = vstv %s5659_s0  ;;  %v1911_v53 = vstv %s5661_s5  ;;  %s5825_s12 = sld [smem:[#allocation2 + $0xc]]  ;;  %s5827_s13 = sld [smem:[#allocation2 + $0x18]] }
 0x543   :  { %s5851_s26 = sld [smem:[#allocation2 + $0x25]]  ;;  %s5853_s0 = sld [smem:[#allocation2 + $0x31]] }
 0x544   :  { %s5855_s3 = sld [smem:[#allocation2 + $0x3d]]  ;;  %s5857_s5 = sld [smem:[#allocation2 + $0x49]] }
 0x545   :  { %s5859_s4 = sld [smem:[#allocation2 + $0x55]]  ;;  %s5865_s28 = sld [smem:[#allocation2 + $0x79]] }
 0x546   :  { %s5863_s27 = sld [smem:[#allocation2 + $0x6d]]  ;;  %s5941_s9 = sld [smem:[#allocation2 + $0x2]] }
 0x547   :  { %s6612_s6 = sld [smem:[#allocation8_spill]]  ;;  %s5943_s10 = sld [smem:[#allocation2 + $0xe]] }
 0x548   :  { %s6066_s29 = sld [smem:[#allocation2 + $0x1c]]  ;;  %s6068_s30 = sld [smem:[#allocation2 + $0x28]] }
 0x549   :  { %s6070_s7 = sld [smem:[#allocation2 + $0x34]]  ;;  %s6072_s8 = sld [smem:[#allocation2 + $0x40]] }
 0x608   :  { %v1288_v3 = vpop.f32.mrb[16].mxu0 }
 0x609   :  { %v1404_v60 = vmul.f32 %v1403_v43, %v1288_v3  ;;  %v1460_v61 = vmul.f32 %v1459_v16, %v1288_v3  ;;  %v1516_v63 = vmul.f32 %v1515_v44, %v1288_v3  ;;  %v1572_v17 = vmul.f32 %v1571_v27, %v1288_v3  ;;  %v5696_v23 = vpop.f32.mrb[16].mxu1  ;;  %v4531_v24 = vpop.f32.mrb[17].mxu0 }
 0x60a   :  { %v1628_v5 = vmul.f32 %v1627_v28, %v1288_v3  ;;  %v1684_v26 = vmul.f32 %v1683_v29, %v1288_v3  ;;  %v1740_v7 = vmul.f32 %v1739_v33, %v1288_v3  ;;  %v1796_v8 = vmul.f32 %v1795_v35, %v1288_v3  ;;  %v4538_v31 = vpop.f32.mrb[17].mxu1 }
 0x60b   :  { %v1405_v38 = vadd.f32 %v1404_v60, %v5539_v18  ;;  %v1461_v39 = vadd.f32 %v1460_v61, %v5542_v55  ;;  %v1517_v41 = vadd.f32 %v1516_v63, %v5544_v15  ;;  %v1573_v12 = vadd.f32 %v1572_v17, %v5546_v62 }
 0x60c   :  { %v1629_v43 = vadd.f32 %v1628_v5, %v5548_v25  ;;  %v1685_v16 = vadd.f32 %v1684_v26, %v5563_v9  ;;  %v1741_v44 = vadd.f32 %v1740_v7, %v5565_v13  ;;  %v1797_v27 = vadd.f32 %v1796_v8, %v5567_v20 }
 0x60d   :  { %v1852_v28 = vmul.f32 %v1851_v36, %v1288_v3  ;;  %v1908_v29 = vmul.f32 %v1907_v48, %v1288_v3  ;;  %v1964_v33 = vmul.f32 %v1963_v37, %v1288_v3  ;;  %v1408_v35 = vmul.f32 %v1407_v49, %v5696_v23  ;;  %v2054_v18 = vpop.f32.mrb[18].mxu0 }
 0x60e   :  { %v1464_v55 = vmul.f32 %v1463_v10, %v5696_v23  ;;  %v1520_v15 = vmul.f32 %v1519_v58, %v5696_v23  ;;  %v1576_v62 = vmul.f32 %v1575_v59, %v5696_v23  ;;  %v1632_v25 = vmul.f32 %v1631_v46, %v5696_v23  ;;  %v4545_v9 = vpop.f32.mrb[19].mxu0  ;;  %4551 = vmatmul.mubr.msk.f32.vlgmr.msra.gmra.mrb[18].mxu1 %vm48_vm4, %v2054_v18 }
 0x60f   :  { %v1853_v13 = vadd.f32 %v1852_v28, %v5569_v21  ;;  %v5714_v20 = vadd.f32 %v1908_v29, %v5573_v30  ;;  %v5717_v36 = vadd.f32 %v1964_v33, %v5575_v22  ;;  %v1409_v48 = vadd.f32 %v1408_v35, %v1405_v38  ;;  %4558 = vmatmul.mubr.msk.f32.vlgmr.msra.gmra.mrb[20].mxu0 %vm48_vm4, %v2054_v18  ;;  %v5726_v21 = vld [vmem:[%s6609_s16 + $0x8] sm:$0x7f] }
 0x610   :  { %v1465_v37 = vadd.f32 %v1464_v55, %v1461_v39  ;;  %v1521_v49 = vadd.f32 %v1520_v15, %v1517_v41  ;;  %v1577_v10 = vadd.f32 %v1576_v62, %v1573_v12  ;;  %v1633_v58 = vadd.f32 %v1632_v25, %v1629_v43  ;;  %4752 = vmatpush3.bf16.msk.msra.mxu1 %vm4893_vm2, %v5517_v32 }
 0x611   :  { %v1412_v30 = vadd.f32 %v1411_v50, %v1409_v48  ;;  %v1688_v22 = vmul.f32 %v1687_v51, %v5696_v23  ;;  %v1744_v59 = vmul.f32 %v1743_v56, %v5696_v23  ;;  %v1800_v46 = vmul.f32 %v1799_v57, %v5696_v23  ;;  %4564 = vmatprep.mubr.msk.f32.mxu1 %vm4848_vm3, %v4849_v6 }
 0x612   :  { %v1468_v3 = vadd.f32 %v1467_v34, %v1465_v37  ;;  %v1524_v32 = vadd.f32 %v1523_v42, %v1521_v49  ;;  %v1580_v12 = vadd.f32 %v1579_v45, %v1577_v10  ;;  %v1636_v60 = vadd.f32 %v1635_v47, %v1633_v58  ;;  %4756 = vmatpush3.bf16.msk.msra.mxu0 %vm4893_vm2, %v5588_v40 }
 0x613   :  { %v1413_v50 = vmax.f32 %v1412_v30, 1.1  ;;  %v1689_v51 = vadd.f32 %v1688_v22, %v1685_v16  ;;  %v1745_v56 = vadd.f32 %v1744_v59, %v1741_v44  ;;  %v1801_v57 = vadd.f32 %v1800_v46, %v1797_v27  ;;  %4565 = vmatmul.mubr.msk.f32.vlgmr.msra.gmra.mrb[20].mxu1 %vm48_vm4, %v5726_v21  ;;  %4757 = vmatprep.subr.bf16.mxu1 %v4846_v2 }
 0x614   :  { %v1469_v34 = vmax.f32 %v1468_v3, 1.1  ;;  %v1525_v42 = vmax.f32 %v1524_v32, 1.1  ;;  %v1581_v45 = vmax.f32 %v1580_v12, 1.1  ;;  %v1856_v47 = vmul.f32 %v1855_v52, %v5696_v23  ;;  %4760 = vmatpush3.bf16.msk.msra.mxu1 %vm4893_vm2, %v5593_v14  ;;  %4571 = vmatprep.mubr.msk.f32.mxu0 %vm4848_vm3, %v4849_v6 }
 0x615   :  { %v1414_v61 = vmin.f32 %v1413_v50, -0.9  ;;  %v1637_v63 = vmax.f32 %v1636_v60, 1.1  ;;  %v1692_v17 = vadd.f32 %v1691_v54, %v1689_v51  ;;  %v1748_v24 = vadd.f32 %v1747_v0, %v1745_v56  ;;  %4578 = vmatprep.mubr.msk.f32.mxu1 %vm4848_vm3, %v4849_v6  ;;  %4761 = vmatprep.subr.bf16.mxu0 %v4846_v2  ;;  %v4125_v32 = vld [vmem:[%s6612_s6 + $0x40] sm:$0xff] }
 0x616   :  { %v1470_v5 = vmin.f32 %v1469_v34, -0.9  ;;  %v1526_v52 = vmin.f32 %v1525_v42, -0.9  ;;  %v1582_v26 = vmin.f32 %v1581_v45, -0.9  ;;  %v1804_v7 = vadd.f32 %v1803_v1, %v1801_v57  ;;  %4765 = vmatprep.subr.bf16.mxu1 %v4846_v2 }
 0x617   :  { %v1415_v8 = vmax.f32 %v1414_v61, 0.0  ;;  %v1638_v31 = vmin.f32 %v1637_v63, -0.9  ;;  %v1693_v38 = vmax.f32 %v1692_v17, 1.1  ;;  %v1857_v54 = vadd.f32 %v1856_v47, %v1853_v13 }
 0x618   :  { %v1471_v0 = vmax.f32 %v1470_v5, 0.0  ;;  %v1527_v39 = vmax.f32 %v1526_v52, 0.0  ;;  %v1583_v41 = vmax.f32 %v1582_v26, 0.0  ;;  %v1749_v43 = vmax.f32 %v1748_v24, 1.1 }
 0x619   :  { %1417 = vst.msk [vmem:[%s6610_s20] sm:$0x7f] %vm1416_vm5, %v1415_v8  ;;  %v1639_v1 = vmax.f32 %v1638_v31, 0.0  ;;  %v1694_v16 = vmin.f32 %v1693_v38, -0.9  ;;  %v1860_v27 = vadd.f32 %v1859_v11, %v1857_v54  ;;  %v1912_v29 = vmul.f32 %v1911_v53, %v5696_v23 }
 0x61a   :  { %v1805_v44 = vmax.f32 %v1804_v7, 1.1  ;;  %3981 = vst.msk [vmem:[%s6610_s20 + $0x8] sm:$0x7f] %vm1416_vm5, %v1471_v0  ;;  %3995 = vst.msk [vmem:[%s6610_s20 + $0x10] sm:$0x7f] %vm1416_vm5, %v1527_v39  ;;  %v1915_v11 = vstv %s5739_s2  ;;  %v6611_v33 = vstv %s5663_s1 }
 0x61b   :  { %4009 = vst.msk [vmem:[%s6610_s20 + $0x18] sm:$0x7f] %vm1416_vm5, %v1583_v41  ;;  %v1750_v28 = vmin.f32 %v1749_v43, -0.9  ;;  %v1968_v35 = vmul.f32 %v6611_v33, %v5696_v23  ;;  %4023 = vst.msk [vmem:[%s6610_s20 + $0x20] sm:$0x7f] %vm1416_vm5, %v1639_v1  ;;  %v1971_v62 = vstv %s5744_s17  ;;  %v1913_v9 = vadd.f32 %v1912_v29, %v5714_v20 }
 0x61c   :  { %v1695_v18 = vmax.f32 %v1694_v16, 0.0  ;;  %v1806_v55 = vmin.f32 %v1805_v44, -0.9  ;;  %v1861_v15 = vmax.f32 %v1860_v27, 1.1  ;;  %s5833_s2 = sld [smem:[#allocation2 + $0x3c]]  ;;  %v3293_v59 = vstv %s5823_s11 }
 0x61d   :  { %v1751_v25 = vmax.f32 %v1750_v28, 0.0  ;;  %v1969_v13 = vadd.f32 %v1968_v35, %v5717_v36  ;;  %v1916_v48 = vadd.f32 %v1915_v11, %v1913_v9  ;;  %s5835_s17 = sld [smem:[#allocation2 + $0x48]]  ;;  %s5861_s1 = sld [smem:[#allocation2 + $0x61]]  ;;  %v3349_v46 = vstv %s5825_s12  ;;  %v4126_v12 = vld [vmem:[%s6612_s6 + $0x48] sm:$0x3] }
 0x61e   :  { %4037 = vst.msk [vmem:[%s6610_s20 + $0x28] sm:$0x7f] %vm1416_vm5, %v1695_v18  ;;  %v1807_v53 = vmax.f32 %v1806_v55, 0.0  ;;  %v1862_v23 = vmin.f32 %v1861_v15, -0.9  ;;  %v3405_v3 = vstv %s5827_s13  ;;  %v3461_v60 = vstv %s5829_s14  ;;  %s5945_s11 = sld [smem:[#allocation2 + $0x1a]] }
 0x61f   :  { %4051 = vst.msk [vmem:[%s6610_s20 + $0x30] sm:$0x7f] %vm1416_vm5, %v1751_v25  ;;  %v1972_v37 = vadd.f32 %v1971_v62, %v1969_v13  ;;  %v1917_v36 = vmax.f32 %v1916_v48, 1.1  ;;  %v3517_v50 = vstv %s5831_s15  ;;  %v3685_v57 = vstv %s5837_s18  ;;  %s5947_s12 = sld [smem:[#allocation2 + $0x26]]  ;;  %s5949_s13 = sld [smem:[#allocation2 + $0x32]] }
 0x620   :  { %4065 = vst.msk [vmem:[%s6610_s20 + $0x38] sm:$0x7f] %vm1416_vm5, %v1807_v53  ;;  %v1863_v20 = vmax.f32 %v1862_v23, 0.0  ;;  %v3741_v34 = vstv %s5839_s19  ;;  %v3797_v42 = vstv %s5841_s21  ;;  %v3853_v45 = vstv %s5843_s22  ;;  %s5951_s14 = sld [smem:[#allocation2 + $0x3e]]  ;;  %s5953_s15 = sld [smem:[#allocation2 + $0x4a]] }
 0x621   :  { %v1973_v49 = vmax.f32 %v1972_v37, 1.1  ;;  %v1918_v10 = vmin.f32 %v1917_v36, -0.9  ;;  %v3297_v47 = vstv %s5845_s23  ;;  %v3353_v61 = vstv %s5847_s24  ;;  %s5959_s18 = sld [smem:[#allocation2 + $0x6e]]  ;;  %s5961_s19 = sld [smem:[#allocation2 + $0x7a]] }
 0x622   :  { %4079 = vst.msk [vmem:[%s6610_s20 + $0x40] sm:$0x7f] %vm1416_vm5, %v1863_v20  ;;  %v3573_v51 = vstv %s5833_s2  ;;  %v3409_v63 = vstv %s5849_s25  ;;  %v5887_v17 = vpack.c.bf16 %v4126_v12, %v4125_v32  ;;  %v3465_v24 = vstv %s5851_s26  ;;  %s5955_s2 = sld [smem:[#allocation2 + $0x56]]  ;;  %s5963_s21 = sld [smem:[#allocation2 + $0x3]] }
 0x623   :  { %v1974_v58 = vmin.f32 %v1973_v49, -0.9  ;;  %v1919_v30 = vmax.f32 %v1918_v10, 0.0  ;;  %v3629_v56 = vstv %s5835_s17  ;;  %v3521_v5 = vstv %s5853_s0  ;;  %s5957_s17 = sld [smem:[#allocation2 + $0x62]]  ;;  %s5965_s22 = sld [smem:[#allocation2 + $0xf]] }
 0x624   :  { %v3577_v52 = vstv %s5855_s3  ;;  %v3633_v26 = vstv %s5857_s5  ;;  %v3689_v8 = vstv %s5859_s4  ;;  %v3745_v31 = vstv %s5861_s1  ;;  %s5967_s23 = sld [smem:[#allocation2 + $0x1b]]  ;;  %s5969_s24 = sld [smem:[#allocation2 + $0x27]] }
 0x625   :  { %v1975_v22 = vmax.f32 %v1974_v58, 0.0  ;;  %4093 = vst.msk [vmem:[%s6610_s20 + $0x48] sm:$0x7f] %vm1416_vm5, %v1919_v30  ;;  %v3801_v38 = vstv %s5863_s27  ;;  %v3857_v54 = vstv %s5865_s28  ;;  %s5971_s25 = sld [smem:[#allocation2 + $0x33]]  ;;  %s5973_s26 = sld [smem:[#allocation2 + $0x3f]] }
 0x626   :  { %s5975_s0 = sld [smem:[#allocation2 + $0x4b]]  ;;  %s5977_s3 = sld [smem:[#allocation2 + $0x57]] }
 0x627   :  { %4107 = vst.msk [vmem:[%s6610_s20 + $0x50] sm:$0x7f] %vm1416_vm5, %v1975_v22  ;;  %s5979_s5 = sld [smem:[#allocation2 + $0x63]]  ;;  %s5981_s4 = sld [smem:[#allocation2 + $0x6f]] }
 0x628   :  { %s5983_s1 = sld [smem:[#allocation2 + $0x7b]]  ;;  %s6062_s27 = sld [smem:[#allocation2 + $0x4]] }
 0x629   :  { %s6064_s28 = sld [smem:[#allocation2 + $0x10]]  ;;  %s6473_s20 = sld [smem:[#allocation2 + $0x83]] }
 0x6e1   :  { %v2132_v7 = vpop.f32.mrb[18].mxu1 }
 0x6e2   :  { %v3294_v0 = vmul.f32 %v3293_v59, %v2132_v7  ;;  %v3350_v39 = vmul.f32 %v3349_v46, %v2132_v7  ;;  %v3406_v41 = vmul.f32 %v3405_v3, %v2132_v7  ;;  %v3462_v43 = vmul.f32 %v3461_v60, %v2132_v7  ;;  %v2207_v1 = vpop.f32.mrb[20].mxu0  ;;  %v4552_v16 = vpop.f32.mrb[19].mxu1 }
 0x6e3   :  { %v3518_v44 = vmul.f32 %v3517_v50, %v2132_v7  ;;  %v3574_v27 = vmul.f32 %v3573_v51, %v2132_v7  ;;  %v3630_v28 = vmul.f32 %v3629_v56, %v2132_v7  ;;  %v3686_v29 = vmul.f32 %v3685_v57, %v2132_v7  ;;  %v4559_v11 = vpop.f32.mrb[21].mxu0 }
 0x6e4   :  { %v3742_v33 = vmul.f32 %v3741_v34, %v2132_v7  ;;  %v3798_v35 = vmul.f32 %v3797_v42, %v2132_v7  ;;  %v3854_v18 = vmul.f32 %v3853_v45, %v2132_v7  ;;  %v3298_v55 = vmul.f32 %v3297_v47, %v2207_v1 }
 0x6e5   :  { %v3354_v15 = vmul.f32 %v3353_v61, %v2207_v1  ;;  %v3410_v62 = vmul.f32 %v3409_v63, %v2207_v1  ;;  %v3466_v25 = vmul.f32 %v3465_v24, %v2207_v1  ;;  %v3522_v9 = vmul.f32 %v3521_v5, %v2207_v1 }
 0x6e6   :  { %v5897_v13 = vadd.f32 %v3298_v55, %v3294_v0  ;;  %v3578_v53 = vmul.f32 %v3577_v52, %v2207_v1  ;;  %v3634_v23 = vmul.f32 %v3633_v26, %v2207_v1  ;;  %v3690_v48 = vmul.f32 %v3689_v8, %v2207_v1  ;;  %v2281_v37 = vpop.f32.mrb[20].mxu1 }
 0x6e7   :  { %v5899_v20 = vadd.f32 %v3354_v15, %v3350_v39  ;;  %v5901_v36 = vadd.f32 %v3410_v62, %v3406_v41  ;;  %v5903_v49 = vadd.f32 %v3466_v25, %v3462_v43  ;;  %v5905_v10 = vadd.f32 %v3522_v9, %v3518_v44  ;;  %v4566_v58 = vpop.f32.mrb[21].mxu1  ;;  %4572 = vmatmul.mubr.msk.f32.vlgmr.msra.gmra.mrb[22].mxu0 %vm48_vm4, %v2281_v37 }
 0x6e8   :  { %v5908_v30 = vadd.f32 %v3578_v53, %v3574_v27  ;;  %v5910_v22 = vadd.f32 %v3634_v23, %v3630_v28  ;;  %v5912_v59 = vadd.f32 %v3690_v48, %v3686_v29  ;;  %v3746_v46 = vmul.f32 %v3745_v31, %v2207_v1  ;;  %4579 = vmatmul.mubr.msk.f32.vlgmr.msra.gmra.mrb[22].mxu1 %vm48_vm4, %v2281_v37 }
 0x6e9   :  { %v3802_v3 = vmul.f32 %v3801_v38, %v2207_v1  ;;  %v3858_v32 = vmul.f32 %v3857_v54, %v2207_v1  ;;  %4764 = vmatpush3.bf16.msk.msra.mxu0 %vm4893_vm2, %v5887_v17  ;;  %4585 = vmatprep.mubr.msk.f32.mxu0 %vm4848_vm3, %v4849_v6  ;;  %v3357_v51 = vstv %s5943_s10  ;;  %v3413_v56 = vstv %s5945_s11  ;;  %s6076_s10 = sld [smem:[#allocation2 + $0x58]]  ;;  %s6078_s11 = sld [smem:[#allocation2 + $0x64]] }
 0x6ea   :  { %v5920_v12 = vadd.f32 %v3746_v46, %v3742_v33  ;;  %4768 = vmatpush3.bf16.msk.msra.mxu1 %vm4893_vm2, %v5588_v40  ;;  %4769 = vmatprep.subr.bf16.mxu0 %v4846_v2  ;;  %v3469_v57 = vstv %s5947_s12  ;;  %v3525_v34 = vstv %s5949_s13  ;;  %v3581_v42 = vstv %s5951_s14  ;;  %s6080_s12 = sld [smem:[#allocation2 + $0x70]]  ;;  %s6082_s13 = sld [smem:[#allocation2 + $0x7c]] }
 0x6eb   :  { %v5926_v60 = vadd.f32 %v3802_v3, %v3798_v35  ;;  %v5928_v50 = vadd.f32 %v3858_v32, %v3854_v18  ;;  %4592 = vmatprep.mubr.msk.f32.mxu1 %vm4848_vm3, %v4849_v6  ;;  %4773 = vmatprep.subr.bf16.mxu1 %v4846_v2  ;;  %v3637_v45 = vstv %s5953_s15  ;;  %v3693_v47 = vstv %s5955_s2  ;;  %s6084_s14 = sld [smem:[#allocation2 + $0x5]]  ;;  %s6086_s15 = sld [smem:[#allocation2 + $0x11]] }
 0x6ec   :  { %4586 = vmatmul.mubr.msk.f32.vlgmr.msra.gmra.mrb[24].mxu0 %vm48_vm4, %v5556_v19  ;;  %v3301_v19 = vstv %s5941_s9  ;;  %v3749_v61 = vstv %s5957_s17  ;;  %v3805_v63 = vstv %s5959_s18  ;;  %v3861_v24 = vstv %s5961_s19  ;;  %s6074_s9 = sld [smem:[#allocation2 + $0x4c]]  ;;  %s6088_s2 = sld [smem:[#allocation2 + $0x1d]] }
 0x6ed   :  { %4772 = vmatpush3.bf16.msk.msra.mxu0 %vm4893_vm2, %v5593_v14  ;;  %4599 = vmatprep.mubr.msk.f32.mxu0 %vm4848_vm3, %v4849_v6  ;;  %v3305_v5 = vstv %s5963_s21  ;;  %v3361_v52 = vstv %s5965_s22  ;;  %v3417_v26 = vstv %s5967_s23  ;;  %v3473_v7 = vstv %s5969_s24  ;;  %s6090_s17 = sld [smem:[#allocation2 + $0x29]]  ;;  %s6092_s18 = sld [smem:[#allocation2 + $0x35]] }
 0x6ee   :  { %4777 = vmatprep.subr.bf16.mxu0 %v4846_v2  ;;  %v3529_v8 = vstv %s5971_s25  ;;  %v3585_v31 = vstv %s5973_s26  ;;  %v3641_v38 = vstv %s5975_s0  ;;  %v3697_v0 = vstv %s5977_s3  ;;  %s6094_s19 = sld [smem:[#allocation2 + $0x41]]  ;;  %s6096_s21 = sld [smem:[#allocation2 + $0x4d]] }
 0x6ef   :  { %v3753_v39 = vstv %s5979_s5  ;;  %v3809_v41 = vstv %s5981_s4  ;;  %v3865_v43 = vstv %s5983_s1  ;;  %s6098_s22 = sld [smem:[#allocation2 + $0x59]]  ;;  %s6100_s23 = sld [smem:[#allocation2 + $0x65]] }
 0x6f0   :  { %s6102_s24 = sld [smem:[#allocation2 + $0x71]]  ;;  %s6104_s25 = sld [smem:[#allocation2 + $0x7d]] }
 0x6f1   :  { %s6195_s1 = sld [smem:[#allocation2 + $0x12]]  ;;  %s6316_s26 = sld [smem:[#allocation2 + $0x20]] }
 0x6f2   :  { %s6318_s0 = sld [smem:[#allocation2 + $0x2c]]  ;;  %s6320_s3 = sld [smem:[#allocation2 + $0x38]] }
 0x6f3   :  { %s6322_s5 = sld [smem:[#allocation2 + $0x44]] }
 0x6f4   :  { %s6326_s4 = sld [smem:[#allocation2 + $0x5c]] }
 0x7ba   :  { %v2354_v54 = vpop.f32.mrb[22].mxu0 }
 0x7bb   :  { %v3302_v1 = vmul.f32 %v3301_v19, %v2354_v54  ;;  %v3358_v16 = vmul.f32 %v3357_v51, %v2354_v54  ;;  %v3414_v44 = vmul.f32 %v3413_v56, %v2354_v54  ;;  %v3470_v27 = vmul.f32 %v3469_v57, %v2354_v54  ;;  %v2424_v28 = vpop.f32.mrb[22].mxu1  ;;  %v4573_v29 = vpop.f32.mrb[23].mxu0 }
 0x7bc   :  { %v3526_v11 = vmul.f32 %v3525_v34, %v2354_v54  ;;  %v3582_v33 = vmul.f32 %v3581_v42, %v2354_v54  ;;  %v3638_v35 = vmul.f32 %v3637_v45, %v2354_v54  ;;  %v3694_v18 = vmul.f32 %v3693_v47, %v2354_v54  ;;  %v4580_v55 = vpop.f32.mrb[23].mxu1 }
 0x7bd   :  { %v3303_v15 = vadd.f32 %v3302_v1, %v5897_v13  ;;  %v3359_v62 = vadd.f32 %v3358_v16, %v5899_v20  ;;  %v3415_v25 = vadd.f32 %v3414_v44, %v5901_v36  ;;  %v3471_v9 = vadd.f32 %v3470_v27, %v5903_v49 }
 0x7be   :  { %v3527_v53 = vadd.f32 %v3526_v11, %v5905_v10  ;;  %v3583_v23 = vadd.f32 %v3582_v33, %v5908_v30  ;;  %v3639_v48 = vadd.f32 %v3638_v35, %v5910_v22  ;;  %v3695_v37 = vadd.f32 %v3694_v18, %v5912_v59 }
 0x7bf   :  { %v3750_v58 = vmul.f32 %v3749_v61, %v2354_v54  ;;  %v3806_v46 = vmul.f32 %v3805_v63, %v2354_v54  ;;  %v3862_v3 = vmul.f32 %v3861_v24, %v2354_v54  ;;  %v3306_v32 = vmul.f32 %v3305_v5, %v2424_v28  ;;  %v2500_v19 = vpop.f32.mrb[24].mxu0  ;;  %v4140_v54 = vld [vmem:[%s6612_s6 + $0x58] sm:$0x3] }
 0x7c0   :  { %v3362_v13 = vmul.f32 %v3361_v52, %v2424_v28  ;;  %v3418_v51 = vmul.f32 %v3417_v26, %v2424_v28  ;;  %v3474_v20 = vmul.f32 %v3473_v7, %v2424_v28  ;;  %v3530_v56 = vmul.f32 %v3529_v8, %v2424_v28  ;;  %v4587_v36 = vpop.f32.mrb[25].mxu0  ;;  %4593 = vmatmul.mubr.msk.f32.vlgmr.msra.gmra.mrb[24].mxu1 %vm48_vm4, %v2500_v19 }
 0x7c1   :  { %v3751_v49 = vadd.f32 %v3750_v58, %v5920_v12  ;;  %v3807_v10 = vadd.f32 %v3806_v46, %v5926_v60  ;;  %v3863_v30 = vadd.f32 %v3862_v3, %v5928_v50  ;;  %v6019_v22 = vadd.f32 %v3306_v32, %v3303_v15  ;;  %4600 = vmatmul.mubr.msk.f32.vlgmr.msra.gmra.mrb[26].mxu0 %vm48_vm4, %v2500_v19 }
 0x7c2   :  { %v6022_v59 = vadd.f32 %v3362_v13, %v3359_v62  ;;  %v6024_v57 = vadd.f32 %v3418_v51, %v3415_v25  ;;  %v6026_v34 = vadd.f32 %v3474_v20, %v3471_v9  ;;  %v6028_v42 = vadd.f32 %v3530_v56, %v3527_v53  ;;  %4776 = vmatpush3.bf16.msk.msra.mxu1 %vm4893_vm2, %v5887_v17 }
 0x7c3   :  { %v3586_v12 = vmul.f32 %v3585_v31, %v2424_v28  ;;  %v3642_v60 = vmul.f32 %v3641_v38, %v2424_v28  ;;  %v3698_v45 = vmul.f32 %v3697_v0, %v2424_v28  ;;  %v3754_v50 = vmul.f32 %v3753_v39, %v2424_v28  ;;  %4606 = vmatprep.mubr.msk.f32.mxu1 %vm4848_vm3, %v4849_v6  ;;  %v4139_v38 = vld [vmem:[%s6612_s6 + $0x50] sm:$0xff]  ;;  %s6324_s6 = sld [smem:[#allocation2 + $0x50]] }
 0x7c4   :  { %v3810_v47 = vmul.f32 %v3809_v41, %v2424_v28  ;;  %v3866_v61 = vmul.f32 %v3865_v43, %v2424_v28  ;;  %4780 = vmatpush3.bf16.msk.msra.mxu0 %vm4893_vm2, %v5588_v40  ;;  %4781 = vmatprep.subr.bf16.mxu1 %v4846_v2  ;;  %v3309_v7 = vstv %s6062_s27  ;;  %v3365_v8 = vstv %s6064_s28  ;;  %s6197_s27 = sld [smem:[#allocation2 + $0x1e]]  ;;  %s6199_s28 = sld [smem:[#allocation2 + $0x2a]] }
 0x7c5   :  { %v6039_v63 = vadd.f32 %v3586_v12, %v3583_v23  ;;  %v6041_v24 = vadd.f32 %v3642_v60, %v3639_v48  ;;  %v6043_v17 = vadd.f32 %v3698_v45, %v3695_v37  ;;  %v6045_v5 = vadd.f32 %v3754_v50, %v3751_v49  ;;  %4607 = vmatmul.mubr.msk.f32.vlgmr.msra.gmra.mrb[26].mxu1 %vm48_vm4, %v5726_v21 }
 0x7c6   :  { %v6049_v52 = vadd.f32 %v3810_v47, %v3807_v10  ;;  %v6051_v26 = vadd.f32 %v3866_v61, %v3863_v30  ;;  %4784 = vmatpush3.bf16.msk.msra.mxu1 %vm4893_vm2, %v5593_v14  ;;  %4613 = vmatprep.mubr.msk.f32.mxu0 %vm4848_vm3, %v4849_v6  ;;  %v3421_v31 = vstv %s6066_s29  ;;  %v3477_v0 = vstv %s6068_s30  ;;  %s6201_s29 = sld [smem:[#allocation2 + $0x36]]  ;;  %s6203_s30 = sld [smem:[#allocation2 + $0x42]] }
 0x7c7   :  { %4620 = vmatprep.mubr.msk.f32.mxu1 %vm4848_vm3, %v4849_v6  ;;  %4785 = vmatprep.subr.bf16.mxu0 %v4846_v2  ;;  %v3533_v39 = vstv %s6070_s7  ;;  %v3589_v41 = vstv %s6072_s8  ;;  %v3645_v43 = vstv %s6074_s9  ;;  %v3701_v1 = vstv %s6076_s10  ;;  %s6205_s7 = sld [smem:[#allocation2 + $0x4e]]  ;;  %s6207_s8 = sld [smem:[#allocation2 + $0x5a]] }
 0x7c8   :  { %4789 = vmatprep.subr.bf16.mxu1 %v4846_v2  ;;  %v3757_v16 = vstv %s6078_s11  ;;  %v3813_v44 = vstv %s6080_s12  ;;  %v3869_v27 = vstv %s6082_s13  ;;  %v3313_v28 = vstv %s6084_s14  ;;  %s6209_s9 = sld [smem:[#allocation2 + $0x66]]  ;;  %s6211_s10 = sld [smem:[#allocation2 + $0x72]] }
 0x7c9   :  { %v3369_v29 = vstv %s6086_s15  ;;  %v3425_v11 = vstv %s6088_s2  ;;  %v6126_v33 = vpack.c.bf16 %v4140_v54, %v4139_v38  ;;  %v3481_v35 = vstv %s6090_s17  ;;  %s6213_s11 = sld [smem:[#allocation2 + $0x7e]]  ;;  %s6215_s12 = sld [smem:[#allocation2 + $0x7]] }
 0x7ca   :  { %v3537_v18 = vstv %s6092_s18  ;;  %v3593_v55 = vstv %s6094_s19  ;;  %v3649_v15 = vstv %s6096_s21  ;;  %v3705_v25 = vstv %s6098_s22  ;;  %s6217_s13 = sld [smem:[#allocation2 + $0x13]]  ;;  %s6219_s14 = sld [smem:[#allocation2 + $0x1f]] }
 0x7cb   :  { %v3761_v9 = vstv %s6100_s23  ;;  %v3817_v53 = vstv %s6102_s24  ;;  %v3873_v23 = vstv %s6104_s25  ;;  %s6221_s15 = sld [smem:[#allocation2 + $0x2b]]  ;;  %s6223_s2 = sld [smem:[#allocation2 + $0x37]] }
 0x7cc   :  { %s6225_s17 = sld [smem:[#allocation2 + $0x43]]  ;;  %s6227_s18 = sld [smem:[#allocation2 + $0x4f]] }
 0x7cd   :  { %s6229_s19 = sld [smem:[#allocation2 + $0x5b]]  ;;  %s6231_s21 = sld [smem:[#allocation2 + $0x67]] }
 0x7ce   :  { %s6233_s22 = sld [smem:[#allocation2 + $0x73]]  ;;  %s6235_s23 = sld [smem:[#allocation2 + $0x7f]] }
 0x7cf   :  { %s6312_s24 = sld [smem:[#allocation2 + $0x8]]  ;;  %s6314_s25 = sld [smem:[#allocation2 + $0x14]] }
 0x7d5   :  { %v3381_v4 = vstv %s6314_s25  ;;  %s6431_s25 = sld [smem:[#allocation2 + $0x76]] }
 0x893   :  { %v2573_v62 = vpop.f32.mrb[24].mxu1 }
 0x894   :  { %v3310_v48 = vmul.f32 %v3309_v7, %v2573_v62  ;;  %v3366_v37 = vmul.f32 %v3365_v8, %v2573_v62  ;;  %v3422_v58 = vmul.f32 %v3421_v31, %v2573_v62  ;;  %v3478_v46 = vmul.f32 %v3477_v0, %v2573_v62  ;;  %v2643_v3 = vpop.f32.mrb[26].mxu0  ;;  %v4594_v32 = vpop.f32.mrb[25].mxu1 }
 0x895   :  { %v3534_v19 = vmul.f32 %v3533_v39, %v2573_v62  ;;  %v3590_v13 = vmul.f32 %v3589_v41, %v2573_v62  ;;  %v3646_v51 = vmul.f32 %v3645_v43, %v2573_v62  ;;  %v3702_v20 = vmul.f32 %v3701_v1, %v2573_v62  ;;  %v4601_v56 = vpop.f32.mrb[27].mxu0 }
 0x896   :  { %v3311_v36 = vadd.f32 %v3310_v48, %v6019_v22  ;;  %v3367_v49 = vadd.f32 %v3366_v37, %v6022_v59  ;;  %v3423_v10 = vadd.f32 %v3422_v58, %v6024_v57  ;;  %v3479_v30 = vadd.f32 %v3478_v46, %v6026_v34 }
 0x897   :  { %v3535_v12 = vadd.f32 %v3534_v19, %v6028_v42  ;;  %v3591_v60 = vadd.f32 %v3590_v13, %v6039_v63  ;;  %v3647_v45 = vadd.f32 %v3646_v51, %v6041_v24  ;;  %v3703_v50 = vadd.f32 %v3702_v20, %v6043_v17 }
 0x898   :  { %v3758_v47 = vmul.f32 %v3757_v16, %v2573_v62  ;;  %v3814_v61 = vmul.f32 %v3813_v44, %v2573_v62  ;;  %v3870_v7 = vmul.f32 %v3869_v27, %v2573_v62  ;;  %v3314_v8 = vmul.f32 %v3313_v28, %v2643_v3  ;;  %v2713_v31 = vpop.f32.mrb[26].mxu1 }
 0x899   :  { %v3370_v22 = vmul.f32 %v3369_v29, %v2643_v3  ;;  %v3426_v38 = vmul.f32 %v3425_v11, %v2643_v3  ;;  %v3482_v59 = vmul.f32 %v3481_v35, %v2643_v3  ;;  %v3538_v54 = vmul.f32 %v3537_v18, %v2643_v3  ;;  %v4608_v57 = vpop.f32.mrb[27].mxu1  ;;  %4614 = vmatmul.mubr.msk.f32.vlgmr.msra.gmra.mrb[28].mxu0 %vm48_vm4, %v2713_v31  ;;  %v4815_v11 = vld [vmem:[%s6609_s16] sm:$0x7f]  ;;  %s6193_s16 = sld [smem:[#allocation2 + $0x6]] }
 0x89a   :  { %v3759_v34 = vadd.f32 %v3758_v47, %v6045_v5  ;;  %v3815_v42 = vadd.f32 %v3814_v61, %v6049_v52  ;;  %v3871_v63 = vadd.f32 %v3870_v7, %v6051_v26  ;;  %v6148_v24 = vadd.f32 %v3314_v8, %v3311_v36  ;;  %4621 = vmatmul.mubr.msk.f32.vlgmr.msra.gmra.mrb[28].mxu1 %vm48_vm4, %v2713_v31 }
 0x89b   :  { %v6151_v17 = vadd.f32 %v3370_v22, %v3367_v49  ;;  %v6153_v0 = vadd.f32 %v3426_v38, %v3423_v10  ;;  %v6155_v39 = vadd.f32 %v3482_v59, %v3479_v30  ;;  %v6157_v41 = vadd.f32 %v3538_v54, %v3535_v12  ;;  %4788 = vmatpush3.bf16.msk.msra.mxu0 %vm4893_vm2, %v6126_v33 }
 0x89c   :  { %v3594_v5 = vmul.f32 %v3593_v55, %v2643_v3  ;;  %v3650_v52 = vmul.f32 %v3649_v15, %v2643_v3  ;;  %v3706_v43 = vmul.f32 %v3705_v25, %v2643_v3  ;;  %v3762_v26 = vmul.f32 %v3761_v9, %v2643_v3  ;;  %4627 = vmatprep.mubr.msk.f32.mxu0 %vm4848_vm3, %v4849_v6 }
 0x89d   :  { %v3818_v1 = vmul.f32 %v3817_v53, %v2643_v3  ;;  %v3874_v16 = vmul.f32 %v3873_v23, %v2643_v3  ;;  %4792 = vmatpush3.bf16.msk.msra.mxu1 %vm4893_vm2, %v5588_v40  ;;  %4793 = vmatprep.subr.bf16.mxu0 %v4846_v2  ;;  %v3373_v15 = vstv %s6195_s1  ;;  %v3429_v62 = vstv %s6197_s27  ;;  %s6330_s1 = sld [smem:[#allocation2 + $0x74]]  ;;  %s6332_s27 = sld [smem:[#allocation2 + $0x80]] }
 0x89e   :  { %v6168_v44 = vadd.f32 %v3594_v5, %v3591_v60  ;;  %v6170_v27 = vadd.f32 %v3650_v52, %v3647_v45  ;;  %v6172_v28 = vadd.f32 %v3706_v43, %v3703_v50  ;;  %v6174_v29 = vadd.f32 %v3762_v26, %v3759_v34  ;;  %4628 = vmatmul.mubr.msk.f32.vlgmr.msra.gmra.mrb[30].mxu0 %vm48_vm4, %v4815_v11 }
 0x89f   :  { %v6180_v35 = vadd.f32 %v3818_v1, %v3815_v42  ;;  %v6182_v18 = vadd.f32 %v3874_v16, %v3871_v63  ;;  %4796 = vmatpush3.bf16.msk.msra.mxu0 %vm4893_vm2, %v5593_v14  ;;  %4634 = vmatprep.mubr.msk.f32.mxu1 %vm4848_vm3, %v4849_v6  ;;  %v3317_v55 = vstv %s6193_s16  ;;  %v3485_v25 = vstv %s6199_s28  ;;  %s6328_s16 = sld [smem:[#allocation2 + $0x68]]  ;;  %s6334_s28 = sld [smem:[#allocation2 + $0x9]] }
 0x8a0   :  { %4641 = vmatprep.mubr.msk.f32.mxu0 %vm4848_vm3, %v4849_v6  ;;  %4797 = vmatprep.subr.bf16.mxu1 %v4846_v2  ;;  %v3541_v9 = vstv %s6201_s29  ;;  %v3597_v53 = vstv %s6203_s30  ;;  %v3653_v23 = vstv %s6205_s7  ;;  %v3709_v48 = vstv %s6207_s8  ;;  %s6336_s29 = sld [smem:[#allocation2 + $0x15]]  ;;  %s6338_s30 = sld [smem:[#allocation2 + $0x21]] }
 0x8a1   :  { %4801 = vmatprep.subr.bf16.mxu0 %v4846_v2  ;;  %v3765_v37 = vstv %s6209_s9  ;;  %v3821_v58 = vstv %s6211_s10  ;;  %v3877_v46 = vstv %s6213_s11  ;;  %v3321_v3 = vstv %s6215_s12  ;;  %s6340_s7 = sld [smem:[#allocation2 + $0x2d]]  ;;  %s6342_s8 = sld [smem:[#allocation2 + $0x39]] }
 0x8a2   :  { %v3377_v32 = vstv %s6217_s13  ;;  %v3433_v19 = vstv %s6219_s14  ;;  %v3489_v13 = vstv %s6221_s15  ;;  %v3545_v51 = vstv %s6223_s2  ;;  %s6344_s9 = sld [smem:[#allocation2 + $0x45]]  ;;  %s6346_s10 = sld [smem:[#allocation2 + $0x51]] }
 0x8a3   :  { %v3601_v20 = vstv %s6225_s17  ;;  %v3657_v56 = vstv %s6227_s18  ;;  %v3713_v49 = vstv %s6229_s19  ;;  %v3769_v10 = vstv %s6231_s21  ;;  %s6348_s11 = sld [smem:[#allocation2 + $0x5d]]  ;;  %s6350_s12 = sld [smem:[#allocation2 + $0x69]] }
 0x8a4   :  { %v3825_v30 = vstv %s6233_s22  ;;  %v3881_v12 = vstv %s6235_s23  ;;  %s6352_s13 = sld [smem:[#allocation2 + $0x75]]  ;;  %s6354_s14 = sld [smem:[#allocation2 + $0x81]] }
 0x8a5   :  { %s6413_s15 = sld [smem:[#allocation2 + $0xa]]  ;;  %s6415_s2 = sld [smem:[#allocation2 + $0x16]] }
 0x8a6   :  { %s6417_s17 = sld [smem:[#allocation2 + $0x22]]  ;;  %s6419_s18 = sld [smem:[#allocation2 + $0x2e]] }
 0x8a7   :  { %s6421_s19 = sld [smem:[#allocation2 + $0x3a]]  ;;  %s6423_s21 = sld [smem:[#allocation2 + $0x46]] }
 0x8a8   :  { %s6425_s22 = sld [smem:[#allocation2 + $0x52]]  ;;  %s6427_s23 = sld [smem:[#allocation2 + $0x5e]] }
 0x96c   :  { %v2786_v36 = vpop.f32.mrb[28].mxu0 }
 0x96d   :  { %v3318_v60 = vmul.f32 %v3317_v55, %v2786_v36  ;;  %v3374_v45 = vmul.f32 %v3373_v15, %v2786_v36  ;;  %v3430_v50 = vmul.f32 %v3429_v62, %v2786_v36  ;;  %v3486_v47 = vmul.f32 %v3485_v25, %v2786_v36  ;;  %v2856_v61 = vpop.f32.mrb[28].mxu1  ;;  %v4615_v7 = vpop.f32.mrb[29].mxu0 }
 0x96e   :  { %v3542_v8 = vmul.f32 %v3541_v9, %v2786_v36  ;;  %v3598_v31 = vmul.f32 %v3597_v53, %v2786_v36  ;;  %v3654_v22 = vmul.f32 %v3653_v23, %v2786_v36  ;;  %v3710_v38 = vmul.f32 %v3709_v48, %v2786_v36  ;;  %v4622_v59 = vpop.f32.mrb[29].mxu1 }
 0x96f   :  { %v3319_v54 = vadd.f32 %v3318_v60, %v6148_v24  ;;  %v3375_v57 = vadd.f32 %v3374_v45, %v6151_v17  ;;  %v3431_v34 = vadd.f32 %v3430_v50, %v6153_v0  ;;  %v3487_v42 = vadd.f32 %v3486_v47, %v6155_v39 }
 0x970   :  { %v3543_v63 = vadd.f32 %v3542_v8, %v6157_v41  ;;  %v3599_v5 = vadd.f32 %v3598_v31, %v6168_v44  ;;  %v3655_v52 = vadd.f32 %v3654_v22, %v6170_v27  ;;  %v3711_v43 = vadd.f32 %v3710_v38, %v6172_v28 }
 0x971   :  { %v3766_v26 = vmul.f32 %v3765_v37, %v2786_v36  ;;  %v3822_v1 = vmul.f32 %v3821_v58, %v2786_v36  ;;  %v3878_v16 = vmul.f32 %v3877_v46, %v2786_v36  ;;  %v3322_v11 = vmul.f32 %v3321_v3, %v2856_v61  ;;  %v2932_v55 = vpop.f32.mrb[30].mxu0 }
 0x972   :  { %v3378_v24 = vmul.f32 %v3377_v32, %v2856_v61  ;;  %v3434_v15 = vmul.f32 %v3433_v19, %v2856_v61  ;;  %v3490_v17 = vmul.f32 %v3489_v13, %v2856_v61  ;;  %v3546_v62 = vmul.f32 %v3545_v51, %v2856_v61  ;;  %v4629_v0 = vpop.f32.mrb[31].mxu0  ;;  %4635 = vmatmul.mubr.msk.f32.vlgmr.msra.gmra.mrb[30].mxu1 %vm48_vm4, %v2932_v55 }
 0x973   :  { %v3767_v39 = vadd.f32 %v3766_v26, %v6174_v29  ;;  %v3823_v41 = vadd.f32 %v3822_v1, %v6180_v35  ;;  %v3879_v44 = vadd.f32 %v3878_v16, %v6182_v18  ;;  %v6271_v27 = vadd.f32 %v3322_v11, %v3319_v54  ;;  %4642 = vmatmul.mubr.msk.f32.vlgmr.msra.gmra.mrb[32].mxu0 %vm48_vm4, %v2932_v55 }
 0x974   :  { %v6274_v28 = vadd.f32 %v3378_v24, %v3375_v57  ;;  %v6276_v25 = vadd.f32 %v3434_v15, %v3431_v34  ;;  %v6278_v9 = vadd.f32 %v3490_v17, %v3487_v42  ;;  %v6280_v53 = vadd.f32 %v3546_v62, %v3543_v63  ;;  %4800 = vmatpush3.bf16.msk.msra.mxu1 %vm4893_vm2, %v6126_v33 }
 0x975   :  { %v3602_v29 = vmul.f32 %v3601_v20, %v2856_v61  ;;  %v3658_v35 = vmul.f32 %v3657_v56, %v2856_v61  ;;  %v3714_v23 = vmul.f32 %v3713_v49, %v2856_v61  ;;  %v3770_v18 = vmul.f32 %v3769_v10, %v2856_v61  ;;  %4648 = vmatprep.mubr.msk.f32.mxu1 %vm4848_vm3, %v4849_v6 }
 0x976   :  { %v3826_v48 = vmul.f32 %v3825_v30, %v2856_v61  ;;  %v3882_v37 = vmul.f32 %v3881_v12, %v2856_v61  ;;  %4804 = vmatpush3.bf16.msk.msra.mxu0 %vm4893_vm2, %v5588_v40  ;;  %4805 = vmatprep.subr.bf16.mxu1 %v4846_v2  ;;  %v3325_v2 = vstv %s6312_s24  ;;  %v3493_v40 = vstv %s6318_s0  ;;  %s6429_s24 = sld [smem:[#allocation2 + $0x6a]]  ;;  %s6435_s0 = sld [smem:[#allocation2 + $0xb]] }
 0x977   :  { %v6291_v58 = vadd.f32 %v3602_v29, %v3599_v5  ;;  %v6293_v46 = vadd.f32 %v3658_v35, %v3655_v52  ;;  %v6295_v33 = vadd.f32 %v3714_v23, %v3711_v43  ;;  %v6297_v3 = vadd.f32 %v3770_v18, %v3767_v39  ;;  %4649 = vmatmul.mubr.msk.f32.vlgmr.msra.gmra.mrb[32].mxu1 %vm48_vm4, %v5726_v21 }
 0x978   :  { %v6301_v32 = vadd.f32 %v3826_v48, %v3823_v41  ;;  %v6303_v19 = vadd.f32 %v3882_v37, %v3879_v44  ;;  %4808 = vmatpush3.bf16.msk.msra.mxu1 %vm4893_vm2, %v5593_v14  ;;  %4655 = vmatprep.mubr.msk.f32.mxu0 %vm4848_vm3, %v4849_v6  ;;  %v3549_v14 = vstv %s6320_s3  ;;  %v3605_v21 = vstv %s6322_s5  ;;  %s6437_s3 = sld [smem:[#allocation4]]  ;;  %s6439_s5 = sld [smem:[#allocation2 + $0x17]] }
 0x979   :  { %4662 = vmatprep.mubr.msk.f32.mxu1 %vm4848_vm3, %v4849_v6  ;;  %v3437_v6 = vstv %s6316_s26  ;;  %v3661_v13 = vstv %s6324_s6  ;;  %v3717_v51 = vstv %s6326_s4  ;;  %v3773_v20 = vstv %s6328_s16  ;;  %s6433_s26 = sld [smem:[#allocation2 + $0x82]]  ;;  %s6441_s6 = sld [smem:[#allocation2 + $0x23]] }
 0x97a   :  { %v3829_v56 = vstv %s6330_s1  ;;  %v3885_v36 = vstv %s6332_s27  ;;  %v3329_v49 = vstv %s6334_s28  ;;  %v3385_v10 = vstv %s6336_s29  ;;  %s6443_s4 = sld [smem:[#allocation2 + $0x2f]]  ;;  %s6445_s16 = sld [smem:[#allocation2 + $0x3b]] }
 0x97b   :  { %v3441_v30 = vstv %s6338_s30  ;;  %v3497_v12 = vstv %s6340_s7  ;;  %v3553_v60 = vstv %s6342_s8  ;;  %v3609_v45 = vstv %s6344_s9  ;;  %s6447_s1 = sld [smem:[#allocation4 + $0x1]]  ;;  %s6449_s27 = sld [smem:[#allocation4 + $0x2]] }
 0x97c   :  { %v3665_v50 = vstv %s6346_s10  ;;  %v3721_v61 = vstv %s6348_s11  ;;  %v3777_v7 = vstv %s6350_s12  ;;  %v3833_v8 = vstv %s6352_s13  ;;  %s6451_s28 = sld [smem:[#allocation4 + $0x3]]  ;;  %s6453_s29 = sld [smem:[#allocation4 + $0x4]] }
 0x97d   :  { %v3889_v31 = vstv %s6354_s14  ;;  %s6455_s30 = sld [smem:[#allocation2 + $0x47]]  ;;  %s6457_s7 = sld [smem:[#allocation4 + $0x5]] }
 0x97e   :  { %s6459_s8 = sld [smem:[#allocation2 + $0x53]]  ;;  %s6461_s9 = sld [smem:[#allocation4 + $0x6]] }
 0x97f   :  { %s6463_s10 = sld [smem:[#allocation2 + $0x5f]]  ;;  %s6467_s12 = sld [smem:[#allocation2 + $0x6b]] }
 0x980   :  { %s6465_s11 = sld [smem:[#allocation4 + $0x7]]  ;;  %s6469_s13 = sld [smem:[#allocation4 + $0x8]] }
 0x981   :  { %s6471_s14 = sld [smem:[#allocation2 + $0x77]] }
 0xa45   :  { %v3005_v47 = vpop.f32.mrb[30].mxu1 }
 0xa46   :  { %v3326_v22 = vmul.f32 %v3325_v2, %v3005_v47  ;;  %v3382_v38 = vmul.f32 %v3381_v4, %v3005_v47  ;;  %v3438_v59 = vmul.f32 %v3437_v6, %v3005_v47  ;;  %v3494_v54 = vmul.f32 %v3493_v40, %v3005_v47  ;;  %v3075_v57 = vpop.f32.mrb[32].mxu0  ;;  %v4636_v34 = vpop.f32.mrb[31].mxu1 }
 0xa47   :  { %v3550_v42 = vmul.f32 %v3549_v14, %v3005_v47  ;;  %v3606_v63 = vmul.f32 %v3605_v21, %v3005_v47  ;;  %v3662_v5 = vmul.f32 %v3661_v13, %v3005_v47  ;;  %v3718_v52 = vmul.f32 %v3717_v51, %v3005_v47  ;;  %v4643_v43 = vpop.f32.mrb[33].mxu0 }
 0xa48   :  { %v3327_v26 = vadd.f32 %v3326_v22, %v6271_v27  ;;  %v3383_v1 = vadd.f32 %v3382_v38, %v6274_v28  ;;  %v3439_v16 = vadd.f32 %v3438_v59, %v6276_v25  ;;  %v3495_v11 = vadd.f32 %v3494_v54, %v6278_v9 }
 0xa49   :  { %v3551_v55 = vadd.f32 %v3550_v42, %v6280_v53  ;;  %v3607_v24 = vadd.f32 %v3606_v63, %v6291_v58  ;;  %v3663_v15 = vadd.f32 %v3662_v5, %v6293_v46  ;;  %v3719_v17 = vadd.f32 %v3718_v52, %v6295_v33 }
 0xa4a   :  { %v3774_v62 = vmul.f32 %v3773_v20, %v3005_v47  ;;  %v3830_v0 = vmul.f32 %v3829_v56, %v3005_v47  ;;  %v3886_v39 = vmul.f32 %v3885_v36, %v3005_v47  ;;  %v3330_v41 = vmul.f32 %v3329_v49, %v3075_v57  ;;  %v3145_v44 = vpop.f32.mrb[32].mxu1 }
 0xa4b   :  { %v3386_v27 = vmul.f32 %v3385_v10, %v3075_v57  ;;  %v3442_v29 = vmul.f32 %v3441_v30, %v3075_v57  ;;  %v3498_v28 = vmul.f32 %v3497_v12, %v3075_v57  ;;  %v3554_v35 = vmul.f32 %v3553_v60, %v3075_v57  ;;  %v4650_v25 = vpop.f32.mrb[33].mxu1  ;;  %4656 = vmatmul.mubr.msk.f32.vlgmr.msra.gmra.mrb[34].mxu0 %vm48_vm4, %v3145_v44 }
 0xa4c   :  { %v3775_v9 = vadd.f32 %v3774_v62, %v6297_v3  ;;  %v3831_v53 = vadd.f32 %v3830_v0, %v6301_v32  ;;  %v3887_v23 = vadd.f32 %v3886_v39, %v6303_v19  ;;  %v6390_v18 = vadd.f32 %v3330_v41, %v3327_v26  ;;  %4663 = vmatmul.mubr.msk.f32.vlgmr.msra.gmra.mrb[34].mxu1 %vm48_vm4, %v3145_v44 }
 0xa4d   :  { %v6393_v48 = vadd.f32 %v3386_v27, %v3383_v1  ;;  %v6395_v37 = vadd.f32 %v3442_v29, %v3439_v16  ;;  %v6397_v58 = vadd.f32 %v3498_v28, %v3495_v11  ;;  %v6399_v46 = vadd.f32 %v3554_v35, %v3551_v55 }
 0xa4e   :  { %v3610_v33 = vmul.f32 %v3609_v45, %v3075_v57  ;;  %v3666_v2 = vmul.f32 %v3665_v50, %v3075_v57  ;;  %v3722_v4 = vmul.f32 %v3721_v61, %v3075_v57  ;;  %v3778_v3 = vmul.f32 %v3777_v7, %v3075_v57 }
 0xa4f   :  { %v3834_v6 = vmul.f32 %v3833_v8, %v3075_v57  ;;  %v3890_v32 = vmul.f32 %v3889_v31, %v3075_v57  ;;  %v3333_v20 = vstv %s6413_s15  ;;  %v3389_v56 = vstv %s6415_s2  ;;  %s6527_s15 = sld [smem:[#allocation4 + $0x9]]  ;;  %s6529_s2 = sld [smem:[#allocation4 + $0xa]] }
 0xa50   :  { %v6401_v40 = vadd.f32 %v3610_v33, %v3607_v24  ;;  %v6403_v19 = vadd.f32 %v3666_v2, %v3663_v15  ;;  %v6405_v14 = vadd.f32 %v3722_v4, %v3719_v17  ;;  %v6407_v21 = vadd.f32 %v3778_v3, %v3775_v9 }
 0xa51   :  { %v6409_v13 = vadd.f32 %v3834_v6, %v3831_v53  ;;  %v6411_v51 = vadd.f32 %v3890_v32, %v3887_v23  ;;  %v3445_v36 = vstv %s6417_s17  ;;  %v3501_v49 = vstv %s6419_s18 }
 0xa52   :  { %v3557_v10 = vstv %s6421_s19  ;;  %v3613_v30 = vstv %s6423_s21  ;;  %v3669_v12 = vstv %s6425_s22  ;;  %v3725_v60 = vstv %s6427_s23  ;;  %s6613_s19 = sld [smem:[#allocation10_spill]] }
 0xa53   :  { %v3781_v45 = vstv %s6429_s24  ;;  %v3837_v50 = vstv %s6431_s25  ;;  %v3893_v47 = vstv %s6433_s26  ;;  %v3337_v61 = vstv %s6435_s0 }
 0xa54   :  { %v3341_v7 = vstv %s6437_s3  ;;  %v3393_v8 = vstv %s6439_s5  ;;  %v3449_v31 = vstv %s6441_s6  ;;  %v3397_v22 = vstv %s6447_s1 }
 0xa55   :  { %v3453_v38 = vstv %s6449_s27  ;;  %v3505_v59 = vstv %s6443_s4  ;;  %v3561_v54 = vstv %s6445_s16  ;;  %v3509_v57 = vstv %s6451_s28 }
 0xa56   :  { %v3565_v34 = vstv %s6453_s29  ;;  %v3617_v42 = vstv %s6455_s30  ;;  %v3621_v63 = vstv %s6457_s7  ;;  %v3673_v5 = vstv %s6459_s8 }
 0xa57   :  { %v3677_v52 = vstv %s6461_s9  ;;  %v3729_v43 = vstv %s6463_s10  ;;  %v3733_v26 = vstv %s6465_s11  ;;  %v3785_v16 = vstv %s6467_s12 }
 0xa58   :  { %v3789_v11 = vstv %s6469_s13  ;;  %v3841_v55 = vstv %s6471_s14  ;;  %v3897_v24 = vstv %s6473_s20 }
 0xb1e   :  { %v3218_v1 = vpop.f32.mrb[34].mxu0 }
 0xb1f   :  { %v3334_v15 = vmul.f32 %v3333_v20, %v3218_v1  ;;  %v3390_v17 = vmul.f32 %v3389_v56, %v3218_v1  ;;  %v3446_v62 = vmul.f32 %v3445_v36, %v3218_v1  ;;  %v3502_v0 = vmul.f32 %v3501_v49, %v3218_v1  ;;  %v6506_v39 = vpop.f32.mrb[34].mxu1  ;;  %v4657_v41 = vpop.f32.mrb[35].mxu0 }
 0xb20   :  { %v3558_v44 = vmul.f32 %v3557_v10, %v3218_v1  ;;  %v3614_v27 = vmul.f32 %v3613_v30, %v3218_v1  ;;  %v3670_v29 = vmul.f32 %v3669_v12, %v3218_v1  ;;  %v3726_v28 = vmul.f32 %v3725_v60, %v3218_v1  ;;  %v4664_v35 = vpop.f32.mrb[35].mxu1 }
 0xb21   :  { %v3335_v25 = vadd.f32 %v3334_v15, %v6390_v18  ;;  %v3391_v9 = vadd.f32 %v3390_v17, %v6393_v48  ;;  %v3447_v53 = vadd.f32 %v3446_v62, %v6395_v37  ;;  %v3503_v23 = vadd.f32 %v3502_v0, %v6397_v58 }
 0xb22   :  { %v3559_v33 = vadd.f32 %v3558_v44, %v6399_v46  ;;  %v3615_v2 = vadd.f32 %v3614_v27, %v6401_v40  ;;  %v3671_v4 = vadd.f32 %v3670_v29, %v6403_v19  ;;  %v3727_v3 = vadd.f32 %v3726_v28, %v6405_v14 }
 0xb23   :  { %v3782_v6 = vmul.f32 %v3781_v45, %v3218_v1  ;;  %v3838_v32 = vmul.f32 %v3837_v50, %v3218_v1  ;;  %v3894_v20 = vmul.f32 %v3893_v47, %v3218_v1  ;;  %v3338_v56 = vmul.f32 %v3337_v61, %v6506_v39 }
 0xb24   :  { %v3394_v18 = vmul.f32 %v3393_v8, %v6506_v39  ;;  %v3450_v48 = vmul.f32 %v3449_v31, %v6506_v39  ;;  %v3506_v37 = vmul.f32 %v3505_v59, %v6506_v39  ;;  %v3562_v58 = vmul.f32 %v3561_v54, %v6506_v39 }
 0xb25   :  { %v3783_v46 = vadd.f32 %v3782_v6, %v6407_v21  ;;  %v3839_v40 = vadd.f32 %v3838_v32, %v6409_v13  ;;  %v3895_v19 = vadd.f32 %v3894_v20, %v6411_v51  ;;  %v3339_v14 = vadd.f32 %v3338_v56, %v3335_v25 }
 0xb26   :  { %v3395_v36 = vadd.f32 %v3394_v18, %v3391_v9  ;;  %v3451_v49 = vadd.f32 %v3450_v48, %v3447_v53  ;;  %v3507_v10 = vadd.f32 %v3506_v37, %v3503_v23  ;;  %v3563_v30 = vadd.f32 %v3562_v58, %v3559_v33 }
 0xb27   :  { %v3342_v12 = vadd.f32 %v3341_v7, %v3339_v14  ;;  %v3618_v60 = vmul.f32 %v3617_v42, %v6506_v39  ;;  %v3674_v45 = vmul.f32 %v3673_v5, %v6506_v39  ;;  %v3730_v50 = vmul.f32 %v3729_v43, %v6506_v39 }
 0xb28   :  { %v3398_v47 = vadd.f32 %v3397_v22, %v3395_v36  ;;  %v3454_v61 = vadd.f32 %v3453_v38, %v3451_v49  ;;  %v3510_v21 = vadd.f32 %v3509_v57, %v3507_v10  ;;  %v3566_v13 = vadd.f32 %v3565_v34, %v3563_v30 }
 0xb29   :  { %v3343_v51 = vmax.f32 %v3342_v12, 1.1  ;;  %v3619_v8 = vadd.f32 %v3618_v60, %v3615_v2  ;;  %v3675_v31 = vadd.f32 %v3674_v45, %v3671_v4  ;;  %v3731_v59 = vadd.f32 %v3730_v50, %v3727_v3 }
 0xb2a   :  { %v3399_v7 = vmax.f32 %v3398_v47, 1.1  ;;  %v3455_v54 = vmax.f32 %v3454_v61, 1.1  ;;  %v3511_v42 = vmax.f32 %v3510_v21, 1.1  ;;  %v3786_v5 = vmul.f32 %v3785_v16, %v6506_v39 }
 0xb2b   :  { %v3344_v22 = vmin.f32 %v3343_v51, -0.9  ;;  %v3567_v43 = vmax.f32 %v3566_v13, 1.1  ;;  %v3622_v38 = vadd.f32 %v3621_v63, %v3619_v8  ;;  %v3678_v57 = vadd.f32 %v3677_v52, %v3675_v31 }
 0xb2c   :  { %v3400_v34 = vmin.f32 %v3399_v7, -0.9  ;;  %v3456_v1 = vmin.f32 %v3455_v54, -0.9  ;;  %v3512_v15 = vmin.f32 %v3511_v42, -0.9  ;;  %v3734_v17 = vadd.f32 %v3733_v26, %v3731_v59 }
 0xb2d   :  { %v3345_v62 = vmax.f32 %v3344_v22, 0.0  ;;  %v3568_v0 = vmin.f32 %v3567_v43, -0.9  ;;  %v3623_v41 = vmax.f32 %v3622_v38, 1.1  ;;  %v3787_v44 = vadd.f32 %v3786_v5, %v3783_v46 }
 0xb2e   :  { %v3401_v16 = vmax.f32 %v3400_v34, 0.0  ;;  %v3457_v27 = vmax.f32 %v3456_v1, 0.0  ;;  %v3513_v29 = vmax.f32 %v3512_v15, 0.0  ;;  %v3679_v28 = vmax.f32 %v3678_v57, 1.1 }
 0xb2f   :  { %4164 = vst.msk [vmem:[%s6613_s19 + $0x58] sm:$0x7f] %vm1416_vm5, %v3345_v62  ;;  %v3569_v63 = vmax.f32 %v3568_v0, 0.0  ;;  %v3624_v52 = vmin.f32 %v3623_v41, -0.9  ;;  %v3790_v35 = vadd.f32 %v3789_v11, %v3787_v44  ;;  %v3842_v9 = vmul.f32 %v3841_v55, %v6506_v39 }
 0xb30   :  { %v3735_v26 = vmax.f32 %v3734_v17, 1.1  ;;  %4178 = vst.msk [vmem:[%s6613_s19 + $0x60] sm:$0x7f] %vm1416_vm5, %v3401_v16  ;;  %4192 = vst.msk [vmem:[%s6613_s19 + $0x68] sm:$0x7f] %vm1416_vm5, %v3457_v27  ;;  %v3845_v11 = vstv %s6527_s15  ;;  %v3898_v53 = vmul.f32 %v3897_v24, %v6506_v39  ;;  %v3901_v4 = vstv %s6529_s2 }
 0xb31   :  { %4206 = vst.msk [vmem:[%s6613_s19 + $0x70] sm:$0x7f] %vm1416_vm5, %v3513_v29  ;;  %v3680_v25 = vmin.f32 %v3679_v28, -0.9  ;;  %4220 = vst.msk [vmem:[%s6613_s19 + $0x78] sm:$0x7f] %vm1416_vm5, %v3569_v63  ;;  %v3843_v6 = vadd.f32 %v3842_v9, %v3839_v40 }
 0xb32   :  { %v3625_v23 = vmax.f32 %v3624_v52, 0.0  ;;  %v3736_v33 = vmin.f32 %v3735_v26, -0.9  ;;  %v3791_v2 = vmax.f32 %v3790_v35, 1.1  ;;  %v3899_v32 = vadd.f32 %v3898_v53, %v3895_v19 }
 0xb33   :  { %v3681_v3 = vmax.f32 %v3680_v25, 0.0  ;;  %v3846_v24 = vadd.f32 %v3845_v11, %v3843_v6 }
 0xb34   :  { %4234 = vst.msk [vmem:[%s6613_s19 + $0x80] sm:$0x7f] %vm1416_vm5, %v3625_v23  ;;  %v3737_v55 = vmax.f32 %v3736_v33, 0.0  ;;  %v3792_v20 = vmin.f32 %v3791_v2, -0.9  ;;  %v3902_v39 = vadd.f32 %v3901_v4, %v3899_v32 }
 0xb35   :  { %4248 = vst.msk [vmem:[%s6613_s19 + $0x88] sm:$0x7f] %vm1416_vm5, %v3681_v3  ;;  %v3847_v18 = vmax.f32 %v3846_v24, 1.1 }
 0xb36   :  { %4262 = vst.msk [vmem:[%s6613_s19 + $0x90] sm:$0x7f] %vm1416_vm5, %v3737_v55  ;;  %v3793_v56 = vmax.f32 %v3792_v20, 0.0  ;;  %v3903_v48 = vmax.f32 %v3902_v39, 1.1 }
 0xb37   :  { %v3848_v37 = vmin.f32 %v3847_v18, -0.9 }
 0xb38   :  { %4276 = vst.msk [vmem:[%s6613_s19 + $0x98] sm:$0x7f] %vm1416_vm5, %v3793_v56  ;;  %v3904_v58 = vmin.f32 %v3903_v48, -0.9 }
 0xb39   :  { %v3849_v46 = vmax.f32 %v3848_v37, 0.0 }
 0xb3a   :  { %v3905_v40 = vmax.f32 %v3904_v58, 0.0 }
 0xb3b   :  { %4290 = vst.msk [vmem:[%s6613_s19 + $0xa0] sm:$0x7f] %vm1416_vm5, %v3849_v46 }
 0xb3c   :  { %4304 = vst.msk [vmem:[%s6613_s19 + $0xa8] sm:$0x7f] %vm1416_vm5, %v3905_v40 }
 0xb3d   :  { %3912 = vsyncpa [#allocation3], 1 }
 0xb3e   :  { %3913 = vsyncpa [#allocation5], 1 }

</bundles_post_ra>
